<compile_context>
chip_gen: v5e
topology: v5e:2x2
jax: 0.10.0
libtpu: 0.0.40
codegen_flags: <defaults>
</compile_context>

<pallas_src>
import numpy as np
import jax
import jax.numpy as jnp
from jax.experimental import pallas as pl
from jax.experimental.pallas import tpu as pltpu

# tuple = (out_ch, kernel, stride), list = ["B", num_repeats], "P" = prediction.
CONFIG = [
    (16, 3, 1),
    (32, 3, 2),
    ["B", 1],
    (64, 3, 2),
    ["B", 2],
    "P",
]
NUM_CLASSES = 18
BN_EPS = 1e-5
LEAKY_SLOPE = 0.1
PAD_Q = 8          # sublane-aligned leading/trailing pad rows in the scratch


# -----------------------------------------------------------------------------
# Plan construction: flatten CONFIG into per-conv descriptors (shapes + flags).
# -----------------------------------------------------------------------------
def _conv_out_len(L, K, stride, pad):
    return (L + 2 * pad - K) // stride + 1


def build_plan(in_channels, L0):
    plan = []
    C, L = in_channels, L0

    def add(C_in, C_out, K, stride, pad, use_bn_act, L_in,
            save_res=False, add_res=False):
        L_out = _conv_out_len(L_in, K, stride, pad)
        needs_pad = not (K == 1 and stride == 1 and pad == 0)
        if needs_pad:
            # Flat shifted-window trick needs a uniform per-sample offset.
            # TODO(synk): generalize with per-sample windows if this ever trips.
            assert L_in == stride * L_out, (L_in, stride, L_out)
        # Taps whose input index l*s + k - p ever leaves [0, L_in) need a mask.
        leak_taps = tuple(
            k for k in range(K)
            if (k - pad < 0) or ((L_out - 1) * stride + k - pad >= L_in))
        plan.append(dict(
            C_in=C_in, C_out=C_out, K=K, stride=stride, pad=pad,
            L_in=L_in, L_out=L_out, use_bn_act=use_bn_act,
            save_res=save_res, add_res=add_res,
            needs_pad=needs_pad, leak_taps=leak_taps))
        return L_out, C_out

    for module in CONFIG:
        if isinstance(module, tuple):
            out_ch, k, s = module
            L, C = add(C, out_ch, k, s, 1 if k == 3 else 0, True, L)
        elif isinstance(module, list):
            num_repeats = module[1]
            for _ in range(num_repeats):
                L_mid, C_mid = add(C, C // 2, 1, 1, 0, True, L, save_res=True)
                L, C = add(C_mid, C, 3, 1, 1, True, L_mid, add_res=True)
        elif module == "P":
            L, C = add(C, 2 * C, 3, 1, 1, True, L)
            L, C = add(C, 1, 1, 1, 0, False, L)
    return plan, L


# -----------------------------------------------------------------------------
# Host-precomputed per-tap row masks (rows = N*L_out, 1): zero out output rows
# whose shifted read would cross a sample boundary in the flat layout.
# -----------------------------------------------------------------------------
def make_tap_mask(N, L_in, L_out, stride, pad, k):
    m = np.zeros((L_out, 1), np.float32)
    for l in range(L_out):
        j = l * stride + k - pad
        m[l, 0] = 1.0 if 0 <= j < L_in else 0.0
    return jnp.asarray(np.tile(m, (N, 1)))


# -----------------------------------------------------------------------------
# Deterministic parameter / operand construction (mirrors module __init__).
# Operand order MUST match the order the fused kernel consumes refs.
# -----------------------------------------------------------------------------
class _KeyGen:
    def __init__(self, seed):
        self._key = jax.random.PRNGKey(seed)

    def __call__(self):
        self._key, k = jax.random.split(self._key)
        return k


def build_operands(plan, N, seed=0):
    kg = _KeyGen(seed)
    ops = []
    for m in plan:
        for k in m["leak_taps"]:
            ops.append(make_tap_mask(N, m["L_in"], m["L_out"],
                                     m["stride"], m["pad"], k))
        # Conv weight in PyTorch layout (C_out, C_in, K) -> per-tap (K, C_in, C_out),
        # shipped bf16 for the MXU.
        w = 0.1 * jax.random.normal(kg(), (m["C_out"], m["C_in"], m["K"]),
                                    jnp.float32)
        ops.append(jnp.transpose(w, (2, 1, 0)).astype(jnp.bfloat16))
        if m["use_bn_act"]:
            ops.append(jnp.ones((1, m["C_out"]), jnp.float32))   # BN gamma
            ops.append(jnp.zeros((1, m["C_out"]), jnp.float32))  # BN beta
        else:
            ops.append(0.05 * jax.random.normal(kg(), (1, m["C_out"]),
                                                jnp.float32))    # conv bias
    return ops


def _num_operands(plan):
    return sum(len(m["leak_taps"]) + 1 + (2 if m["use_bn_act"] else 1)
               for m in plan)


# -----------------------------------------------------------------------------
# The single fused Pallas kernel: whole network, activations stay on-chip.
# -----------------------------------------------------------------------------
def make_fused_kernel(plan, N):
    n_ops = _num_operands(plan)

    def kernel(*refs):
        x_ref = refs[0]
        prm = refs[1:1 + n_ops]
        out_ref = refs[1 + n_ops]
        scratch = refs[2 + n_ops:]

        X = x_ref[...]                      # (N*L0, C_in) channels-last rows, f32
        saved = None
        oi = 0
        si = 0
        for m in plan:
            K, s, p = m["K"], m["stride"], m["pad"]
            rows_in = N * m["L_in"]
            rows_out = N * m["L_out"]

            mask_refs = {}
            for k in m["leak_taps"]:
                mask_refs[k] = prm[oi]; oi += 1
            W_ref = prm[oi]; oi += 1                     # (K, C_in, C_out) bf16
            if m["use_bn_act"]:
                gamma_ref, beta_ref = prm[oi], prm[oi + 1]; oi += 2
            else:
                bias_ref = prm[oi]; oi += 1

            if m["save_res"]:
                saved = X                    # residual input (x of the repeat)

            if m["needs_pad"]:
                # Zero-padded flat copy of the layer input in VMEM scratch;
                # each tap is a shifted (strided for s>1) window read of it.
                pad_ref = scratch[si]; si += 1
                pad_ref[...] = jnp.zeros(pad_ref.shape, jnp.float32)
                pad_ref[PAD_Q:PAD_Q + rows_in, :] = X
                acc = None
                for k in range(K):
                    start = PAD_Q + k - p
                    if s == 1:
                        win = pad_ref[pl.ds(start, rows_out), :]
                    else:
                        win = pad_ref[pl.ds(start, rows_out, stride=s), :]
                    if k in mask_refs:       # zero rows that crossed a sample edge
                        win = win * mask_refs[k][...]
                    term = jnp.dot(win.astype(jnp.bfloat16), W_ref[k],
                                   preferred_element_type=jnp.float32)
                    acc = term if acc is None else acc + term
            else:                            # 1x1 conv, stride 1, no pad
                acc = jnp.dot(X.astype(jnp.bfloat16), W_ref[0],
                              preferred_element_type=jnp.float32)

            if m["use_bn_act"]:
                # Training-mode BatchNorm1d over all N*L rows (biased variance),
                # folded into a single affine, then LeakyReLU(0.1).  f32 epilogue.
                inv_cnt = 1.0 / rows_out
                mean = jnp.sum(acc, axis=0, keepdims=True) * inv_cnt
                var = jnp.sum(acc * acc, axis=0, keepdims=True) * inv_cnt \
                    - mean * mean
                var = jnp.maximum(var, 0.0)              # guard rsqrt vs f32 noise
                scale = gamma_ref[...] * jax.lax.rsqrt(var + BN_EPS)
                shift = beta_ref[...] - mean * scale
                y = acc * scale + shift
                X = jnp.maximum(y, LEAKY_SLOPE * y)      # LeakyReLU(0.1)
            else:
                X = acc + bias_ref[...]                  # plain conv with bias

            if m["add_res"]:
                X = X + saved                            # fused residual add

        # TODO(synk): final store is lane-width 1 (masked vst); negligible here.
        out_ref[...] = X.astype(out_ref.dtype)           # (N*L_final, 1)

    return kernel


# -----------------------------------------------------------------------------
# Forward wrapper: single gridless pallas_call; layout ops only at the boundary.
# -----------------------------------------------------------------------------
_VMEM = pl.BlockSpec(memory_space=pltpu.MemorySpace.VMEM)


def _tile_bytes(shape, dtype):
    """Conservative (8,128)-tile-padded VMEM footprint of one array."""
    shape = tuple(int(d) for d in shape)
    if len(shape) < 2:
        shape = (1,) * (2 - len(shape)) + shape
    *lead, r, c = shape
    rp = -(-r // 8) * 8
    cp = -(-c // 128) * 128
    n = 1
    for d in lead:
        n *= int(d)
    return n * rp * cp * jnp.dtype(dtype).itemsize


def tsc_resnet_forward(x_ncl, operands, plan, num_classes):
    N, C_in, L0 = x_ncl.shape
    # NCL -> channels-last (N*L, C); the only layout op outside the kernel.
    X0 = jnp.transpose(x_ncl, (0, 2, 1)).reshape(N * L0, C_in)
    rows_final = N * plan[-1]["L_out"]

    scratch_shapes = [
        pltpu.VMEM((2 * PAD_Q + N * m["L_in"], m["C_in"]), jnp.float32)
        for m in plan if m["needs_pad"]
    ]

    footprint = _tile_bytes(X0.shape, X0.dtype)
    footprint += _tile_bytes((rows_final, 1), jnp.float32)
    footprint += sum(_tile_bytes(op.shape, op.dtype) for op in operands)
    footprint += sum(_tile_bytes((2 * PAD_Q + N * m["L_in"], m["C_in"]),
                                 jnp.float32) for m in plan if m["needs_pad"])
    vmem_limit = int(min(max(4 * footprint + (16 << 20), 32 << 20), 48 << 20))

    out_col = pl.pallas_call(
        make_fused_kernel(plan, N),
        out_shape=jax.ShapeDtypeStruct((rows_final, 1), jnp.float32),
        in_specs=[_VMEM] * (1 + len(operands)),
        out_specs=_VMEM,
        scratch_shapes=scratch_shapes,
        compiler_params=pltpu.CompilerParams(vmem_limit_bytes=vmem_limit),
    )(X0, *operands)

    # PredictionBlock: (N, 1, L) -> (N, num_classes) with L_final == num_classes.
    return out_col.reshape(N, num_classes)


# -----------------------------------------------------------------------------
if __name__ == "__main__":
    batch, in_channels, length = 2, 3, 72   # length chosen so "P" sees L == 18
    x = jax.random.normal(jax.random.PRNGKey(0), (batch, in_channels, length),
                          jnp.float32)

    plan, L_final = build_plan(in_channels, length)
    assert L_final == NUM_CLASSES, (
        f"prediction head sees L={L_final}, expected num_classes={NUM_CLASSES}")
    operands = build_operands(plan, batch, seed=0)

    @jax.jit
    def fwd(xx, ops):
        return tsc_resnet_forward(xx, ops, plan, NUM_CLASSES)

    out = jax.block_until_ready(fwd(x, operands))

    assert out.shape == (batch, NUM_CLASSES), out.shape
    assert bool(jnp.all(jnp.isfinite(out)))
    print("KERNEL_OK")
</pallas_src>

<mosaic_0001>
module attributes {stable_mosaic.version = 11 : i64} {
  func.func @kernel(%arg0: memref<144x3xf32, #tpu.memory_space<vmem>>, %arg1: memref<144x1xf32, #tpu.memory_space<vmem>>, %arg2: memref<144x1xf32, #tpu.memory_space<vmem>>, %arg3: memref<3x3x16xbf16, #tpu.memory_space<vmem>>, %arg4: memref<1x16xf32, #tpu.memory_space<vmem>>, %arg5: memref<1x16xf32, #tpu.memory_space<vmem>>, %arg6: memref<72x1xf32, #tpu.memory_space<vmem>>, %arg7: memref<3x16x32xbf16, #tpu.memory_space<vmem>>, %arg8: memref<1x32xf32, #tpu.memory_space<vmem>>, %arg9: memref<1x32xf32, #tpu.memory_space<vmem>>, %arg10: memref<1x32x16xbf16, #tpu.memory_space<vmem>>, %arg11: memref<1x16xf32, #tpu.memory_space<vmem>>, %arg12: memref<1x16xf32, #tpu.memory_space<vmem>>, %arg13: memref<72x1xf32, #tpu.memory_space<vmem>>, %arg14: memref<72x1xf32, #tpu.memory_space<vmem>>, %arg15: memref<3x16x32xbf16, #tpu.memory_space<vmem>>, %arg16: memref<1x32xf32, #tpu.memory_space<vmem>>, %arg17: memref<1x32xf32, #tpu.memory_space<vmem>>, %arg18: memref<36x1xf32, #tpu.memory_space<vmem>>, %arg19: memref<3x32x64xbf16, #tpu.memory_space<vmem>>, %arg20: memref<1x64xf32, #tpu.memory_space<vmem>>, %arg21: memref<1x64xf32, #tpu.memory_space<vmem>>, %arg22: memref<1x64x32xbf16, #tpu.memory_space<vmem>>, %arg23: memref<1x32xf32, #tpu.memory_space<vmem>>, %arg24: memref<1x32xf32, #tpu.memory_space<vmem>>, %arg25: memref<36x1xf32, #tpu.memory_space<vmem>>, %arg26: memref<36x1xf32, #tpu.memory_space<vmem>>, %arg27: memref<3x32x64xbf16, #tpu.memory_space<vmem>>, %arg28: memref<1x64xf32, #tpu.memory_space<vmem>>, %arg29: memref<1x64xf32, #tpu.memory_space<vmem>>, %arg30: memref<1x64x32xbf16, #tpu.memory_space<vmem>>, %arg31: memref<1x32xf32, #tpu.memory_space<vmem>>, %arg32: memref<1x32xf32, #tpu.memory_space<vmem>>, %arg33: memref<36x1xf32, #tpu.memory_space<vmem>>, %arg34: memref<36x1xf32, #tpu.memory_space<vmem>>, %arg35: memref<3x32x64xbf16, #tpu.memory_space<vmem>>, %arg36: memref<1x64xf32, #tpu.memory_space<vmem>>, %arg37: memref<1x64xf32, #tpu.memory_space<vmem>>, %arg38: memref<36x1xf32, #tpu.memory_space<vmem>>, %arg39: memref<36x1xf32, #tpu.memory_space<vmem>>, %arg40: memref<3x64x128xbf16, #tpu.memory_space<vmem>>, %arg41: memref<1x128xf32, #tpu.memory_space<vmem>>, %arg42: memref<1x128xf32, #tpu.memory_space<vmem>>, %arg43: memref<1x128x1xbf16, #tpu.memory_space<vmem>>, %arg44: memref<1x1xf32, #tpu.memory_space<vmem>>, %arg45: memref<36x1xf32, #tpu.memory_space<vmem>>, %arg46: memref<160x3xf32, #tpu.memory_space<vmem>>, %arg47: memref<160x16xf32, #tpu.memory_space<vmem>>, %arg48: memref<88x16xf32, #tpu.memory_space<vmem>>, %arg49: memref<88x32xf32, #tpu.memory_space<vmem>>, %arg50: memref<52x32xf32, #tpu.memory_space<vmem>>, %arg51: memref<52x32xf32, #tpu.memory_space<vmem>>, %arg52: memref<52x64xf32, #tpu.memory_space<vmem>>) attributes {dimension_semantics = [], scalar_prefetch = 0 : i64, scratch_operands = 7 : i64, tpu.core_type = #tpu.core_type<tc>} {
    %c0 = arith.constant 0 : index
    %c0_0 = arith.constant 0 : index
    %0 = vector.load %arg0[%c0, %c0_0] : memref<144x3xf32, #tpu.memory_space<vmem>>, vector<144x3xf32>
    %cst = arith.constant 0.000000e+00 : f32
    %1 = vector.broadcast %cst : f32 to vector<160x3xf32>
    %c0_1 = arith.constant 0 : index
    %c0_2 = arith.constant 0 : index
    %2 = vector.load %arg46[%c0_1, %c0_2] : memref<160x3xf32, #tpu.memory_space<vmem>>, vector<160x3xf32>
    tpu.vector_store %arg46[%c0_1, %c0_2], %1 {strides = array<i32>} : memref<160x3xf32, #tpu.memory_space<vmem>>, vector<160x3xf32>,
    %c8 = arith.constant 8 : index
    %c0_3 = arith.constant 0 : index
    %3 = vector.load %arg46[%c8, %c0_3] : memref<160x3xf32, #tpu.memory_space<vmem>>, vector<144x3xf32>
    tpu.vector_store %arg46[%c8, %c0_3], %0 {strides = array<i32>} : memref<160x3xf32, #tpu.memory_space<vmem>>, vector<144x3xf32>,
    %c7 = arith.constant 7 : index
    %c0_4 = arith.constant 0 : index
    %4 = vector.load %arg46[%c7, %c0_4] : memref<160x3xf32, #tpu.memory_space<vmem>>, vector<144x3xf32>
    %c0_5 = arith.constant 0 : index
    %c0_6 = arith.constant 0 : index
    %5 = vector.load %arg1[%c0_5, %c0_6] : memref<144x1xf32, #tpu.memory_space<vmem>>, vector<144x1xf32>
    %6 = vector.broadcast %5 : vector<144x1xf32> to vector<144x3xf32>
    %7 = arith.mulf %4, %6 : vector<144x3xf32>
    %8 = arith.truncf %7 : vector<144x3xf32> to vector<144x3xbf16>
    %c0_7 = arith.constant 0 : index
    %c0_8 = arith.constant 0 : index
    %c0_9 = arith.constant 0 : index
    %9 = vector.load %arg3[%c0_7, %c0_8, %c0_9] : memref<3x3x16xbf16, #tpu.memory_space<vmem>>, vector<1x3x16xbf16>
    %10 = vector.shape_cast %9 : vector<1x3x16xbf16> to vector<3x16xbf16>
    %cst_10 = arith.constant dense<0.000000e+00> : vector<144x16xf32>
    %11 = tpu.matmul %8, %10, %cst_10 {dimension_numbers = #tpu.dot_dimension_numbers<[1], [0], [0], [1], [0, 0, 1, 1], [], []>} : vector<144x3xbf16>, vector<3x16xbf16>, vector<144x16xf32> -> vector<144x16xf32>
    %c8_11 = arith.constant 8 : index
    %c0_12 = arith.constant 0 : index
    %12 = vector.load %arg46[%c8_11, %c0_12] : memref<160x3xf32, #tpu.memory_space<vmem>>, vector<144x3xf32>
    %13 = arith.truncf %12 : vector<144x3xf32> to vector<144x3xbf16>
    %c1 = arith.constant 1 : index
    %c0_13 = arith.constant 0 : index
    %c0_14 = arith.constant 0 : index
    %14 = vector.load %arg3[%c1, %c0_13, %c0_14] : memref<3x3x16xbf16, #tpu.memory_space<vmem>>, vector<1x3x16xbf16>
    %15 = vector.shape_cast %14 : vector<1x3x16xbf16> to vector<3x16xbf16>
    %cst_15 = arith.constant dense<0.000000e+00> : vector<144x16xf32>
    %16 = tpu.matmul %13, %15, %cst_15 {dimension_numbers = #tpu.dot_dimension_numbers<[1], [0], [0], [1], [0, 0, 1, 1], [], []>} : vector<144x3xbf16>, vector<3x16xbf16>, vector<144x16xf32> -> vector<144x16xf32>
    %17 = arith.addf %11, %16 : vector<144x16xf32>
    %c9 = arith.constant 9 : index
    %c0_16 = arith.constant 0 : index
    %18 = vector.load %arg46[%c9, %c0_16] : memref<160x3xf32, #tpu.memory_space<vmem>>, vector<144x3xf32>
    %c0_17 = arith.constant 0 : index
    %c0_18 = arith.constant 0 : index
    %19 = vector.load %arg2[%c0_17, %c0_18] : memref<144x1xf32, #tpu.memory_space<vmem>>, vector<144x1xf32>
    %20 = vector.broadcast %19 : vector<144x1xf32> to vector<144x3xf32>
    %21 = arith.mulf %18, %20 : vector<144x3xf32>
    %22 = arith.truncf %21 : vector<144x3xf32> to vector<144x3xbf16>
    %c2 = arith.constant 2 : index
    %c0_19 = arith.constant 0 : index
    %c0_20 = arith.constant 0 : index
    %23 = vector.load %arg3[%c2, %c0_19, %c0_20] : memref<3x3x16xbf16, #tpu.memory_space<vmem>>, vector<1x3x16xbf16>
    %24 = vector.shape_cast %23 : vector<1x3x16xbf16> to vector<3x16xbf16>
    %cst_21 = arith.constant dense<0.000000e+00> : vector<144x16xf32>
    %25 = tpu.matmul %22, %24, %cst_21 {dimension_numbers = #tpu.dot_dimension_numbers<[1], [0], [0], [1], [0, 0, 1, 1], [], []>} : vector<144x3xbf16>, vector<3x16xbf16>, vector<144x16xf32> -> vector<144x16xf32>
    %26 = arith.addf %17, %25 : vector<144x16xf32>
    %cst_22 = arith.constant dense<0.000000e+00> : vector<16xf32>
    %27 = vector.multi_reduction <add>, %26, %cst_22 [0] : vector<144x16xf32> to vector<16xf32>
    %28 = vector.shape_cast %27 : vector<16xf32> to vector<1x16xf32>
    %cst_23 = arith.constant 0.0069444445 : f32
    %29 = vector.broadcast %cst_23 : f32 to vector<1x16xf32>
    %30 = arith.mulf %28, %29 : vector<1x16xf32>
    %31 = arith.mulf %26, %26 : vector<144x16xf32>
    %cst_24 = arith.constant dense<0.000000e+00> : vector<16xf32>
    %32 = vector.multi_reduction <add>, %31, %cst_24 [0] : vector<144x16xf32> to vector<16xf32>
    %33 = vector.shape_cast %32 : vector<16xf32> to vector<1x16xf32>
    %cst_25 = arith.constant 0.0069444445 : f32
    %34 = vector.broadcast %cst_25 : f32 to vector<1x16xf32>
    %35 = arith.mulf %33, %34 : vector<1x16xf32>
    %36 = arith.mulf %30, %30 : vector<1x16xf32>
    %37 = arith.subf %35, %36 : vector<1x16xf32>
    %cst_26 = arith.constant 0.000000e+00 : f32
    %38 = vector.broadcast %cst_26 : f32 to vector<1x16xf32>
    %39 = arith.maximumf %37, %38 : vector<1x16xf32>
    %c0_27 = arith.constant 0 : index
    %c0_28 = arith.constant 0 : index
    %40 = vector.load %arg4[%c0_27, %c0_28] : memref<1x16xf32, #tpu.memory_space<vmem>>, vector<1x16xf32>
    %cst_29 = arith.constant 9.99999974E-6 : f32
    %41 = vector.broadcast %cst_29 : f32 to vector<1x16xf32>
    %42 = arith.addf %39, %41 : vector<1x16xf32>
    %43 = math.rsqrt %42 : vector<1x16xf32>
    %44 = arith.mulf %40, %43 : vector<1x16xf32>
    %c0_30 = arith.constant 0 : index
    %c0_31 = arith.constant 0 : index
    %45 = vector.load %arg5[%c0_30, %c0_31] : memref<1x16xf32, #tpu.memory_space<vmem>>, vector<1x16xf32>
    %46 = arith.mulf %30, %44 : vector<1x16xf32>
    %47 = arith.subf %45, %46 : vector<1x16xf32>
    %48 = vector.broadcast %44 : vector<1x16xf32> to vector<144x16xf32>
    %49 = arith.mulf %26, %48 : vector<144x16xf32>
    %50 = vector.broadcast %47 : vector<1x16xf32> to vector<144x16xf32>
    %51 = arith.addf %49, %50 : vector<144x16xf32>
    %cst_32 = arith.constant 1.000000e-01 : f32
    %52 = vector.broadcast %cst_32 : f32 to vector<144x16xf32>
    %53 = arith.mulf %52, %51 : vector<144x16xf32>
    %54 = arith.maximumf %51, %53 : vector<144x16xf32>
    %cst_33 = arith.constant 0.000000e+00 : f32
    %55 = vector.broadcast %cst_33 : f32 to vector<160x16xf32>
    %c0_34 = arith.constant 0 : index
    %c0_35 = arith.constant 0 : index
    %56 = vector.load %arg47[%c0_34, %c0_35] : memref<160x16xf32, #tpu.memory_space<vmem>>, vector<160x16xf32>
    tpu.vector_store %arg47[%c0_34, %c0_35], %55 {strides = array<i32>} : memref<160x16xf32, #tpu.memory_space<vmem>>, vector<160x16xf32>,
    %c8_36 = arith.constant 8 : index
    %c0_37 = arith.constant 0 : index
    %57 = vector.load %arg47[%c8_36, %c0_37] : memref<160x16xf32, #tpu.memory_space<vmem>>, vector<144x16xf32>
    tpu.vector_store %arg47[%c8_36, %c0_37], %54 {strides = array<i32>} : memref<160x16xf32, #tpu.memory_space<vmem>>, vector<144x16xf32>,
    %c7_38 = arith.constant 7 : index
    %c0_39 = arith.constant 0 : index
    %58 = tpu.strided_load %arg47[%c7_38, %c0_39] {strides = array<i32: 2, 1>} : memref<160x16xf32, #tpu.memory_space<vmem>>, vector<72x16xf32>
    %c0_40 = arith.constant 0 : index
    %c0_41 = arith.constant 0 : index
    %59 = vector.load %arg6[%c0_40, %c0_41] : memref<72x1xf32, #tpu.memory_space<vmem>>, vector<72x1xf32>
    %60 = vector.broadcast %59 : vector<72x1xf32> to vector<72x16xf32>
    %61 = arith.mulf %58, %60 : vector<72x16xf32>
    %62 = arith.truncf %61 : vector<72x16xf32> to vector<72x16xbf16>
    %c0_42 = arith.constant 0 : index
    %c0_43 = arith.constant 0 : index
    %c0_44 = arith.constant 0 : index
    %63 = vector.load %arg7[%c0_42, %c0_43, %c0_44] : memref<3x16x32xbf16, #tpu.memory_space<vmem>>, vector<1x16x32xbf16>
    %64 = vector.shape_cast %63 : vector<1x16x32xbf16> to vector<16x32xbf16>
    %cst_45 = arith.constant dense<0.000000e+00> : vector<72x32xf32>
    %65 = tpu.matmul %62, %64, %cst_45 {dimension_numbers = #tpu.dot_dimension_numbers<[1], [0], [0], [1], [0, 0, 1, 1], [], []>} : vector<72x16xbf16>, vector<16x32xbf16>, vector<72x32xf32> -> vector<72x32xf32>
    %c8_46 = arith.constant 8 : index
    %c0_47 = arith.constant 0 : index
    %66 = tpu.strided_load %arg47[%c8_46, %c0_47] {strides = array<i32: 2, 1>} : memref<160x16xf32, #tpu.memory_space<vmem>>, vector<72x16xf32>
    %67 = arith.truncf %66 : vector<72x16xf32> to vector<72x16xbf16>
    %c1_48 = arith.constant 1 : index
    %c0_49 = arith.constant 0 : index
    %c0_50 = arith.constant 0 : index
    %68 = vector.load %arg7[%c1_48, %c0_49, %c0_50] : memref<3x16x32xbf16, #tpu.memory_space<vmem>>, vector<1x16x32xbf16>
    %69 = vector.shape_cast %68 : vector<1x16x32xbf16> to vector<16x32xbf16>
    %cst_51 = arith.constant dense<0.000000e+00> : vector<72x32xf32>
    %70 = tpu.matmul %67, %69, %cst_51 {dimension_numbers = #tpu.dot_dimension_numbers<[1], [0], [0], [1], [0, 0, 1, 1], [], []>} : vector<72x16xbf16>, vector<16x32xbf16>, vector<72x32xf32> -> vector<72x32xf32>
    %71 = arith.addf %65, %70 : vector<72x32xf32>
    %c9_52 = arith.constant 9 : index
    %c0_53 = arith.constant 0 : index
    %72 = tpu.strided_load %arg47[%c9_52, %c0_53] {strides = array<i32: 2, 1>} : memref<160x16xf32, #tpu.memory_space<vmem>>, vector<72x16xf32>
    %73 = arith.truncf %72 : vector<72x16xf32> to vector<72x16xbf16>
    %c2_54 = arith.constant 2 : index
    %c0_55 = arith.constant 0 : index
    %c0_56 = arith.constant 0 : index
    %74 = vector.load %arg7[%c2_54, %c0_55, %c0_56] : memref<3x16x32xbf16, #tpu.memory_space<vmem>>, vector<1x16x32xbf16>
    %75 = vector.shape_cast %74 : vector<1x16x32xbf16> to vector<16x32xbf16>
    %cst_57 = arith.constant dense<0.000000e+00> : vector<72x32xf32>
    %76 = tpu.matmul %73, %75, %cst_57 {dimension_numbers = #tpu.dot_dimension_numbers<[1], [0], [0], [1], [0, 0, 1, 1], [], []>} : vector<72x16xbf16>, vector<16x32xbf16>, vector<72x32xf32> -> vector<72x32xf32>
    %77 = arith.addf %71, %76 : vector<72x32xf32>
    %cst_58 = arith.constant dense<0.000000e+00> : vector<32xf32>
    %78 = vector.multi_reduction <add>, %77, %cst_58 [0] : vector<72x32xf32> to vector<32xf32>
    %79 = vector.shape_cast %78 : vector<32xf32> to vector<1x32xf32>
    %cst_59 = arith.constant 0.013888889 : f32
    %80 = vector.broadcast %cst_59 : f32 to vector<1x32xf32>
    %81 = arith.mulf %79, %80 : vector<1x32xf32>
    %82 = arith.mulf %77, %77 : vector<72x32xf32>
    %cst_60 = arith.constant dense<0.000000e+00> : vector<32xf32>
    %83 = vector.multi_reduction <add>, %82, %cst_60 [0] : vector<72x32xf32> to vector<32xf32>
    %84 = vector.shape_cast %83 : vector<32xf32> to vector<1x32xf32>
    %cst_61 = arith.constant 0.013888889 : f32
    %85 = vector.broadcast %cst_61 : f32 to vector<1x32xf32>
    %86 = arith.mulf %84, %85 : vector<1x32xf32>
    %87 = arith.mulf %81, %81 : vector<1x32xf32>
    %88 = arith.subf %86, %87 : vector<1x32xf32>
    %cst_62 = arith.constant 0.000000e+00 : f32
    %89 = vector.broadcast %cst_62 : f32 to vector<1x32xf32>
    %90 = arith.maximumf %88, %89 : vector<1x32xf32>
    %c0_63 = arith.constant 0 : index
    %c0_64 = arith.constant 0 : index
    %91 = vector.load %arg8[%c0_63, %c0_64] : memref<1x32xf32, #tpu.memory_space<vmem>>, vector<1x32xf32>
    %cst_65 = arith.constant 9.99999974E-6 : f32
    %92 = vector.broadcast %cst_65 : f32 to vector<1x32xf32>
    %93 = arith.addf %90, %92 : vector<1x32xf32>
    %94 = math.rsqrt %93 : vector<1x32xf32>
    %95 = arith.mulf %91, %94 : vector<1x32xf32>
    %c0_66 = arith.constant 0 : index
    %c0_67 = arith.constant 0 : index
    %96 = vector.load %arg9[%c0_66, %c0_67] : memref<1x32xf32, #tpu.memory_space<vmem>>, vector<1x32xf32>
    %97 = arith.mulf %81, %95 : vector<1x32xf32>
    %98 = arith.subf %96, %97 : vector<1x32xf32>
    %99 = vector.broadcast %95 : vector<1x32xf32> to vector<72x32xf32>
    %100 = arith.mulf %77, %99 : vector<72x32xf32>
    %101 = vector.broadcast %98 : vector<1x32xf32> to vector<72x32xf32>
    %102 = arith.addf %100, %101 : vector<72x32xf32>
    %cst_68 = arith.constant 1.000000e-01 : f32
    %103 = vector.broadcast %cst_68 : f32 to vector<72x32xf32>
    %104 = arith.mulf %103, %102 : vector<72x32xf32>
    %105 = arith.maximumf %102, %104 : vector<72x32xf32>
    %106 = arith.truncf %105 : vector<72x32xf32> to vector<72x32xbf16>
    %c0_69 = arith.constant 0 : index
    %c0_70 = arith.constant 0 : index
    %c0_71 = arith.constant 0 : index
    %107 = vector.load %arg10[%c0_69, %c0_70, %c0_71] : memref<1x32x16xbf16, #tpu.memory_space<vmem>>, vector<1x32x16xbf16>
    %108 = vector.shape_cast %107 : vector<1x32x16xbf16> to vector<32x16xbf16>
    %cst_72 = arith.constant dense<0.000000e+00> : vector<72x16xf32>
    %109 = tpu.matmul %106, %108, %cst_72 {dimension_numbers = #tpu.dot_dimension_numbers<[1], [0], [0], [1], [0, 0, 1, 1], [], []>} : vector<72x32xbf16>, vector<32x16xbf16>, vector<72x16xf32> -> vector<72x16xf32>
    %cst_73 = arith.constant dense<0.000000e+00> : vector<16xf32>
    %110 = vector.multi_reduction <add>, %109, %cst_73 [0] : vector<72x16xf32> to vector<16xf32>
    %111 = vector.shape_cast %110 : vector<16xf32> to vector<1x16xf32>
    %cst_74 = arith.constant 0.013888889 : f32
    %112 = vector.broadcast %cst_74 : f32 to vector<1x16xf32>
    %113 = arith.mulf %111, %112 : vector<1x16xf32>
    %114 = arith.mulf %109, %109 : vector<72x16xf32>
    %cst_75 = arith.constant dense<0.000000e+00> : vector<16xf32>
    %115 = vector.multi_reduction <add>, %114, %cst_75 [0] : vector<72x16xf32> to vector<16xf32>
    %116 = vector.shape_cast %115 : vector<16xf32> to vector<1x16xf32>
    %cst_76 = arith.constant 0.013888889 : f32
    %117 = vector.broadcast %cst_76 : f32 to vector<1x16xf32>
    %118 = arith.mulf %116, %117 : vector<1x16xf32>
    %119 = arith.mulf %113, %113 : vector<1x16xf32>
    %120 = arith.subf %118, %119 : vector<1x16xf32>
    %cst_77 = arith.constant 0.000000e+00 : f32
    %121 = vector.broadcast %cst_77 : f32 to vector<1x16xf32>
    %122 = arith.maximumf %120, %121 : vector<1x16xf32>
    %c0_78 = arith.constant 0 : index
    %c0_79 = arith.constant 0 : index
    %123 = vector.load %arg11[%c0_78, %c0_79] : memref<1x16xf32, #tpu.memory_space<vmem>>, vector<1x16xf32>
    %cst_80 = arith.constant 9.99999974E-6 : f32
    %124 = vector.broadcast %cst_80 : f32 to vector<1x16xf32>
    %125 = arith.addf %122, %124 : vector<1x16xf32>
    %126 = math.rsqrt %125 : vector<1x16xf32>
    %127 = arith.mulf %123, %126 : vector<1x16xf32>
    %c0_81 = arith.constant 0 : index
    %c0_82 = arith.constant 0 : index
    %128 = vector.load %arg12[%c0_81, %c0_82] : memref<1x16xf32, #tpu.memory_space<vmem>>, vector<1x16xf32>
    %129 = arith.mulf %113, %127 : vector<1x16xf32>
    %130 = arith.subf %128, %129 : vector<1x16xf32>
    %131 = vector.broadcast %127 : vector<1x16xf32> to vector<72x16xf32>
    %132 = arith.mulf %109, %131 : vector<72x16xf32>
    %133 = vector.broadcast %130 : vector<1x16xf32> to vector<72x16xf32>
    %134 = arith.addf %132, %133 : vector<72x16xf32>
    %cst_83 = arith.constant 1.000000e-01 : f32
    %135 = vector.broadcast %cst_83 : f32 to vector<72x16xf32>
    %136 = arith.mulf %135, %134 : vector<72x16xf32>
    %137 = arith.maximumf %134, %136 : vector<72x16xf32>
    %cst_84 = arith.constant 0.000000e+00 : f32
    %138 = vector.broadcast %cst_84 : f32 to vector<88x16xf32>
    %c0_85 = arith.constant 0 : index
    %c0_86 = arith.constant 0 : index
    %139 = vector.load %arg48[%c0_85, %c0_86] : memref<88x16xf32, #tpu.memory_space<vmem>>, vector<88x16xf32>
    tpu.vector_store %arg48[%c0_85, %c0_86], %138 {strides = array<i32>} : memref<88x16xf32, #tpu.memory_space<vmem>>, vector<88x16xf32>,
    %c8_87 = arith.constant 8 : index
    %c0_88 = arith.constant 0 : index
    %140 = vector.load %arg48[%c8_87, %c0_88] : memref<88x16xf32, #tpu.memory_space<vmem>>, vector<72x16xf32>
    tpu.vector_store %arg48[%c8_87, %c0_88], %137 {strides = array<i32>} : memref<88x16xf32, #tpu.memory_space<vmem>>, vector<72x16xf32>,
    %c7_89 = arith.constant 7 : index
    %c0_90 = arith.constant 0 : index
    %141 = vector.load %arg48[%c7_89, %c0_90] : memref<88x16xf32, #tpu.memory_space<vmem>>, vector<72x16xf32>
    %c0_91 = arith.constant 0 : index
    %c0_92 = arith.constant 0 : index
    %142 = vector.load %arg13[%c0_91, %c0_92] : memref<72x1xf32, #tpu.memory_space<vmem>>, vector<72x1xf32>
    %143 = vector.broadcast %142 : vector<72x1xf32> to vector<72x16xf32>
    %144 = arith.mulf %141, %143 : vector<72x16xf32>
    %145 = arith.truncf %144 : vector<72x16xf32> to vector<72x16xbf16>
    %c0_93 = arith.constant 0 : index
    %c0_94 = arith.constant 0 : index
    %c0_95 = arith.constant 0 : index
    %146 = vector.load %arg15[%c0_93, %c0_94, %c0_95] : memref<3x16x32xbf16, #tpu.memory_space<vmem>>, vector<1x16x32xbf16>
    %147 = vector.shape_cast %146 : vector<1x16x32xbf16> to vector<16x32xbf16>
    %cst_96 = arith.constant dense<0.000000e+00> : vector<72x32xf32>
    %148 = tpu.matmul %145, %147, %cst_96 {dimension_numbers = #tpu.dot_dimension_numbers<[1], [0], [0], [1], [0, 0, 1, 1], [], []>} : vector<72x16xbf16>, vector<16x32xbf16>, vector<72x32xf32> -> vector<72x32xf32>
    %c8_97 = arith.constant 8 : index
    %c0_98 = arith.constant 0 : index
    %149 = vector.load %arg48[%c8_97, %c0_98] : memref<88x16xf32, #tpu.memory_space<vmem>>, vector<72x16xf32>
    %150 = arith.truncf %149 : vector<72x16xf32> to vector<72x16xbf16>
    %c1_99 = arith.constant 1 : index
    %c0_100 = arith.constant 0 : index
    %c0_101 = arith.constant 0 : index
    %151 = vector.load %arg15[%c1_99, %c0_100, %c0_101] : memref<3x16x32xbf16, #tpu.memory_space<vmem>>, vector<1x16x32xbf16>
    %152 = vector.shape_cast %151 : vector<1x16x32xbf16> to vector<16x32xbf16>
    %cst_102 = arith.constant dense<0.000000e+00> : vector<72x32xf32>
    %153 = tpu.matmul %150, %152, %cst_102 {dimension_numbers = #tpu.dot_dimension_numbers<[1], [0], [0], [1], [0, 0, 1, 1], [], []>} : vector<72x16xbf16>, vector<16x32xbf16>, vector<72x32xf32> -> vector<72x32xf32>
    %154 = arith.addf %148, %153 : vector<72x32xf32>
    %c9_103 = arith.constant 9 : index
    %c0_104 = arith.constant 0 : index
    %155 = vector.load %arg48[%c9_103, %c0_104] : memref<88x16xf32, #tpu.memory_space<vmem>>, vector<72x16xf32>
    %c0_105 = arith.constant 0 : index
    %c0_106 = arith.constant 0 : index
    %156 = vector.load %arg14[%c0_105, %c0_106] : memref<72x1xf32, #tpu.memory_space<vmem>>, vector<72x1xf32>
    %157 = vector.broadcast %156 : vector<72x1xf32> to vector<72x16xf32>
    %158 = arith.mulf %155, %157 : vector<72x16xf32>
    %159 = arith.truncf %158 : vector<72x16xf32> to vector<72x16xbf16>
    %c2_107 = arith.constant 2 : index
    %c0_108 = arith.constant 0 : index
    %c0_109 = arith.constant 0 : index
    %160 = vector.load %arg15[%c2_107, %c0_108, %c0_109] : memref<3x16x32xbf16, #tpu.memory_space<vmem>>, vector<1x16x32xbf16>
    %161 = vector.shape_cast %160 : vector<1x16x32xbf16> to vector<16x32xbf16>
    %cst_110 = arith.constant dense<0.000000e+00> : vector<72x32xf32>
    %162 = tpu.matmul %159, %161, %cst_110 {dimension_numbers = #tpu.dot_dimension_numbers<[1], [0], [0], [1], [0, 0, 1, 1], [], []>} : vector<72x16xbf16>, vector<16x32xbf16>, vector<72x32xf32> -> vector<72x32xf32>
    %163 = arith.addf %154, %162 : vector<72x32xf32>
    %cst_111 = arith.constant dense<0.000000e+00> : vector<32xf32>
    %164 = vector.multi_reduction <add>, %163, %cst_111 [0] : vector<72x32xf32> to vector<32xf32>
    %165 = vector.shape_cast %164 : vector<32xf32> to vector<1x32xf32>
    %cst_112 = arith.constant 0.013888889 : f32
    %166 = vector.broadcast %cst_112 : f32 to vector<1x32xf32>
    %167 = arith.mulf %165, %166 : vector<1x32xf32>
    %168 = arith.mulf %163, %163 : vector<72x32xf32>
    %cst_113 = arith.constant dense<0.000000e+00> : vector<32xf32>
    %169 = vector.multi_reduction <add>, %168, %cst_113 [0] : vector<72x32xf32> to vector<32xf32>
    %170 = vector.shape_cast %169 : vector<32xf32> to vector<1x32xf32>
    %cst_114 = arith.constant 0.013888889 : f32
    %171 = vector.broadcast %cst_114 : f32 to vector<1x32xf32>
    %172 = arith.mulf %170, %171 : vector<1x32xf32>
    %173 = arith.mulf %167, %167 : vector<1x32xf32>
    %174 = arith.subf %172, %173 : vector<1x32xf32>
    %cst_115 = arith.constant 0.000000e+00 : f32
    %175 = vector.broadcast %cst_115 : f32 to vector<1x32xf32>
    %176 = arith.maximumf %174, %175 : vector<1x32xf32>
    %c0_116 = arith.constant 0 : index
    %c0_117 = arith.constant 0 : index
    %177 = vector.load %arg16[%c0_116, %c0_117] : memref<1x32xf32, #tpu.memory_space<vmem>>, vector<1x32xf32>
    %cst_118 = arith.constant 9.99999974E-6 : f32
    %178 = vector.broadcast %cst_118 : f32 to vector<1x32xf32>
    %179 = arith.addf %176, %178 : vector<1x32xf32>
    %180 = math.rsqrt %179 : vector<1x32xf32>
    %181 = arith.mulf %177, %180 : vector<1x32xf32>
    %c0_119 = arith.constant 0 : index
    %c0_120 = arith.constant 0 : index
    %182 = vector.load %arg17[%c0_119, %c0_120] : memref<1x32xf32, #tpu.memory_space<vmem>>, vector<1x32xf32>
    %183 = arith.mulf %167, %181 : vector<1x32xf32>
    %184 = arith.subf %182, %183 : vector<1x32xf32>
    %185 = vector.broadcast %181 : vector<1x32xf32> to vector<72x32xf32>
    %186 = arith.mulf %163, %185 : vector<72x32xf32>
    %187 = vector.broadcast %184 : vector<1x32xf32> to vector<72x32xf32>
    %188 = arith.addf %186, %187 : vector<72x32xf32>
    %cst_121 = arith.constant 1.000000e-01 : f32
    %189 = vector.broadcast %cst_121 : f32 to vector<72x32xf32>
    %190 = arith.mulf %189, %188 : vector<72x32xf32>
    %191 = arith.maximumf %188, %190 : vector<72x32xf32>
    %192 = arith.addf %191, %105 : vector<72x32xf32>
    %cst_122 = arith.constant 0.000000e+00 : f32
    %193 = vector.broadcast %cst_122 : f32 to vector<88x32xf32>
    %c0_123 = arith.constant 0 : index
    %c0_124 = arith.constant 0 : index
    %194 = vector.load %arg49[%c0_123, %c0_124] : memref<88x32xf32, #tpu.memory_space<vmem>>, vector<88x32xf32>
    tpu.vector_store %arg49[%c0_123, %c0_124], %193 {strides = array<i32>} : memref<88x32xf32, #tpu.memory_space<vmem>>, vector<88x32xf32>,
    %c8_125 = arith.constant 8 : index
    %c0_126 = arith.constant 0 : index
    %195 = vector.load %arg49[%c8_125, %c0_126] : memref<88x32xf32, #tpu.memory_space<vmem>>, vector<72x32xf32>
    tpu.vector_store %arg49[%c8_125, %c0_126], %192 {strides = array<i32>} : memref<88x32xf32, #tpu.memory_space<vmem>>, vector<72x32xf32>,
    %c7_127 = arith.constant 7 : index
    %c0_128 = arith.constant 0 : index
    %196 = tpu.strided_load %arg49[%c7_127, %c0_128] {strides = array<i32: 2, 1>} : memref<88x32xf32, #tpu.memory_space<vmem>>, vector<36x32xf32>
    %c0_129 = arith.constant 0 : index
    %c0_130 = arith.constant 0 : index
    %197 = vector.load %arg18[%c0_129, %c0_130] : memref<36x1xf32, #tpu.memory_space<vmem>>, vector<36x1xf32>
    %198 = vector.broadcast %197 : vector<36x1xf32> to vector<36x32xf32>
    %199 = arith.mulf %196, %198 : vector<36x32xf32>
    %200 = arith.truncf %199 : vector<36x32xf32> to vector<36x32xbf16>
    %c0_131 = arith.constant 0 : index
    %c0_132 = arith.constant 0 : index
    %c0_133 = arith.constant 0 : index
    %201 = vector.load %arg19[%c0_131, %c0_132, %c0_133] : memref<3x32x64xbf16, #tpu.memory_space<vmem>>, vector<1x32x64xbf16>
    %202 = vector.shape_cast %201 : vector<1x32x64xbf16> to vector<32x64xbf16>
    %cst_134 = arith.constant dense<0.000000e+00> : vector<36x64xf32>
    %203 = tpu.matmul %200, %202, %cst_134 {dimension_numbers = #tpu.dot_dimension_numbers<[1], [0], [0], [1], [0, 0, 1, 1], [], []>} : vector<36x32xbf16>, vector<32x64xbf16>, vector<36x64xf32> -> vector<36x64xf32>
    %c8_135 = arith.constant 8 : index
    %c0_136 = arith.constant 0 : index
    %204 = tpu.strided_load %arg49[%c8_135, %c0_136] {strides = array<i32: 2, 1>} : memref<88x32xf32, #tpu.memory_space<vmem>>, vector<36x32xf32>
    %205 = arith.truncf %204 : vector<36x32xf32> to vector<36x32xbf16>
    %c1_137 = arith.constant 1 : index
    %c0_138 = arith.constant 0 : index
    %c0_139 = arith.constant 0 : index
    %206 = vector.load %arg19[%c1_137, %c0_138, %c0_139] : memref<3x32x64xbf16, #tpu.memory_space<vmem>>, vector<1x32x64xbf16>
    %207 = vector.shape_cast %206 : vector<1x32x64xbf16> to vector<32x64xbf16>
    %cst_140 = arith.constant dense<0.000000e+00> : vector<36x64xf32>
    %208 = tpu.matmul %205, %207, %cst_140 {dimension_numbers = #tpu.dot_dimension_numbers<[1], [0], [0], [1], [0, 0, 1, 1], [], []>} : vector<36x32xbf16>, vector<32x64xbf16>, vector<36x64xf32> -> vector<36x64xf32>
    %209 = arith.addf %203, %208 : vector<36x64xf32>
    %c9_141 = arith.constant 9 : index
    %c0_142 = arith.constant 0 : index
    %210 = tpu.strided_load %arg49[%c9_141, %c0_142] {strides = array<i32: 2, 1>} : memref<88x32xf32, #tpu.memory_space<vmem>>, vector<36x32xf32>
    %211 = arith.truncf %210 : vector<36x32xf32> to vector<36x32xbf16>
    %c2_143 = arith.constant 2 : index
    %c0_144 = arith.constant 0 : index
    %c0_145 = arith.constant 0 : index
    %212 = vector.load %arg19[%c2_143, %c0_144, %c0_145] : memref<3x32x64xbf16, #tpu.memory_space<vmem>>, vector<1x32x64xbf16>
    %213 = vector.shape_cast %212 : vector<1x32x64xbf16> to vector<32x64xbf16>
    %cst_146 = arith.constant dense<0.000000e+00> : vector<36x64xf32>
    %214 = tpu.matmul %211, %213, %cst_146 {dimension_numbers = #tpu.dot_dimension_numbers<[1], [0], [0], [1], [0, 0, 1, 1], [], []>} : vector<36x32xbf16>, vector<32x64xbf16>, vector<36x64xf32> -> vector<36x64xf32>
    %215 = arith.addf %209, %214 : vector<36x64xf32>
    %cst_147 = arith.constant dense<0.000000e+00> : vector<64xf32>
    %216 = vector.multi_reduction <add>, %215, %cst_147 [0] : vector<36x64xf32> to vector<64xf32>
    %217 = vector.shape_cast %216 : vector<64xf32> to vector<1x64xf32>
    %cst_148 = arith.constant 0.027777778 : f32
    %218 = vector.broadcast %cst_148 : f32 to vector<1x64xf32>
    %219 = arith.mulf %217, %218 : vector<1x64xf32>
    %220 = arith.mulf %215, %215 : vector<36x64xf32>
    %cst_149 = arith.constant dense<0.000000e+00> : vector<64xf32>
    %221 = vector.multi_reduction <add>, %220, %cst_149 [0] : vector<36x64xf32> to vector<64xf32>
    %222 = vector.shape_cast %221 : vector<64xf32> to vector<1x64xf32>
    %cst_150 = arith.constant 0.027777778 : f32
    %223 = vector.broadcast %cst_150 : f32 to vector<1x64xf32>
    %224 = arith.mulf %222, %223 : vector<1x64xf32>
    %225 = arith.mulf %219, %219 : vector<1x64xf32>
    %226 = arith.subf %224, %225 : vector<1x64xf32>
    %cst_151 = arith.constant 0.000000e+00 : f32
    %227 = vector.broadcast %cst_151 : f32 to vector<1x64xf32>
    %228 = arith.maximumf %226, %227 : vector<1x64xf32>
    %c0_152 = arith.constant 0 : index
    %c0_153 = arith.constant 0 : index
    %229 = vector.load %arg20[%c0_152, %c0_153] : memref<1x64xf32, #tpu.memory_space<vmem>>, vector<1x64xf32>
    %cst_154 = arith.constant 9.99999974E-6 : f32
    %230 = vector.broadcast %cst_154 : f32 to vector<1x64xf32>
    %231 = arith.addf %228, %230 : vector<1x64xf32>
    %232 = math.rsqrt %231 : vector<1x64xf32>
    %233 = arith.mulf %229, %232 : vector<1x64xf32>
    %c0_155 = arith.constant 0 : index
    %c0_156 = arith.constant 0 : index
    %234 = vector.load %arg21[%c0_155, %c0_156] : memref<1x64xf32, #tpu.memory_space<vmem>>, vector<1x64xf32>
    %235 = arith.mulf %219, %233 : vector<1x64xf32>
    %236 = arith.subf %234, %235 : vector<1x64xf32>
    %237 = vector.broadcast %233 : vector<1x64xf32> to vector<36x64xf32>
    %238 = arith.mulf %215, %237 : vector<36x64xf32>
    %239 = vector.broadcast %236 : vector<1x64xf32> to vector<36x64xf32>
    %240 = arith.addf %238, %239 : vector<36x64xf32>
    %cst_157 = arith.constant 1.000000e-01 : f32
    %241 = vector.broadcast %cst_157 : f32 to vector<36x64xf32>
    %242 = arith.mulf %241, %240 : vector<36x64xf32>
    %243 = arith.maximumf %240, %242 : vector<36x64xf32>
    %244 = arith.truncf %243 : vector<36x64xf32> to vector<36x64xbf16>
    %c0_158 = arith.constant 0 : index
    %c0_159 = arith.constant 0 : index
    %c0_160 = arith.constant 0 : index
    %245 = vector.load %arg22[%c0_158, %c0_159, %c0_160] : memref<1x64x32xbf16, #tpu.memory_space<vmem>>, vector<1x64x32xbf16>
    %246 = vector.shape_cast %245 : vector<1x64x32xbf16> to vector<64x32xbf16>
    %cst_161 = arith.constant dense<0.000000e+00> : vector<36x32xf32>
    %247 = tpu.matmul %244, %246, %cst_161 {dimension_numbers = #tpu.dot_dimension_numbers<[1], [0], [0], [1], [0, 0, 1, 1], [], []>} : vector<36x64xbf16>, vector<64x32xbf16>, vector<36x32xf32> -> vector<36x32xf32>
    %cst_162 = arith.constant dense<0.000000e+00> : vector<32xf32>
    %248 = vector.multi_reduction <add>, %247, %cst_162 [0] : vector<36x32xf32> to vector<32xf32>
    %249 = vector.shape_cast %248 : vector<32xf32> to vector<1x32xf32>
    %cst_163 = arith.constant 0.027777778 : f32
    %250 = vector.broadcast %cst_163 : f32 to vector<1x32xf32>
    %251 = arith.mulf %249, %250 : vector<1x32xf32>
    %252 = arith.mulf %247, %247 : vector<36x32xf32>
    %cst_164 = arith.constant dense<0.000000e+00> : vector<32xf32>
    %253 = vector.multi_reduction <add>, %252, %cst_164 [0] : vector<36x32xf32> to vector<32xf32>
    %254 = vector.shape_cast %253 : vector<32xf32> to vector<1x32xf32>
    %cst_165 = arith.constant 0.027777778 : f32
    %255 = vector.broadcast %cst_165 : f32 to vector<1x32xf32>
    %256 = arith.mulf %254, %255 : vector<1x32xf32>
    %257 = arith.mulf %251, %251 : vector<1x32xf32>
    %258 = arith.subf %256, %257 : vector<1x32xf32>
    %cst_166 = arith.constant 0.000000e+00 : f32
    %259 = vector.broadcast %cst_166 : f32 to vector<1x32xf32>
    %260 = arith.maximumf %258, %259 : vector<1x32xf32>
    %c0_167 = arith.constant 0 : index
    %c0_168 = arith.constant 0 : index
    %261 = vector.load %arg23[%c0_167, %c0_168] : memref<1x32xf32, #tpu.memory_space<vmem>>, vector<1x32xf32>
    %cst_169 = arith.constant 9.99999974E-6 : f32
    %262 = vector.broadcast %cst_169 : f32 to vector<1x32xf32>
    %263 = arith.addf %260, %262 : vector<1x32xf32>
    %264 = math.rsqrt %263 : vector<1x32xf32>
    %265 = arith.mulf %261, %264 : vector<1x32xf32>
    %c0_170 = arith.constant 0 : index
    %c0_171 = arith.constant 0 : index
    %266 = vector.load %arg24[%c0_170, %c0_171] : memref<1x32xf32, #tpu.memory_space<vmem>>, vector<1x32xf32>
    %267 = arith.mulf %251, %265 : vector<1x32xf32>
    %268 = arith.subf %266, %267 : vector<1x32xf32>
    %269 = vector.broadcast %265 : vector<1x32xf32> to vector<36x32xf32>
    %270 = arith.mulf %247, %269 : vector<36x32xf32>
    %271 = vector.broadcast %268 : vector<1x32xf32> to vector<36x32xf32>
    %272 = arith.addf %270, %271 : vector<36x32xf32>
    %cst_172 = arith.constant 1.000000e-01 : f32
    %273 = vector.broadcast %cst_172 : f32 to vector<36x32xf32>
    %274 = arith.mulf %273, %272 : vector<36x32xf32>
    %275 = arith.maximumf %272, %274 : vector<36x32xf32>
    %cst_173 = arith.constant 0.000000e+00 : f32
    %276 = vector.broadcast %cst_173 : f32 to vector<52x32xf32>
    %c0_174 = arith.constant 0 : index
    %c0_175 = arith.constant 0 : index
    %277 = vector.load %arg50[%c0_174, %c0_175] : memref<52x32xf32, #tpu.memory_space<vmem>>, vector<52x32xf32>
    tpu.vector_store %arg50[%c0_174, %c0_175], %276 {strides = array<i32>} : memref<52x32xf32, #tpu.memory_space<vmem>>, vector<52x32xf32>,
    %c8_176 = arith.constant 8 : index
    %c0_177 = arith.constant 0 : index
    %278 = vector.load %arg50[%c8_176, %c0_177] : memref<52x32xf32, #tpu.memory_space<vmem>>, vector<36x32xf32>
    tpu.vector_store %arg50[%c8_176, %c0_177], %275 {strides = array<i32>} : memref<52x32xf32, #tpu.memory_space<vmem>>, vector<36x32xf32>,
    %c7_178 = arith.constant 7 : index
    %c0_179 = arith.constant 0 : index
    %279 = vector.load %arg50[%c7_178, %c0_179] : memref<52x32xf32, #tpu.memory_space<vmem>>, vector<36x32xf32>
    %c0_180 = arith.constant 0 : index
    %c0_181 = arith.constant 0 : index
    %280 = vector.load %arg25[%c0_180, %c0_181] : memref<36x1xf32, #tpu.memory_space<vmem>>, vector<36x1xf32>
    %281 = vector.broadcast %280 : vector<36x1xf32> to vector<36x32xf32>
    %282 = arith.mulf %279, %281 : vector<36x32xf32>
    %283 = arith.truncf %282 : vector<36x32xf32> to vector<36x32xbf16>
    %c0_182 = arith.constant 0 : index
    %c0_183 = arith.constant 0 : index
    %c0_184 = arith.constant 0 : index
    %284 = vector.load %arg27[%c0_182, %c0_183, %c0_184] : memref<3x32x64xbf16, #tpu.memory_space<vmem>>, vector<1x32x64xbf16>
    %285 = vector.shape_cast %284 : vector<1x32x64xbf16> to vector<32x64xbf16>
    %cst_185 = arith.constant dense<0.000000e+00> : vector<36x64xf32>
    %286 = tpu.matmul %283, %285, %cst_185 {dimension_numbers = #tpu.dot_dimension_numbers<[1], [0], [0], [1], [0, 0, 1, 1], [], []>} : vector<36x32xbf16>, vector<32x64xbf16>, vector<36x64xf32> -> vector<36x64xf32>
    %c8_186 = arith.constant 8 : index
    %c0_187 = arith.constant 0 : index
    %287 = vector.load %arg50[%c8_186, %c0_187] : memref<52x32xf32, #tpu.memory_space<vmem>>, vector<36x32xf32>
    %288 = arith.truncf %287 : vector<36x32xf32> to vector<36x32xbf16>
    %c1_188 = arith.constant 1 : index
    %c0_189 = arith.constant 0 : index
    %c0_190 = arith.constant 0 : index
    %289 = vector.load %arg27[%c1_188, %c0_189, %c0_190] : memref<3x32x64xbf16, #tpu.memory_space<vmem>>, vector<1x32x64xbf16>
    %290 = vector.shape_cast %289 : vector<1x32x64xbf16> to vector<32x64xbf16>
    %cst_191 = arith.constant dense<0.000000e+00> : vector<36x64xf32>
    %291 = tpu.matmul %288, %290, %cst_191 {dimension_numbers = #tpu.dot_dimension_numbers<[1], [0], [0], [1], [0, 0, 1, 1], [], []>} : vector<36x32xbf16>, vector<32x64xbf16>, vector<36x64xf32> -> vector<36x64xf32>
    %292 = arith.addf %286, %291 : vector<36x64xf32>
    %c9_192 = arith.constant 9 : index
    %c0_193 = arith.constant 0 : index
    %293 = vector.load %arg50[%c9_192, %c0_193] : memref<52x32xf32, #tpu.memory_space<vmem>>, vector<36x32xf32>
    %c0_194 = arith.constant 0 : index
    %c0_195 = arith.constant 0 : index
    %294 = vector.load %arg26[%c0_194, %c0_195] : memref<36x1xf32, #tpu.memory_space<vmem>>, vector<36x1xf32>
    %295 = vector.broadcast %294 : vector<36x1xf32> to vector<36x32xf32>
    %296 = arith.mulf %293, %295 : vector<36x32xf32>
    %297 = arith.truncf %296 : vector<36x32xf32> to vector<36x32xbf16>
    %c2_196 = arith.constant 2 : index
    %c0_197 = arith.constant 0 : index
    %c0_198 = arith.constant 0 : index
    %298 = vector.load %arg27[%c2_196, %c0_197, %c0_198] : memref<3x32x64xbf16, #tpu.memory_space<vmem>>, vector<1x32x64xbf16>
    %299 = vector.shape_cast %298 : vector<1x32x64xbf16> to vector<32x64xbf16>
    %cst_199 = arith.constant dense<0.000000e+00> : vector<36x64xf32>
    %300 = tpu.matmul %297, %299, %cst_199 {dimension_numbers = #tpu.dot_dimension_numbers<[1], [0], [0], [1], [0, 0, 1, 1], [], []>} : vector<36x32xbf16>, vector<32x64xbf16>, vector<36x64xf32> -> vector<36x64xf32>
    %301 = arith.addf %292, %300 : vector<36x64xf32>
    %cst_200 = arith.constant dense<0.000000e+00> : vector<64xf32>
    %302 = vector.multi_reduction <add>, %301, %cst_200 [0] : vector<36x64xf32> to vector<64xf32>
    %303 = vector.shape_cast %302 : vector<64xf32> to vector<1x64xf32>
    %cst_201 = arith.constant 0.027777778 : f32
    %304 = vector.broadcast %cst_201 : f32 to vector<1x64xf32>
    %305 = arith.mulf %303, %304 : vector<1x64xf32>
    %306 = arith.mulf %301, %301 : vector<36x64xf32>
    %cst_202 = arith.constant dense<0.000000e+00> : vector<64xf32>
    %307 = vector.multi_reduction <add>, %306, %cst_202 [0] : vector<36x64xf32> to vector<64xf32>
    %308 = vector.shape_cast %307 : vector<64xf32> to vector<1x64xf32>
    %cst_203 = arith.constant 0.027777778 : f32
    %309 = vector.broadcast %cst_203 : f32 to vector<1x64xf32>
    %310 = arith.mulf %308, %309 : vector<1x64xf32>
    %311 = arith.mulf %305, %305 : vector<1x64xf32>
    %312 = arith.subf %310, %311 : vector<1x64xf32>
    %cst_204 = arith.constant 0.000000e+00 : f32
    %313 = vector.broadcast %cst_204 : f32 to vector<1x64xf32>
    %314 = arith.maximumf %312, %313 : vector<1x64xf32>
    %c0_205 = arith.constant 0 : index
    %c0_206 = arith.constant 0 : index
    %315 = vector.load %arg28[%c0_205, %c0_206] : memref<1x64xf32, #tpu.memory_space<vmem>>, vector<1x64xf32>
    %cst_207 = arith.constant 9.99999974E-6 : f32
    %316 = vector.broadcast %cst_207 : f32 to vector<1x64xf32>
    %317 = arith.addf %314, %316 : vector<1x64xf32>
    %318 = math.rsqrt %317 : vector<1x64xf32>
    %319 = arith.mulf %315, %318 : vector<1x64xf32>
    %c0_208 = arith.constant 0 : index
    %c0_209 = arith.constant 0 : index
    %320 = vector.load %arg29[%c0_208, %c0_209] : memref<1x64xf32, #tpu.memory_space<vmem>>, vector<1x64xf32>
    %321 = arith.mulf %305, %319 : vector<1x64xf32>
    %322 = arith.subf %320, %321 : vector<1x64xf32>
    %323 = vector.broadcast %319 : vector<1x64xf32> to vector<36x64xf32>
    %324 = arith.mulf %301, %323 : vector<36x64xf32>
    %325 = vector.broadcast %322 : vector<1x64xf32> to vector<36x64xf32>
    %326 = arith.addf %324, %325 : vector<36x64xf32>
    %cst_210 = arith.constant 1.000000e-01 : f32
    %327 = vector.broadcast %cst_210 : f32 to vector<36x64xf32>
    %328 = arith.mulf %327, %326 : vector<36x64xf32>
    %329 = arith.maximumf %326, %328 : vector<36x64xf32>
    %330 = arith.addf %329, %243 : vector<36x64xf32>
    %331 = arith.truncf %330 : vector<36x64xf32> to vector<36x64xbf16>
    %c0_211 = arith.constant 0 : index
    %c0_212 = arith.constant 0 : index
    %c0_213 = arith.constant 0 : index
    %332 = vector.load %arg30[%c0_211, %c0_212, %c0_213] : memref<1x64x32xbf16, #tpu.memory_space<vmem>>, vector<1x64x32xbf16>
    %333 = vector.shape_cast %332 : vector<1x64x32xbf16> to vector<64x32xbf16>
    %cst_214 = arith.constant dense<0.000000e+00> : vector<36x32xf32>
    %334 = tpu.matmul %331, %333, %cst_214 {dimension_numbers = #tpu.dot_dimension_numbers<[1], [0], [0], [1], [0, 0, 1, 1], [], []>} : vector<36x64xbf16>, vector<64x32xbf16>, vector<36x32xf32> -> vector<36x32xf32>
    %cst_215 = arith.constant dense<0.000000e+00> : vector<32xf32>
    %335 = vector.multi_reduction <add>, %334, %cst_215 [0] : vector<36x32xf32> to vector<32xf32>
    %336 = vector.shape_cast %335 : vector<32xf32> to vector<1x32xf32>
    %cst_216 = arith.constant 0.027777778 : f32
    %337 = vector.broadcast %cst_216 : f32 to vector<1x32xf32>
    %338 = arith.mulf %336, %337 : vector<1x32xf32>
    %339 = arith.mulf %334, %334 : vector<36x32xf32>
    %cst_217 = arith.constant dense<0.000000e+00> : vector<32xf32>
    %340 = vector.multi_reduction <add>, %339, %cst_217 [0] : vector<36x32xf32> to vector<32xf32>
    %341 = vector.shape_cast %340 : vector<32xf32> to vector<1x32xf32>
    %cst_218 = arith.constant 0.027777778 : f32
    %342 = vector.broadcast %cst_218 : f32 to vector<1x32xf32>
    %343 = arith.mulf %341, %342 : vector<1x32xf32>
    %344 = arith.mulf %338, %338 : vector<1x32xf32>
    %345 = arith.subf %343, %344 : vector<1x32xf32>
    %cst_219 = arith.constant 0.000000e+00 : f32
    %346 = vector.broadcast %cst_219 : f32 to vector<1x32xf32>
    %347 = arith.maximumf %345, %346 : vector<1x32xf32>
    %c0_220 = arith.constant 0 : index
    %c0_221 = arith.constant 0 : index
    %348 = vector.load %arg31[%c0_220, %c0_221] : memref<1x32xf32, #tpu.memory_space<vmem>>, vector<1x32xf32>
    %cst_222 = arith.constant 9.99999974E-6 : f32
    %349 = vector.broadcast %cst_222 : f32 to vector<1x32xf32>
    %350 = arith.addf %347, %349 : vector<1x32xf32>
    %351 = math.rsqrt %350 : vector<1x32xf32>
    %352 = arith.mulf %348, %351 : vector<1x32xf32>
    %c0_223 = arith.constant 0 : index
    %c0_224 = arith.constant 0 : index
    %353 = vector.load %arg32[%c0_223, %c0_224] : memref<1x32xf32, #tpu.memory_space<vmem>>, vector<1x32xf32>
    %354 = arith.mulf %338, %352 : vector<1x32xf32>
    %355 = arith.subf %353, %354 : vector<1x32xf32>
    %356 = vector.broadcast %352 : vector<1x32xf32> to vector<36x32xf32>
    %357 = arith.mulf %334, %356 : vector<36x32xf32>
    %358 = vector.broadcast %355 : vector<1x32xf32> to vector<36x32xf32>
    %359 = arith.addf %357, %358 : vector<36x32xf32>
    %cst_225 = arith.constant 1.000000e-01 : f32
    %360 = vector.broadcast %cst_225 : f32 to vector<36x32xf32>
    %361 = arith.mulf %360, %359 : vector<36x32xf32>
    %362 = arith.maximumf %359, %361 : vector<36x32xf32>
    %cst_226 = arith.constant 0.000000e+00 : f32
    %363 = vector.broadcast %cst_226 : f32 to vector<52x32xf32>
    %c0_227 = arith.constant 0 : index
    %c0_228 = arith.constant 0 : index
    %364 = vector.load %arg51[%c0_227, %c0_228] : memref<52x32xf32, #tpu.memory_space<vmem>>, vector<52x32xf32>
    tpu.vector_store %arg51[%c0_227, %c0_228], %363 {strides = array<i32>} : memref<52x32xf32, #tpu.memory_space<vmem>>, vector<52x32xf32>,
    %c8_229 = arith.constant 8 : index
    %c0_230 = arith.constant 0 : index
    %365 = vector.load %arg51[%c8_229, %c0_230] : memref<52x32xf32, #tpu.memory_space<vmem>>, vector<36x32xf32>
    tpu.vector_store %arg51[%c8_229, %c0_230], %362 {strides = array<i32>} : memref<52x32xf32, #tpu.memory_space<vmem>>, vector<36x32xf32>,
    %c7_231 = arith.constant 7 : index
    %c0_232 = arith.constant 0 : index
    %366 = vector.load %arg51[%c7_231, %c0_232] : memref<52x32xf32, #tpu.memory_space<vmem>>, vector<36x32xf32>
    %c0_233 = arith.constant 0 : index
    %c0_234 = arith.constant 0 : index
    %367 = vector.load %arg33[%c0_233, %c0_234] : memref<36x1xf32, #tpu.memory_space<vmem>>, vector<36x1xf32>
    %368 = vector.broadcast %367 : vector<36x1xf32> to vector<36x32xf32>
    %369 = arith.mulf %366, %368 : vector<36x32xf32>
    %370 = arith.truncf %369 : vector<36x32xf32> to vector<36x32xbf16>
    %c0_235 = arith.constant 0 : index
    %c0_236 = arith.constant 0 : index
    %c0_237 = arith.constant 0 : index
    %371 = vector.load %arg35[%c0_235, %c0_236, %c0_237] : memref<3x32x64xbf16, #tpu.memory_space<vmem>>, vector<1x32x64xbf16>
    %372 = vector.shape_cast %371 : vector<1x32x64xbf16> to vector<32x64xbf16>
    %cst_238 = arith.constant dense<0.000000e+00> : vector<36x64xf32>
    %373 = tpu.matmul %370, %372, %cst_238 {dimension_numbers = #tpu.dot_dimension_numbers<[1], [0], [0], [1], [0, 0, 1, 1], [], []>} : vector<36x32xbf16>, vector<32x64xbf16>, vector<36x64xf32> -> vector<36x64xf32>
    %c8_239 = arith.constant 8 : index
    %c0_240 = arith.constant 0 : index
    %374 = vector.load %arg51[%c8_239, %c0_240] : memref<52x32xf32, #tpu.memory_space<vmem>>, vector<36x32xf32>
    %375 = arith.truncf %374 : vector<36x32xf32> to vector<36x32xbf16>
    %c1_241 = arith.constant 1 : index
    %c0_242 = arith.constant 0 : index
    %c0_243 = arith.constant 0 : index
    %376 = vector.load %arg35[%c1_241, %c0_242, %c0_243] : memref<3x32x64xbf16, #tpu.memory_space<vmem>>, vector<1x32x64xbf16>
    %377 = vector.shape_cast %376 : vector<1x32x64xbf16> to vector<32x64xbf16>
    %cst_244 = arith.constant dense<0.000000e+00> : vector<36x64xf32>
    %378 = tpu.matmul %375, %377, %cst_244 {dimension_numbers = #tpu.dot_dimension_numbers<[1], [0], [0], [1], [0, 0, 1, 1], [], []>} : vector<36x32xbf16>, vector<32x64xbf16>, vector<36x64xf32> -> vector<36x64xf32>
    %379 = arith.addf %373, %378 : vector<36x64xf32>
    %c9_245 = arith.constant 9 : index
    %c0_246 = arith.constant 0 : index
    %380 = vector.load %arg51[%c9_245, %c0_246] : memref<52x32xf32, #tpu.memory_space<vmem>>, vector<36x32xf32>
    %c0_247 = arith.constant 0 : index
    %c0_248 = arith.constant 0 : index
    %381 = vector.load %arg34[%c0_247, %c0_248] : memref<36x1xf32, #tpu.memory_space<vmem>>, vector<36x1xf32>
    %382 = vector.broadcast %381 : vector<36x1xf32> to vector<36x32xf32>
    %383 = arith.mulf %380, %382 : vector<36x32xf32>
    %384 = arith.truncf %383 : vector<36x32xf32> to vector<36x32xbf16>
    %c2_249 = arith.constant 2 : index
    %c0_250 = arith.constant 0 : index
    %c0_251 = arith.constant 0 : index
    %385 = vector.load %arg35[%c2_249, %c0_250, %c0_251] : memref<3x32x64xbf16, #tpu.memory_space<vmem>>, vector<1x32x64xbf16>
    %386 = vector.shape_cast %385 : vector<1x32x64xbf16> to vector<32x64xbf16>
    %cst_252 = arith.constant dense<0.000000e+00> : vector<36x64xf32>
    %387 = tpu.matmul %384, %386, %cst_252 {dimension_numbers = #tpu.dot_dimension_numbers<[1], [0], [0], [1], [0, 0, 1, 1], [], []>} : vector<36x32xbf16>, vector<32x64xbf16>, vector<36x64xf32> -> vector<36x64xf32>
    %388 = arith.addf %379, %387 : vector<36x64xf32>
    %cst_253 = arith.constant dense<0.000000e+00> : vector<64xf32>
    %389 = vector.multi_reduction <add>, %388, %cst_253 [0] : vector<36x64xf32> to vector<64xf32>
    %390 = vector.shape_cast %389 : vector<64xf32> to vector<1x64xf32>
    %cst_254 = arith.constant 0.027777778 : f32
    %391 = vector.broadcast %cst_254 : f32 to vector<1x64xf32>
    %392 = arith.mulf %390, %391 : vector<1x64xf32>
    %393 = arith.mulf %388, %388 : vector<36x64xf32>
    %cst_255 = arith.constant dense<0.000000e+00> : vector<64xf32>
    %394 = vector.multi_reduction <add>, %393, %cst_255 [0] : vector<36x64xf32> to vector<64xf32>
    %395 = vector.shape_cast %394 : vector<64xf32> to vector<1x64xf32>
    %cst_256 = arith.constant 0.027777778 : f32
    %396 = vector.broadcast %cst_256 : f32 to vector<1x64xf32>
    %397 = arith.mulf %395, %396 : vector<1x64xf32>
    %398 = arith.mulf %392, %392 : vector<1x64xf32>
    %399 = arith.subf %397, %398 : vector<1x64xf32>
    %cst_257 = arith.constant 0.000000e+00 : f32
    %400 = vector.broadcast %cst_257 : f32 to vector<1x64xf32>
    %401 = arith.maximumf %399, %400 : vector<1x64xf32>
    %c0_258 = arith.constant 0 : index
    %c0_259 = arith.constant 0 : index
    %402 = vector.load %arg36[%c0_258, %c0_259] : memref<1x64xf32, #tpu.memory_space<vmem>>, vector<1x64xf32>
    %cst_260 = arith.constant 9.99999974E-6 : f32
    %403 = vector.broadcast %cst_260 : f32 to vector<1x64xf32>
    %404 = arith.addf %401, %403 : vector<1x64xf32>
    %405 = math.rsqrt %404 : vector<1x64xf32>
    %406 = arith.mulf %402, %405 : vector<1x64xf32>
    %c0_261 = arith.constant 0 : index
    %c0_262 = arith.constant 0 : index
    %407 = vector.load %arg37[%c0_261, %c0_262] : memref<1x64xf32, #tpu.memory_space<vmem>>, vector<1x64xf32>
    %408 = arith.mulf %392, %406 : vector<1x64xf32>
    %409 = arith.subf %407, %408 : vector<1x64xf32>
    %410 = vector.broadcast %406 : vector<1x64xf32> to vector<36x64xf32>
    %411 = arith.mulf %388, %410 : vector<36x64xf32>
    %412 = vector.broadcast %409 : vector<1x64xf32> to vector<36x64xf32>
    %413 = arith.addf %411, %412 : vector<36x64xf32>
    %cst_263 = arith.constant 1.000000e-01 : f32
    %414 = vector.broadcast %cst_263 : f32 to vector<36x64xf32>
    %415 = arith.mulf %414, %413 : vector<36x64xf32>
    %416 = arith.maximumf %413, %415 : vector<36x64xf32>
    %417 = arith.addf %416, %330 : vector<36x64xf32>
    %cst_264 = arith.constant 0.000000e+00 : f32
    %418 = vector.broadcast %cst_264 : f32 to vector<52x64xf32>
    %c0_265 = arith.constant 0 : index
    %c0_266 = arith.constant 0 : index
    %419 = vector.load %arg52[%c0_265, %c0_266] : memref<52x64xf32, #tpu.memory_space<vmem>>, vector<52x64xf32>
    tpu.vector_store %arg52[%c0_265, %c0_266], %418 {strides = array<i32>} : memref<52x64xf32, #tpu.memory_space<vmem>>, vector<52x64xf32>,
    %c8_267 = arith.constant 8 : index
    %c0_268 = arith.constant 0 : index
    %420 = vector.load %arg52[%c8_267, %c0_268] : memref<52x64xf32, #tpu.memory_space<vmem>>, vector<36x64xf32>
    tpu.vector_store %arg52[%c8_267, %c0_268], %417 {strides = array<i32>} : memref<52x64xf32, #tpu.memory_space<vmem>>, vector<36x64xf32>,
    %c7_269 = arith.constant 7 : index
    %c0_270 = arith.constant 0 : index
    %421 = vector.load %arg52[%c7_269, %c0_270] : memref<52x64xf32, #tpu.memory_space<vmem>>, vector<36x64xf32>
    %c0_271 = arith.constant 0 : index
    %c0_272 = arith.constant 0 : index
    %422 = vector.load %arg38[%c0_271, %c0_272] : memref<36x1xf32, #tpu.memory_space<vmem>>, vector<36x1xf32>
    %423 = vector.broadcast %422 : vector<36x1xf32> to vector<36x64xf32>
    %424 = arith.mulf %421, %423 : vector<36x64xf32>
    %425 = arith.truncf %424 : vector<36x64xf32> to vector<36x64xbf16>
    %c0_273 = arith.constant 0 : index
    %c0_274 = arith.constant 0 : index
    %c0_275 = arith.constant 0 : index
    %426 = vector.load %arg40[%c0_273, %c0_274, %c0_275] : memref<3x64x128xbf16, #tpu.memory_space<vmem>>, vector<1x64x128xbf16>
    %427 = vector.shape_cast %426 : vector<1x64x128xbf16> to vector<64x128xbf16>
    %cst_276 = arith.constant dense<0.000000e+00> : vector<36x128xf32>
    %428 = tpu.matmul %425, %427, %cst_276 {dimension_numbers = #tpu.dot_dimension_numbers<[1], [0], [0], [1], [0, 0, 1, 1], [], []>} : vector<36x64xbf16>, vector<64x128xbf16>, vector<36x128xf32> -> vector<36x128xf32>
    %c8_277 = arith.constant 8 : index
    %c0_278 = arith.constant 0 : index
    %429 = vector.load %arg52[%c8_277, %c0_278] : memref<52x64xf32, #tpu.memory_space<vmem>>, vector<36x64xf32>
    %430 = arith.truncf %429 : vector<36x64xf32> to vector<36x64xbf16>
    %c1_279 = arith.constant 1 : index
    %c0_280 = arith.constant 0 : index
    %c0_281 = arith.constant 0 : index
    %431 = vector.load %arg40[%c1_279, %c0_280, %c0_281] : memref<3x64x128xbf16, #tpu.memory_space<vmem>>, vector<1x64x128xbf16>
    %432 = vector.shape_cast %431 : vector<1x64x128xbf16> to vector<64x128xbf16>
    %cst_282 = arith.constant dense<0.000000e+00> : vector<36x128xf32>
    %433 = tpu.matmul %430, %432, %cst_282 {dimension_numbers = #tpu.dot_dimension_numbers<[1], [0], [0], [1], [0, 0, 1, 1], [], []>} : vector<36x64xbf16>, vector<64x128xbf16>, vector<36x128xf32> -> vector<36x128xf32>
    %434 = arith.addf %428, %433 : vector<36x128xf32>
    %c9_283 = arith.constant 9 : index
    %c0_284 = arith.constant 0 : index
    %435 = vector.load %arg52[%c9_283, %c0_284] : memref<52x64xf32, #tpu.memory_space<vmem>>, vector<36x64xf32>
    %c0_285 = arith.constant 0 : index
    %c0_286 = arith.constant 0 : index
    %436 = vector.load %arg39[%c0_285, %c0_286] : memref<36x1xf32, #tpu.memory_space<vmem>>, vector<36x1xf32>
    %437 = vector.broadcast %436 : vector<36x1xf32> to vector<36x64xf32>
    %438 = arith.mulf %435, %437 : vector<36x64xf32>
    %439 = arith.truncf %438 : vector<36x64xf32> to vector<36x64xbf16>
    %c2_287 = arith.constant 2 : index
    %c0_288 = arith.constant 0 : index
    %c0_289 = arith.constant 0 : index
    %440 = vector.load %arg40[%c2_287, %c0_288, %c0_289] : memref<3x64x128xbf16, #tpu.memory_space<vmem>>, vector<1x64x128xbf16>
    %441 = vector.shape_cast %440 : vector<1x64x128xbf16> to vector<64x128xbf16>
    %cst_290 = arith.constant dense<0.000000e+00> : vector<36x128xf32>
    %442 = tpu.matmul %439, %441, %cst_290 {dimension_numbers = #tpu.dot_dimension_numbers<[1], [0], [0], [1], [0, 0, 1, 1], [], []>} : vector<36x64xbf16>, vector<64x128xbf16>, vector<36x128xf32> -> vector<36x128xf32>
    %443 = arith.addf %434, %442 : vector<36x128xf32>
    %cst_291 = arith.constant dense<0.000000e+00> : vector<128xf32>
    %444 = vector.multi_reduction <add>, %443, %cst_291 [0] : vector<36x128xf32> to vector<128xf32>
    %445 = vector.shape_cast %444 : vector<128xf32> to vector<1x128xf32>
    %cst_292 = arith.constant 0.027777778 : f32
    %446 = vector.broadcast %cst_292 : f32 to vector<1x128xf32>
    %447 = arith.mulf %445, %446 : vector<1x128xf32>
    %448 = arith.mulf %443, %443 : vector<36x128xf32>
    %cst_293 = arith.constant dense<0.000000e+00> : vector<128xf32>
    %449 = vector.multi_reduction <add>, %448, %cst_293 [0] : vector<36x128xf32> to vector<128xf32>
    %450 = vector.shape_cast %449 : vector<128xf32> to vector<1x128xf32>
    %cst_294 = arith.constant 0.027777778 : f32
    %451 = vector.broadcast %cst_294 : f32 to vector<1x128xf32>
    %452 = arith.mulf %450, %451 : vector<1x128xf32>
    %453 = arith.mulf %447, %447 : vector<1x128xf32>
    %454 = arith.subf %452, %453 : vector<1x128xf32>
    %cst_295 = arith.constant 0.000000e+00 : f32
    %455 = vector.broadcast %cst_295 : f32 to vector<1x128xf32>
    %456 = arith.maximumf %454, %455 : vector<1x128xf32>
    %c0_296 = arith.constant 0 : index
    %c0_297 = arith.constant 0 : index
    %457 = vector.load %arg41[%c0_296, %c0_297] : memref<1x128xf32, #tpu.memory_space<vmem>>, vector<1x128xf32>
    %cst_298 = arith.constant 9.99999974E-6 : f32
    %458 = vector.broadcast %cst_298 : f32 to vector<1x128xf32>
    %459 = arith.addf %456, %458 : vector<1x128xf32>
    %460 = math.rsqrt %459 : vector<1x128xf32>
    %461 = arith.mulf %457, %460 : vector<1x128xf32>
    %c0_299 = arith.constant 0 : index
    %c0_300 = arith.constant 0 : index
    %462 = vector.load %arg42[%c0_299, %c0_300] : memref<1x128xf32, #tpu.memory_space<vmem>>, vector<1x128xf32>
    %463 = arith.mulf %447, %461 : vector<1x128xf32>
    %464 = arith.subf %462, %463 : vector<1x128xf32>
    %465 = vector.broadcast %461 : vector<1x128xf32> to vector<36x128xf32>
    %466 = arith.mulf %443, %465 : vector<36x128xf32>
    %467 = vector.broadcast %464 : vector<1x128xf32> to vector<36x128xf32>
    %468 = arith.addf %466, %467 : vector<36x128xf32>
    %cst_301 = arith.constant 1.000000e-01 : f32
    %469 = vector.broadcast %cst_301 : f32 to vector<36x128xf32>
    %470 = arith.mulf %469, %468 : vector<36x128xf32>
    %471 = arith.maximumf %468, %470 : vector<36x128xf32>
    %472 = arith.truncf %471 : vector<36x128xf32> to vector<36x128xbf16>
    %c0_302 = arith.constant 0 : index
    %c0_303 = arith.constant 0 : index
    %c0_304 = arith.constant 0 : index
    %473 = vector.load %arg43[%c0_302, %c0_303, %c0_304] : memref<1x128x1xbf16, #tpu.memory_space<vmem>>, vector<1x128x1xbf16>
    %474 = vector.shape_cast %473 : vector<1x128x1xbf16> to vector<128x1xbf16>
    %cst_305 = arith.constant dense<0.000000e+00> : vector<36x1xf32>
    %475 = tpu.matmul %472, %474, %cst_305 {dimension_numbers = #tpu.dot_dimension_numbers<[1], [0], [0], [1], [0, 0, 1, 1], [], []>} : vector<36x128xbf16>, vector<128x1xbf16>, vector<36x1xf32> -> vector<36x1xf32>
    %c0_306 = arith.constant 0 : index
    %c0_307 = arith.constant 0 : index
    %476 = vector.load %arg44[%c0_306, %c0_307] : memref<1x1xf32, #tpu.memory_space<vmem>>, vector<1x1xf32>
    %477 = vector.broadcast %476 : vector<1x1xf32> to vector<36x1xf32>
    %478 = arith.addf %475, %477 : vector<36x1xf32>
    %c0_308 = arith.constant 0 : index
    %c0_309 = arith.constant 0 : index
    %479 = vector.load %arg45[%c0_308, %c0_309] : memref<36x1xf32, #tpu.memory_space<vmem>>, vector<36x1xf32>
    tpu.vector_store %arg45[%c0_308, %c0_309], %478 {strides = array<i32>} : memref<36x1xf32, #tpu.memory_space<vmem>>, vector<36x1xf32>,
    return
  }
}

</mosaic_0001>

<bundles_post_ra>
// kernel: fwd.1
= control target key start
LH: loop header
LB: loop body
LE: loop exit
PB: predicated region body
PF: predicated region fallthrough
CT: control target
= control target key end

     0   :  { %v4550_v0 = vmov 0   ;;  %s4551_s3 = smov 2   ;;  %s4552_s7 = smov 1   ;;  %vm207_vm0 = vcmask 23552   ;;  %v4553_v25 = vmov 0.0   ;;  %vm456_vm1 = vcmask 1040384   ;;  %s5988_s0 = inlined_call_operand.smem [shape: u32[46], index: -1, kind: input, shape index: {}] }
   0x1   :  { %4528 = vset.pattern.permute.xlu2 %v4550_v0  ;;  %4527 = vset.pattern.permute.xlu1 %v4550_v0  ;;  %s4606_s6 = sld [smem:[%s5988_s0 + %s4551_s3]]   ;;  %211 = vst.msk [vmem:[#allocation2 + $0x18] sm:$0xff] %vm207_vm0, %v4553_v25  ;;  %s4554_s14 = smov 3   ;;  %vm457_vm2 = vcmask 1041408   ;;  %v4555_v34 = vmov 65535   ;;  %vm858_vm3 = vcmask 130048   ;;  %vm1407_vm7 = vcmask 261120  }
   0x2   :  { %4526 = vset.pattern.permute.xlu0 %v4550_v0  ;;  %s4611_s10 = sld [smem:[%s5988_s0 + %s4552_s7]]   ;;  %212 = vst.msk [vmem:[#allocation2 + $0x20] sm:$0xff] %vm207_vm0, %v4553_v25  ;;  %v458_v35 = vsel %vm456_vm1, 4294967295, %v4555_v34  ;;  %s4556_s18 = smov 6   ;;  %vm2452_vm1 = vcmask 523264  }
   0x3   :  { %s4637_s13 = sld [smem:[%s5988_s0]]   ;;  %208 = vst.msk [vmem:[#allocation2] sm:$0xff] %vm207_vm0, %v4553_v25  ;;  %v459_v37 = vsel %vm457_vm2, %v458_v35, 0  ;;  %s4557_s22 = smov 14   ;;  %vm2460_vm2 = vcmask 519168  }
   0x4   :  { %s4655_s17 = sld [smem:[%s5988_s0 + %s4554_s14]]   ;;  %209 = vst.msk [vmem:[#allocation2 + $0x8] sm:$0xff] %vm207_vm0, %v4553_v25  ;;  %s4558_s26 = smov 13  }
   0x5   :  { %210 = vst.msk [vmem:[#allocation2 + $0x10] sm:$0xff] %vm207_vm0, %v4553_v25  ;;  %s4714_s21 = sld [smem:[%s5988_s0 + %s4556_s18]]   ;;  %s4559_s30 = smov 18  }
   0x6   :  { %213 = vst.msk [vmem:[#allocation2 + $0x28] sm:$0xff] %vm207_vm0, %v4553_v25  ;;  %s4744_s25 = sld [smem:[%s5988_s0 + %s4557_s22]]   ;;  %s4560_s4 = smov 25  }
   0x7   :  { %v621_v1 = vld [vmem:[%s4606_s6 + $0x10] sm:$0xff]  ;;  %v619_v2 = vld [vmem:[%s4606_s6] sm:$0xff]  ;;  %v622_v4 = vld [vmem:[%s4606_s6 + $0x18] sm:$0xff]  ;;  %214 = vst.msk [vmem:[#allocation2 + $0x30] sm:$0xff] %vm207_vm0, %v4553_v25  ;;  %s4752_s29 = sld [smem:[%s5988_s0 + %s4558_s26]]   ;;  %s4561_s8 = smov 26  }
   0x8   :  { %649 = vperm.xlu2 %4528, %v621_v1   ;;  %639 = vperm.xlu0 %4526, %v619_v2   ;;  %v264_v3 = vld [vmem:[%s4611_s10] sm:$0xff]  ;;  %v620_v5 = vld [vmem:[%s4606_s6 + $0x8] sm:$0xff]  ;;  %v266_v8 = vld [vmem:[%s4611_s10 + $0x10] sm:$0xff]  ;;  %215 = vst.msk [vmem:[#allocation2 + $0x38] sm:$0xff] %vm207_vm0, %v4553_v25  ;;  %s4790_s3 = sld [smem:[%s5988_s0 + %s4559_s30]]   ;;  %s4562_s12 = smov 34  }
   0x9   :  { %284 = vperm.xlu1 %4527, %v264_v3   ;;  %v265_v6 = vld [vmem:[%s4611_s10 + $0x8] sm:$0xff]  ;;  %v623_v7 = vld [vmem:[%s4606_s6 + $0x20] sm:$0xff]  ;;  %v267_v9 = vld [vmem:[%s4611_s10 + $0x18] sm:$0xff]  ;;  %216 = vst.msk [vmem:[#allocation2 + $0x40] sm:$0xff] %vm207_vm0, %v4553_v25  ;;  %s4801_s7 = sld [smem:[%s5988_s0 + %s4560_s4]]   ;;  %s4563_s16 = smov 33  }
   0xa   :  { %v269_v10 = vld [vmem:[%s4611_s10 + $0x28] sm:$0xff]  ;;  %v268_v12 = vld [vmem:[%s4611_s10 + $0x20] sm:$0xff]  ;;  %v270_v13 = vld [vmem:[%s4611_s10 + $0x30] sm:$0xff]  ;;  %217 = vst.msk [vmem:[#allocation2 + $0x48] sm:$0xff] %vm207_vm0, %v4553_v25  ;;  %s4809_s11 = sld [smem:[%s5988_s0 + %s4561_s8]]   ;;  %s4564_s20 = smov 38  }
   0xb   :  { %v624_v11 = vld [vmem:[%s4606_s6 + $0x28] sm:$0xff]  ;;  %v625_v14 = vld [vmem:[%s4606_s6 + $0x30] sm:$0xff]  ;;  %v626_v15 = vld [vmem:[%s4606_s6 + $0x38] sm:$0xff]  ;;  %218 = vst.msk [vmem:[#allocation2 + $0x50] sm:$0xff] %vm207_vm0, %v4553_v25  ;;  %s4829_s15 = sld [smem:[%s5988_s0 + %s4562_s12]]   ;;  %s4565_s24 = smov 39  }
   0xc   :  { %v628_v16 = vld [vmem:[%s4606_s6 + $0x48] sm:$0xff]  ;;  %v271_v17 = vld [vmem:[%s4611_s10 + $0x38] sm:$0xff]  ;;  %v627_v18 = vld [vmem:[%s4606_s6 + $0x40] sm:$0xff]  ;;  %219 = vst.msk [vmem:[#allocation2 + $0x58] sm:$0xff] %vm207_vm0, %v4553_v25  ;;  %s4836_s19 = sld [smem:[%s5988_s0 + %s4563_s16]]   ;;  %s4566_s28 = smov 7  }
   0xd   :  { %v629_v19 = vld [vmem:[%s4606_s6 + $0x50] sm:$0xff]  ;;  %v272_v20 = vld [vmem:[%s4611_s10 + $0x40] sm:$0xff]  ;;  %v273_v21 = vld [vmem:[%s4611_s10 + $0x48] sm:$0xff]  ;;  %220 = vst.msk [vmem:[#allocation2 + $0x60] sm:$0xff] %vm207_vm0, %v4553_v25  ;;  %s4851_s23 = sld [smem:[%s5988_s0 + %s4564_s20]]   ;;  %s4567_s2 = smov 4  }
   0xe   :  { %v275_v22 = vld [vmem:[%s4611_s10 + $0x58] sm:$0xff]  ;;  %v274_v24 = vld [vmem:[%s4611_s10 + $0x50] sm:$0xff]  ;;  %v276_v28 = vld [vmem:[%s4611_s10 + $0x60] sm:$0xff]  ;;  %221 = vst.msk [vmem:[#allocation2 + $0x68] sm:$0xff] %vm207_vm0, %v4553_v25  ;;  %s4867_s27 = sld [smem:[%s5988_s0 + %s4565_s24]]   ;;  %s4570_s14 = smov 8  }
   0xf   :  { %v630_v23 = vld [vmem:[%s4606_s6 + $0x58] sm:$0xff]  ;;  %v191_v26 = vld [vmem:[%s4637_s13 + $0x10] sm:$0xff]  ;;  %v631_v29 = vld [vmem:[%s4606_s6 + $0x60] sm:$0xff]  ;;  %222 = vst.msk [vmem:[#allocation2 + $0x70] sm:$0xff] %vm207_vm0, %v4553_v25  ;;  %s4014_s1 = sld [smem:[%s5988_s0 + %s4566_s28]]   ;;  %s4571_s18 = smov 9  }
  0x10   :  { %654 = vperm.xlu2 %4528, %v622_v4   ;;  %644 = vperm.xlu0 %4526, %v620_v5   ;;  %v192_v27 = vld [vmem:[%s4637_s13 + $0x18] sm:$0xff]  ;;  %230 = vst.msk [vmem:[#allocation2 + $0x18] sm:$0xff] %vm207_vm0, %v191_v26  ;;  %v632_v30 = vld [vmem:[%s4606_s6 + $0x68] sm:$0xff]  ;;  %v4053_v33 = vld [vmem:[%s4655_s17 + $0x2] sm:$0x3]  ;;  %s4011_s5 = sld [smem:[%s5988_s0 + %s4567_s2]]   ;;  %s4572_s22 = smov 15  }
  0x11   :  { %289 = vperm.xlu1 %4527, %v265_v6   ;;  %231 = vst.msk [vmem:[#allocation2 + $0x20] sm:$0xff] %vm207_vm0, %v192_v27  ;;  %v634_v31 = vld [vmem:[%s4606_s6 + $0x78] sm:$0xff]  ;;  %v277_v32 = vld [vmem:[%s4611_s10 + $0x68] sm:$0xff]  ;;  %v633_v36 = vld [vmem:[%s4606_s6 + $0x70] sm:$0xff]  ;;  %v461_v38 = vand.u32 %v4053_v33, %v459_v37  ;;  %s4573_s26 = smov 11   ;;  %s4574_s30 = smov 12  }
  0x12   :  { %223 = vst.msk [vmem:[#allocation2 + $0x78] sm:$0xff] %vm207_vm0, %v4553_v25  ;;  %v635_v39 = vld [vmem:[%s4606_s6 + $0x80] sm:$0xff]  ;;  %v278_v40 = vld [vmem:[%s4611_s10 + $0x70] sm:$0xff]  ;;  %v279_v42 = vld [vmem:[%s4611_s10 + $0x78] sm:$0xff]  ;;  %s4575_s4 = smov 19   ;;  %s4576_s8 = smov 16  }
  0x13   :  { %4477 = vmatpush.bf16.msra.mxu1 %v461_v38  ;;  %470 = vmatpush.bf16.msra.mxu0 %v461_v38  ;;  %224 = vst.msk [vmem:[#allocation2 + $0x80] sm:$0xff] %vm207_vm0, %v4553_v25  ;;  %v193_v41 = vld [vmem:[%s4637_s13 + $0x20] sm:$0xff]  ;;  %v194_v43 = vld [vmem:[%s4637_s13 + $0x28] sm:$0xff]  ;;  %v195_v57 = vld [vmem:[%s4637_s13 + $0x30] sm:$0xff]  ;;  %s4577_s12 = smov 17   ;;  %s4578_s16 = smov 22  }
  0x14   :  { %225 = vst.msk [vmem:[#allocation2 + $0x88] sm:$0xff] %vm207_vm0, %v4553_v25  ;;  %v205_v44 = vld [vmem:[%s4637_s13 + $0x80] sm:$0xff]  ;;  %v206_v45 = vld [vmem:[%s4637_s13 + $0x88] sm:$0xff]  ;;  %v1116_v60 = vld [vmem:[%s4714_s21 + $0x10] sm:$0xff]  ;;  %s4579_s20 = smov 20   ;;  %s4580_s24 = smov 21  }
  0x15   :  { %226 = vst.msk [vmem:[#allocation2 + $0x90] sm:$0xff] %vm207_vm0, %v4553_v25  ;;  %v189_v46 = vld [vmem:[%s4637_s13] sm:$0xff]  ;;  %v190_v47 = vld [vmem:[%s4637_s13 + $0x8] sm:$0xff]  ;;  %v199_v0 = vld [vmem:[%s4637_s13 + $0x50] sm:$0xff]  ;;  %s4581_s28 = smov 27   ;;  %s4582_s2 = smov 23  }
  0x16   :  { %227 = vst.msk [vmem:[#allocation2 + $0x98] sm:$0xff] %vm207_vm0, %v4553_v25  ;;  %v399_v48 = vld [vmem:[%s4655_s17] sm:$0x3]  ;;  %v281_v49 = vld [vmem:[%s4611_s10 + $0x88] sm:$0xff]  ;;  %v4072_v55 = vld [vmem:[%s4655_s17 + $0x4] sm:$0x3]  ;;  %s4015_s17 = sld [smem:[%s5988_s0 + %s4570_s14]]  }
  0x17   :  { %232 = vst.msk [vmem:[#allocation2 + $0x28] sm:$0xff] %vm207_vm0, %v193_v41  ;;  %v636_v50 = vld [vmem:[%s4606_s6 + $0x88] sm:$0xff]  ;;  %v545_v51 = vand.u32 %v459_v37, %v399_v48  ;;  %v280_v52 = vld [vmem:[%s4611_s10 + $0x80] sm:$0xff]  ;;  %v784_v58 = vand.u32 %v4072_v55, %v459_v37  ;;  %v200_v3 = vld [vmem:[%s4637_s13 + $0x58] sm:$0xff]  ;;  %s4568_s6 = smov 5   ;;  %s4569_s10 = smov 10  }
  0x18   :  { %659 = vperm.xlu2 %4528, %v623_v7   ;;  %294 = vperm.xlu0 %4526, %v266_v8   ;;  %233 = vst.msk [vmem:[#allocation2 + $0x30] sm:$0xff] %vm207_vm0, %v194_v43  ;;  %v198_v59 = vld [vmem:[%s4637_s13 + $0x48] sm:$0xff]  ;;  %v1114_v61 = vld [vmem:[%s4714_s21] sm:$0xff]  ;;  %v1117_v5 = vld [vmem:[%s4714_s21 + $0x18] sm:$0xff]  ;;  %s4012_s9 = sld [smem:[%s5988_s0 + %s4568_s6]]   ;;  %s4583_s6 = smov 24  }
  0x19   :  { %299 = vperm.xlu1 %4527, %v267_v9   ;;  %244 = vst.msk [vmem:[#allocation2 + $0x88] sm:$0xff] %vm207_vm0, %v205_v44  ;;  %554 = vmatpush.bf16.msrb.mxu1 %v545_v51  ;;  %v1115_v1 = vld [vmem:[%s4714_s21 + $0x8] sm:$0xff]  ;;  %v1118_v6 = vld [vmem:[%s4714_s21 + $0x20] sm:$0xff]  ;;  %v196_v7 = vld [vmem:[%s4637_s13 + $0x38] sm:$0xff]  ;;  %s4585_s14 = smov 28  }
  0x1a   :  { %245 = vst.msk [vmem:[#allocation2 + $0x90] sm:$0xff] %vm207_vm0, %v206_v45  ;;  %793 = vmatpush.bf16.msra.mxu2 %v784_v58  ;;  %v1119_v4 = vld [vmem:[%s4714_s21 + $0x28] sm:$0xff]  ;;  %v1122_v8 = vld [vmem:[%s4714_s21 + $0x40] sm:$0xff]  ;;  %v204_v33 = vld [vmem:[%s4637_s13 + $0x78] sm:$0xff] }
  0x1b   :  { %228 = vst.msk [vmem:[#allocation2 + $0x8] sm:$0xff] %vm207_vm0, %v189_v46  ;;  %v197_v9 = vld [vmem:[%s4637_s13 + $0x40] sm:$0xff]  ;;  %v1745_v35 = vld [vmem:[%s4752_s29 + $0x18] sm:$0xff]  ;;  %v1948_v46 = vld [vmem:[%s4744_s25 + $0x10] sm:$0xff] }
  0x1c   :  { %229 = vst.msk [vmem:[#allocation2 + $0x10] sm:$0xff] %vm207_vm0, %v190_v47  ;;  %v1746_v43 = vld [vmem:[%s4752_s29 + $0x20] sm:$0xff]  ;;  %v1949_v47 = vld [vmem:[%s4744_s25 + $0x18] sm:$0xff] }
  0x1d   :  { %234 = vst.msk [vmem:[#allocation2 + $0x38] sm:$0xff] %vm207_vm0, %v195_v57  ;;  %v249_v51 = vld [vmem:[#allocation2 + $0x1f] sm:$0xff]  ;;  %v203_v57 = vld [vmem:[%s4637_s13 + $0x70] sm:$0xff] }
  0x1e   :  { %237 = vst.msk [vmem:[#allocation2 + $0x50] sm:$0xff] %vm207_vm0, %v198_v59  ;;  %v604_v45 = vld [vmem:[#allocation2 + $0x21] sm:$0xff] }
  0x1f   :  { %238 = vst.msk [vmem:[#allocation2 + $0x58] sm:$0xff] %vm207_vm0, %v199_v0  ;;  %v405_v37 = vld [vmem:[#allocation2 + $0x30] sm:$0xff]  ;;  %v1951_v59 = vld [vmem:[%s4744_s25 + $0x28] sm:$0xff]  ;;  %v1950_v0 = vld [vmem:[%s4744_s25 + $0x20] sm:$0xff] }
  0x20   :  { %309 = vperm.xlu2 %4528, %v269_v10   ;;  %664 = vperm.xlu0 %4526, %v624_v11   ;;  %v416_v53 = vld [vmem:[#allocation2 + $0x88] sm:$0xff]  ;;  %239 = vst.msk [vmem:[#allocation2 + $0x60] sm:$0xff] %vm207_vm0, %v200_v3  ;;  %v1120_v10 = vld [vmem:[%s4714_s21 + $0x30] sm:$0xff]  ;;  %v402_v11 = vld [vmem:[#allocation2 + $0x18] sm:$0xff] }
  0x21   :  { %304 = vperm.xlu1 %4527, %v268_v12   ;;  %v417_v54 = vld [vmem:[#allocation2 + $0x90] sm:$0xff]  ;;  %235 = vst.msk [vmem:[#allocation2 + $0x40] sm:$0xff] %vm207_vm0, %v196_v7  ;;  %v403_v12 = vld [vmem:[#allocation2 + $0x20] sm:$0xff]  ;;  %v1749_v7 = vld [vmem:[%s4752_s29 + $0x38] sm:$0xff] }
  0x22   :  { %v426_v56 = vpack.c.bf16 %v417_v54, %v416_v53  ;;  %v400_v62 = vld [vmem:[#allocation2 + $0x8] sm:$0xff]  ;;  %236 = vst.msk [vmem:[#allocation2 + $0x48] sm:$0xff] %vm207_vm0, %v197_v9 }
  0x23   :  { %v401_v63 = vld [vmem:[#allocation2 + $0x10] sm:$0xff]  ;;  %243 = vst.msk [vmem:[#allocation2 + $0x80] sm:$0xff] %vm207_vm0, %v204_v33  ;;  %v250_v9 = vld [vmem:[#allocation2 + $0x27] sm:$0xff] }
  0x24   :  { %4062 = vmatmul.msk.bf16.vlgmr.msra.gmra.mxu1 %vm207_vm0, %v426_v56  ;;  %v418_v2 = vpack.c.bf16 %v401_v63, %v400_v62  ;;  %v202_v56 = vld [vmem:[%s4637_s13 + $0x68] sm:$0xff]  ;;  %242 = vst.msk [vmem:[#allocation2 + $0x78] sm:$0xff] %vm207_vm0, %v203_v57 }
  0x25   :  { %241 = vst.msk [vmem:[#allocation2 + $0x70] sm:$0xff] %vm207_vm0, %v202_v56  ;;  %v1747_v63 = vld [vmem:[%s4752_s29 + $0x28] sm:$0xff] }
  0x26   :  { %4054 = vmatmul.msk.bf16.vlgmr.msra.gmra.mxu0 %vm207_vm0, %v418_v2  ;;  %1058 = vst.msk [vmem:[#allocation3] sm:$0xff] %vm858_vm3, %v4553_v25 }
  0x27   :  { %1059 = vst.msk [vmem:[#allocation3 + $0x8] sm:$0xff] %vm858_vm3, %v4553_v25 }
  0x28   :  { %314 = vperm.xlu2 %4528, %v270_v13   ;;  %669 = vperm.xlu0 %4526, %v625_v14   ;;  %v1121_v13 = vld [vmem:[%s4714_s21 + $0x38] sm:$0xff]  ;;  %v419_v14 = vpack.c.bf16 %v403_v12, %v402_v11  ;;  %v251_v11 = vld [vmem:[#allocation2 + $0x2f] sm:$0xff]  ;;  %1060 = vst.msk [vmem:[#allocation3 + $0x10] sm:$0xff] %vm858_vm3, %v4553_v25  ;;  %s4016_s21 = sld [smem:[%s5988_s0 + %s4571_s18]]   ;;  %s4586_s18 = smov 29  }
  0x29   :  { %674 = vperm.xlu1 %4527, %v626_v15   ;;  %v254_v56 = vld [vmem:[#allocation2 + $0x47] sm:$0xff]  ;;  %1061 = vst.msk [vmem:[#allocation3 + $0x18] sm:$0xff] %vm858_vm3, %v4553_v25 }
  0x2a   :  { %1062 = vst.msk [vmem:[#allocation3 + $0x20] sm:$0xff] %vm858_vm3, %v4553_v25 }
  0x2b   :  { %1063 = vst.msk [vmem:[#allocation3 + $0x28] sm:$0xff] %vm858_vm3, %v4553_v25 }
  0x2c   :  { %1064 = vst.msk [vmem:[#allocation3 + $0x30] sm:$0xff] %vm858_vm3, %v4553_v25 }
  0x2d   :  { %1065 = vst.msk [vmem:[#allocation3 + $0x38] sm:$0xff] %vm858_vm3, %v4553_v25 }
  0x2e   :  { %1066 = vst.msk [vmem:[#allocation3 + $0x40] sm:$0xff] %vm858_vm3, %v4553_v25 }
  0x2f   :  { %1067 = vst.msk [vmem:[#allocation3 + $0x48] sm:$0xff] %vm858_vm3, %v4553_v25 }
  0x30   :  { %684 = vperm.xlu2 %4528, %v628_v16   ;;  %319 = vperm.xlu0 %4526, %v271_v17   ;;  %v201_v17 = vld [vmem:[%s4637_s13 + $0x60] sm:$0xff]  ;;  %1068 = vst.msk [vmem:[#allocation3 + $0x50] sm:$0xff] %vm858_vm3, %v4553_v25  ;;  %s5192_s13 = sld [smem:[%s5988_s0 + %s4569_s10]]   ;;  %s4584_s10 = smov 30  }
  0x31   :  { %679 = vperm.xlu1 %4527, %v627_v18   ;;  %240 = vst.msk [vmem:[#allocation2 + $0x68] sm:$0xff] %vm207_vm0, %v201_v17  ;;  %v1946_v18 = vld [vmem:[%s4744_s25] sm:$0xff] }
  0x32   :  { %1069 = vst.msk [vmem:[#allocation3 + $0x58] sm:$0xff] %vm858_vm3, %v4553_v25 }
  0x33   :  { %1070 = vst.msk [vmem:[#allocation3 + $0x60] sm:$0xff] %vm858_vm3, %v4553_v25 }
  0x34   :  { %1071 = vst.msk [vmem:[#allocation3 + $0x68] sm:$0xff] %vm858_vm3, %v4553_v25 }
  0x35   :  { %1072 = vst.msk [vmem:[#allocation3 + $0x70] sm:$0xff] %vm858_vm3, %v4553_v25 }
  0x36   :  { %4055 = vmatmul.msk.bf16.gmra.mxu0 %vm207_vm0, %v419_v14  ;;  %1073 = vst.msk [vmem:[#allocation3 + $0x78] sm:$0xff] %vm858_vm3, %v4553_v25 }
  0x37   :  { %1074 = vst.msk [vmem:[#allocation3 + $0x80] sm:$0xff] %vm858_vm3, %v4553_v25 }
  0x38   :  { %689 = vperm.xlu2 %4528, %v629_v19   ;;  %324 = vperm.xlu0 %4526, %v272_v20   ;;  %v1742_v19 = vld [vmem:[%s4752_s29] sm:$0xff]  ;;  %v1743_v20 = vld [vmem:[%s4752_s29 + $0x8] sm:$0xff]  ;;  %1075 = vst.msk [vmem:[#allocation3 + $0x88] sm:$0xff] %vm858_vm3, %v4553_v25 }
  0x39   :  { %329 = vperm.xlu1 %4527, %v273_v21   ;;  %v601_v21 = vld [vmem:[#allocation2 + $0x9] sm:$0xff]  ;;  %1076 = vst.msk [vmem:[#allocation3 + $0x90] sm:$0xff] %vm858_vm3, %v4553_v25 }
  0x3a   :  { %1713 = vst.msk [vmem:[#allocation4] sm:$0xff] %vm858_vm3, %v4553_v25 }
  0x3b   :  { %1714 = vst.msk [vmem:[#allocation4 + $0x8] sm:$0xff] %vm858_vm3, %v4553_v25 }
  0x3c   :  { %1715 = vst.msk [vmem:[#allocation4 + $0x10] sm:$0xff] %vm858_vm3, %v4553_v25 }
  0x3d   :  { %1716 = vst.msk [vmem:[#allocation4 + $0x18] sm:$0xff] %vm858_vm3, %v4553_v25 }
  0x3e   :  { %1717 = vst.msk [vmem:[#allocation4 + $0x20] sm:$0xff] %vm858_vm3, %v4553_v25 }
  0x3f   :  { %1718 = vst.msk [vmem:[#allocation4 + $0x28] sm:$0xff] %vm858_vm3, %v4553_v25 }
  0x40   :  { %339 = vperm.xlu2 %4528, %v275_v22   ;;  %694 = vperm.xlu0 %4526, %v630_v23   ;;  %v602_v22 = vld [vmem:[#allocation2 + $0x11] sm:$0xff]  ;;  %v246_v23 = vld [vmem:[#allocation2 + $0x7] sm:$0xff]  ;;  %1719 = vst.msk [vmem:[#allocation4 + $0x30] sm:$0xff] %vm858_vm3, %v4553_v25 }
  0x41   :  { %334 = vperm.xlu1 %4527, %v274_v24   ;;  %v247_v24 = vld [vmem:[#allocation2 + $0xf] sm:$0xff]  ;;  %1720 = vst.msk [vmem:[#allocation4 + $0x38] sm:$0xff] %vm858_vm3, %v4553_v25 }
  0x42   :  { %1721 = vst.msk [vmem:[#allocation4 + $0x40] sm:$0xff] %vm858_vm3, %v4553_v25 }
  0x43   :  { %1722 = vst.msk [vmem:[#allocation4 + $0x48] sm:$0xff] %vm858_vm3, %v4553_v25 }
  0x44   :  { %1723 = vst.msk [vmem:[#allocation4 + $0x50] sm:$0xff] %vm858_vm3, %v4553_v25 }
  0x45   :  { %2207 = vst.msk [vmem:[#allocation5] sm:$0xff] %vm1407_vm7, %v4553_v25 }
  0x46   :  { %2208 = vst.msk [vmem:[#allocation5 + $0x8] sm:$0xff] %vm1407_vm7, %v4553_v25 }
  0x47   :  { %2209 = vst.msk [vmem:[#allocation5 + $0x10] sm:$0xff] %vm1407_vm7, %v4553_v25 }
  0x48   :  { %344 = vperm.xlu2 %4528, %v276_v28   ;;  %699 = vperm.xlu0 %4526, %v631_v29   ;;  %2210 = vst.msk [vmem:[#allocation5 + $0x18] sm:$0xff] %vm1407_vm7, %v4553_v25 }
  0x49   :  { %704 = vperm.xlu1 %4527, %v632_v30   ;;  %2211 = vst.msk [vmem:[#allocation5 + $0x20] sm:$0xff] %vm1407_vm7, %v4553_v25 }
  0x4a   :  { %2212 = vst.msk [vmem:[#allocation5 + $0x28] sm:$0xff] %vm1407_vm7, %v4553_v25 }
  0x4b   :  { %2213 = vst.msk [vmem:[#allocation5 + $0x30] sm:$0xff] %vm1407_vm7, %v4553_v25 }
  0x4c   :  { %2214 = vst.msk [vmem:[#allocation5 + $0x38] sm:$0xff] %vm1407_vm7, %v4553_v25 }
  0x4d   :  { %2215 = vst.msk [vmem:[#allocation5 + $0x40] sm:$0xff] %vm1407_vm7, %v4553_v25 }
  0x4e   :  { %2216 = vst.msk [vmem:[#allocation5 + $0x48] sm:$0xff] %vm1407_vm7, %v4553_v25 }
  0x4f   :  { %2686 = vst.msk [vmem:[#allocation6] sm:$0xff] %vm1407_vm7, %v4553_v25 }
  0x50   :  { %714 = vperm.xlu2 %4528, %v634_v31   ;;  %349 = vperm.xlu0 %4526, %v277_v32   ;;  %2687 = vst.msk [vmem:[#allocation6 + $0x8] sm:$0xff] %vm1407_vm7, %v4553_v25 }
  0x51   :  { %709 = vperm.xlu1 %4527, %v633_v36   ;;  %v404_v36 = vld [vmem:[#allocation2 + $0x28] sm:$0xff]  ;;  %2688 = vst.msk [vmem:[#allocation6 + $0x10] sm:$0xff] %vm1407_vm7, %v4553_v25 }
  0x52   :  { %v420_v41 = vpack.c.bf16 %v405_v37, %v404_v36  ;;  %2689 = vst.msk [vmem:[#allocation6 + $0x18] sm:$0xff] %vm1407_vm7, %v4553_v25 }
  0x53   :  { %2690 = vst.msk [vmem:[#allocation6 + $0x20] sm:$0xff] %vm1407_vm7, %v4553_v25 }
  0x54   :  { %4056 = vmatmul.msk.bf16.gmra.mxu0 %vm207_vm0, %v420_v41  ;;  %2691 = vst.msk [vmem:[#allocation6 + $0x28] sm:$0xff] %vm1407_vm7, %v4553_v25 }
  0x55   :  { %3179 = vst.msk [vmem:[#allocation7] sm:$0xff] %vm1407_vm7, %v4553_v25 }
  0x56   :  { %3180 = vst.msk [vmem:[#allocation7 + $0x8] sm:$0xff] %vm1407_vm7, %v4553_v25 }
  0x57   :  { %3181 = vst.msk [vmem:[#allocation7 + $0x10] sm:$0xff] %vm1407_vm7, %v4553_v25 }
  0x58   :  { %719 = vperm.xlu2 %4528, %v635_v39   ;;  %354 = vperm.xlu0 %4526, %v278_v40   ;;  %v1947_v39 = vld [vmem:[%s4744_s25 + $0x8] sm:$0xff]  ;;  %v1744_v40 = vld [vmem:[%s4752_s29 + $0x10] sm:$0xff]  ;;  %3182 = vst.msk [vmem:[#allocation7 + $0x18] sm:$0xff] %vm1407_vm7, %v4553_v25 }
  0x59   :  { %359 = vperm.xlu1 %4527, %v279_v42   ;;  %v603_v42 = vld [vmem:[#allocation2 + $0x19] sm:$0xff]  ;;  %3183 = vst.msk [vmem:[#allocation7 + $0x20] sm:$0xff] %vm1407_vm7, %v4553_v25 }
  0x5a   :  { %3184 = vst.msk [vmem:[#allocation7 + $0x28] sm:$0xff] %vm1407_vm7, %v4553_v25 }
  0x5b   :  { %3523 = vst.msk [vmem:[#allocation8] sm:$0xff] %vm2452_vm1, %v4553_v25 }
  0x5c   :  { %3524 = vst.msk [vmem:[#allocation8 + $0x8] sm:$0xff] %vm2452_vm1, %v4553_v25 }
  0x5d   :  { %3525 = vst.msk [vmem:[#allocation8 + $0x10] sm:$0xff] %vm2452_vm1, %v4553_v25 }
  0x5e   :  { %3526 = vst.msk [vmem:[#allocation8 + $0x18] sm:$0xff] %vm2452_vm1, %v4553_v25 }
  0x5f   :  { %3527 = vst.msk [vmem:[#allocation8 + $0x20] sm:$0xff] %vm2452_vm1, %v4553_v25 }
  0x60   :  { %369 = vperm.xlu2 %4528, %v281_v49   ;;  %724 = vperm.xlu0 %4526, %v636_v50   ;;  %v248_v49 = vld [vmem:[#allocation2 + $0x17] sm:$0xff]  ;;  %3528 = vst.msk [vmem:[#allocation8 + $0x28] sm:$0xff] %vm2452_vm1, %v4553_v25 }
  0x61   :  { %364 = vperm.xlu1 %4527, %v280_v52  }
  0x62   :  { %v650_v30 = vpop.permute.xlu2 %649 }
  0x63   :  { %v729_v52 = vmul.f32 %v650_v30, %v603_v42  ;;  %v608_v30 = vld [vmem:[#allocation2 + $0x41] sm:$0xff] }
  0x68   :  { %1135 = vperm.xlu2 %4528, %v1116_v60   ;;  %1125 = vperm.xlu0 %4526, %v1114_v61   ;;  %v406_v60 = vld [vmem:[#allocation2 + $0x38] sm:$0xff]  ;;  %v407_v61 = vld [vmem:[#allocation2 + $0x40] sm:$0xff] }
  0x69   :  { %1130 = vperm.xlu1 %4527, %v1115_v1   ;;  %v421_v1 = vpack.c.bf16 %v407_v61, %v406_v60 }
  0x6a   :  { %v655_v44 = vpop.permute.xlu2 %654 }
  0x6b   :  { %v730_v53 = vmul.f32 %v655_v44, %v604_v45  ;;  %4057 = vmatmul.msk.bf16.gmra.mxu0 %vm207_vm0, %v421_v1  ;;  %v410_v44 = vld [vmem:[#allocation2 + $0x58] sm:$0xff]  ;;  %v411_v45 = vld [vmem:[#allocation2 + $0x60] sm:$0xff]  ;;  %v413_v1 = vld [vmem:[#allocation2 + $0x70] sm:$0xff] }
  0x6d   :  { %v746_v58 = vpack.c.bf16 %v730_v53, %v729_v52  ;;  %v609_v52 = vld [vmem:[#allocation2 + $0x49] sm:$0xff] }
  0x6e   :  { %v2704_v53 = vld [vmem:[%s4801_s7 + $0x8] sm:$0xff] }
  0x70   :  { %1150 = vperm.xlu2 %4528, %v1119_v4   ;;  %1140 = vperm.xlu0 %4526, %v1117_v5   ;;  %v1952_v4 = vld [vmem:[%s4744_s25 + $0x30] sm:$0xff] }
  0x71   :  { %1145 = vperm.xlu1 %4527, %v1118_v6   ;;  %v606_v5 = vld [vmem:[#allocation2 + $0x31] sm:$0xff] }
  0x72   :  { %v660_v2 = vpop.permute.xlu2 %659  ;;  %v1748_v6 = vld [vmem:[%s4752_s29 + $0x30] sm:$0xff] }
  0x78   :  { %1165 = vperm.xlu2 %4528, %v1122_v8   ;;  %1155 = vperm.xlu0 %4526, %v1120_v10   ;;  %v605_v10 = vld [vmem:[#allocation2 + $0x29] sm:$0xff] }
  0x79   :  { %1160 = vperm.xlu1 %4527, %v1121_v13   ;;  %v731_v14 = vmul.f32 %v660_v2, %v605_v10  ;;  %v2855_v10 = vld [vmem:[%s4809_s11 + $0x20] sm:$0xf] }
  0x7a   :  { %v640_v15 = vpop.permute.xlu0 %639 }
  0x7b   :  { %v285_v16 = vpop.permute.xlu1 %284  ;;  %v727_v27 = vmul.f32 %v640_v15, %v601_v21  ;;  %v310_v15 = vpop.permute.xlu2 %309  ;;  %v409_v21 = vld [vmem:[#allocation2 + $0x50] sm:$0xff] }
  0x7c   :  { %v372_v31 = vmul.f32 %v285_v16, %v246_v23  ;;  %v377_v16 = vmul.f32 %v310_v15, %v251_v11  ;;  %v1953_v23 = vld [vmem:[%s4744_s25 + $0x38] sm:$0xff]  ;;  %v612_v11 = vld [vmem:[#allocation2 + $0x61] sm:$0xff] }
  0x7d   :  { %v256_v15 = vld [vmem:[#allocation2 + $0x57] sm:$0xff] }
  0x80   :  { %1957 = vperm.xlu2 %4528, %v1946_v18   ;;  %1753 = vperm.xlu0 %4526, %v1742_v19   ;;  %v1954_v19 = vld [vmem:[%s4744_s25 + $0x40] sm:$0xff]  ;;  %s4022_s25 = sld [smem:[%s5988_s0 + %s4572_s22]]   ;;  %s4587_s22 = smov 35  }
  0x81   :  { %1758 = vperm.xlu1 %4527, %v1743_v20   ;;  %v408_v20 = vld [vmem:[#allocation2 + $0x48] sm:$0xff] }
  0x82   :  { %v645_v26 = vpop.permute.xlu0 %644 }
  0x83   :  { %v728_v28 = vmul.f32 %v645_v26, %v602_v22  ;;  %v290_v29 = vpop.permute.xlu1 %289  ;;  %v422_v26 = vpack.c.bf16 %v409_v21, %v408_v20 }
  0x84   :  { %v373_v32 = vmul.f32 %v290_v29, %v247_v24  ;;  %v1750_v24 = vld [vmem:[%s4752_s29 + $0x40] sm:$0xff]  ;;  %v2239_v29 = vld [vmem:[%s4790_s3 + $0x10] sm:$0xff]  ;;  %s4018_s29 = sld [smem:[%s5988_s0 + %s4573_s26]]   ;;  %s4588_s26 = smov 31  }
  0x85   :  { %v745_v34 = vpack.c.bf16 %v728_v28, %v727_v27  ;;  %4058 = vmatmul.msk.bf16.gmra.mxu0 %vm207_vm0, %v422_v26  ;;  %v607_v28 = vld [vmem:[#allocation2 + $0x39] sm:$0xff] }
  0x86   :  { %v390_v38 = vpack.c.bf16 %v373_v32, %v372_v31  ;;  %v2237_v31 = vld [vmem:[%s4790_s3] sm:$0xff]  ;;  %v2238_v32 = vld [vmem:[%s4790_s3 + $0x8] sm:$0xff] }
  0x87   :  { %4073 = vmatmul.msk.bf16.vlgmr.msra.gmra.mxu2 %vm207_vm0, %v745_v34  ;;  %v253_v34 = vld [vmem:[#allocation2 + $0x3f] sm:$0xff] }
  0x88   :  { %4063 = vmatmul.msk.bf16.vlgmr.msrb.gmra.mxu1 %vm207_vm0, %v390_v38  ;;  %1768 = vperm.xlu2 %4528, %v1745_v35   ;;  %v252_v35 = vld [vmem:[#allocation2 + $0x37] sm:$0xff] }
  0x89   :  { %1962 = vperm.xlu0 %4526, %v1947_v39   ;;  %1763 = vperm.xlu1 %4527, %v1744_v40   ;;  %v315_v39 = vpop.permute.xlu2 %314 }
  0x8a   :  { %v295_v48 = vpop.permute.xlu0 %294  ;;  %v378_v40 = vmul.f32 %v315_v39, %v252_v35  ;;  %v3199_v35 = vld [vmem:[%s4836_s19 + $0x18] sm:$0xff] }
  0x8b   :  { %v300_v50 = vpop.permute.xlu1 %299  ;;  %v374_v54 = vmul.f32 %v295_v48, %v248_v49  ;;  %v2241_v48 = vld [vmem:[%s4790_s3 + $0x20] sm:$0xf]  ;;  %v423_v49 = vpack.c.bf16 %v411_v45, %v410_v44 }
  0x8c   :  { %v375_v55 = vmul.f32 %v300_v50, %v249_v51  ;;  %v2852_v51 = vld [vmem:[%s4809_s11 + $0x8] sm:$0xff] }
  0x8e   :  { %v391_v62 = vpack.c.bf16 %v375_v55, %v374_v54  ;;  %v2851_v54 = vld [vmem:[%s4809_s11] sm:$0xff] }
  0x90   :  { %1773 = vperm.xlu2 %4528, %v1746_v43   ;;  %v2703_v43 = vld [vmem:[%s4801_s7] sm:$0xff] }
  0x91   :  { %1967 = vperm.xlu0 %4526, %v1948_v46   ;;  %1972 = vperm.xlu1 %4527, %v1949_v47   ;;  %v2240_v47 = vld [vmem:[%s4790_s3 + $0x18] sm:$0xff]  ;;  %v685_v50 = vpop.permute.xlu2 %684  ;;  %s4019_s3 = sld [smem:[%s5988_s0 + %s4574_s30]]   ;;  %s4589_s30 = smov 32  }
  0x92   :  { %v665_v3 = vpop.permute.xlu0 %664 }
  0x93   :  { %v305_v8 = vpop.permute.xlu1 %304  ;;  %v732_v12 = vmul.f32 %v665_v3, %v606_v5  ;;  %v2853_v3 = vld [vmem:[%s4809_s11 + $0x10] sm:$0xff] }
  0x94   :  { %v376_v13 = vmul.f32 %v305_v8, %v250_v9  ;;  %v2705_v5 = vld [vmem:[%s4801_s7 + $0x10] sm:$0xff] }
  0x95   :  { %v747_v17 = vpack.c.bf16 %v732_v12, %v731_v14  ;;  %4059 = vmatmul.msk.bf16.gmra.mxu0 %vm207_vm0, %v423_v49  ;;  %v2854_v12 = vld [vmem:[%s4809_s11 + $0x18] sm:$0xff]  ;;  %v3200_v49 = vld [vmem:[%s4836_s19 + $0x20] sm:$0xf]  ;;  %s4023_s11 = sld [smem:[%s5988_s0 + %s4576_s8]]   ;;  %s4591_s8 = smov 36  }
  0x96   :  { %v392_v22 = vpack.c.bf16 %v377_v16, %v376_v13  ;;  %v2707_v13 = vld [vmem:[%s4801_s7 + $0x20] sm:$0xf] }
  0x97   :  { %4074 = vmatmul.msk.bf16.gmra.mxu2 %vm207_vm0, %v746_v58  ;;  %v255_v58 = vld [vmem:[#allocation2 + $0x4f] sm:$0xff]  ;;  %v611_v16 = vld [vmem:[#allocation2 + $0x59] sm:$0xff] }
  0x98   :  { %4064 = vmatmul.msk.bf16.gmra.mxu1 %vm207_vm0, %v391_v62  ;;  %1982 = vperm.xlu2 %4528, %v1951_v59   ;;  %v610_v59 = vld [vmem:[#allocation2 + $0x51] sm:$0xff] }
  0x99   :  { %1778 = vperm.xlu0 %4526, %v1747_v63   ;;  %1977 = vperm.xlu1 %4527, %v1950_v0   ;;  %v736_v63 = vmul.f32 %v685_v50, %v610_v59  ;;  %v412_v0 = vld [vmem:[#allocation2 + $0x68] sm:$0xff]  ;;  %v690_v8 = vpop.permute.xlu2 %689 }
  0x9a   :  { %v670_v18 = vpop.permute.xlu0 %669  ;;  %v737_v21 = vmul.f32 %v690_v8, %v611_v16  ;;  %v3720_v8 = vld [vmem:[%s4867_s27] sm:$0xff]  ;;  %v3543_v16 = vld [vmem:[%s4851_s23 + $0x18] sm:$0xff] }
  0x9b   :  { %v675_v27 = vpop.permute.xlu1 %674  ;;  %v733_v36 = vmul.f32 %v670_v18, %v607_v28  ;;  %v257_v18 = vld [vmem:[#allocation2 + $0x5f] sm:$0xff] }
  0x9c   :  { %v734_v37 = vmul.f32 %v675_v27, %v608_v30  ;;  %v3344_v28 = vld [vmem:[%s4829_s15] sm:$0xff] }
  0x9d   :  { %v3196_v30 = vld [vmem:[%s4836_s19] sm:$0xff] }
  0x9e   :  { %v748_v41 = vpack.c.bf16 %v734_v37, %v733_v36  ;;  %v614_v36 = vld [vmem:[#allocation2 + $0x71] sm:$0xff]  ;;  %v3345_v37 = vld [vmem:[%s4829_s15 + $0x8] sm:$0xff] }
  0xa0   :  { %1987 = vperm.xlu2 %4528, %v1952_v4  }
  0xa1   :  { %1783 = vperm.xlu0 %4526, %v1748_v6   ;;  %1788 = vperm.xlu1 %4527, %v1749_v7   ;;  %v2706_v6 = vld [vmem:[%s4801_s7 + $0x18] sm:$0xff]  ;;  %v424_v7 = vpack.c.bf16 %v413_v1, %v412_v0  ;;  %s5463_s7 = sld [smem:[%s5988_s0 + %s4575_s4]]   ;;  %s4590_s4 = smov 40  }
  0xa2   :  { %v320_v33 = vpop.permute.xlu0 %319 }
  0xa3   :  { %v379_v38 = vmul.f32 %v320_v33, %v253_v34  ;;  %v680_v42 = vpop.permute.xlu1 %679  ;;  %v613_v34 = vld [vmem:[#allocation2 + $0x69] sm:$0xff] }
  0xa4   :  { %v735_v60 = vmul.f32 %v680_v42, %v609_v52  ;;  %v258_v42 = vld [vmem:[#allocation2 + $0x67] sm:$0xff]  ;;  %v3347_v52 = vld [vmem:[%s4829_s15 + $0x18] sm:$0xff] }
  0xa5   :  { %v393_v46 = vpack.c.bf16 %v379_v38, %v378_v40  ;;  %4060 = vmatmul.msk.bf16.gmra.mxu0 %vm207_vm0, %v424_v7  ;;  %v3198_v38 = vld [vmem:[%s4836_s19 + $0x10] sm:$0xff] }
  0xa6   :  { %v749_v2 = vpack.c.bf16 %v736_v63, %v735_v60  ;;  %v259_v40 = vld [vmem:[#allocation2 + $0x6f] sm:$0xff]  ;;  %v260_v60 = vld [vmem:[#allocation2 + $0x77] sm:$0xff]  ;;  %v616_v63 = vld [vmem:[#allocation2 + $0x81] sm:$0xff] }
  0xa7   :  { %4075 = vmatmul.msk.bf16.gmra.mxu2 %vm207_vm0, %v747_v17  ;;  %v340_v17 = vpop.permute.xlu2 %339 }
  0xa8   :  { %4065 = vmatmul.msk.bf16.gmra.mxu1 %vm207_vm0, %v392_v22  ;;  %1997 = vperm.xlu2 %4528, %v1954_v19   ;;  %v414_v22 = vld [vmem:[#allocation2 + $0x78] sm:$0xff] }
  0xa9   :  { %1992 = vperm.xlu0 %4526, %v1953_v23   ;;  %1793 = vperm.xlu1 %4527, %v1750_v24   ;;  %v415_v23 = vld [vmem:[#allocation2 + $0x80] sm:$0xff]  ;;  %v383_v24 = vmul.f32 %v340_v17, %v257_v18  ;;  %v3722_v17 = vld [vmem:[%s4867_s27 + $0x10] sm:$0xff] }
  0xaa   :  { %v325_v55 = vpop.permute.xlu0 %324 }
  0xab   :  { %v330_v57 = vpop.permute.xlu1 %329  ;;  %v380_v61 = vmul.f32 %v325_v55, %v254_v56  ;;  %v615_v55 = vld [vmem:[#allocation2 + $0x79] sm:$0xff] }
  0xac   :  { %v381_v62 = vmul.f32 %v330_v57, %v255_v58  ;;  %v3348_v56 = vld [vmem:[%s4829_s15 + $0x20] sm:$0xf]  ;;  %v4869_v58 = vpop.f32.mrf.mxu0 }
  0xad   :  { %v3540_v57 = vld [vmem:[%s4851_s23] sm:$0xff] }
  0xae   :  { %v394_v4 = vpack.c.bf16 %v381_v62, %v380_v61  ;;  %v261_v62 = vld [vmem:[#allocation2 + $0x7f] sm:$0xff] }
  0xb0   :  { %2254 = vperm.xlu2 %4528, %v2239_v29  }
  0xb1   :  { %2244 = vperm.xlu0 %4526, %v2237_v31   ;;  %2249 = vperm.xlu1 %4527, %v2238_v32   ;;  %v3197_v31 = vld [vmem:[%s4836_s19 + $0x8] sm:$0xff]  ;;  %v425_v32 = vpack.c.bf16 %v415_v23, %v414_v22  ;;  %s4029_s19 = sld [smem:[%s5988_s0 + %s4578_s16]]   ;;  %s4593_s16 = smov 43  }
  0xb2   :  { %v695_v9 = vpop.permute.xlu0 %694  ;;  %v263_v22 = vld [vmem:[#allocation2 + $0x8f] sm:$0xff] }
  0xb3   :  { %v335_v14 = vpop.permute.xlu1 %334  ;;  %v738_v19 = vmul.f32 %v695_v9, %v612_v11  ;;  %v3721_v9 = vld [vmem:[%s4867_s27 + $0x8] sm:$0xff] }
  0xb4   :  { %v382_v20 = vmul.f32 %v335_v14, %v256_v15  ;;  %v4900_v11 = vpop.f32.mrf.mxu0  ;;  %v618_v15 = vld [vmem:[#allocation2 + $0x91] sm:$0xff] }
  0xb5   :  { %v750_v26 = vpack.c.bf16 %v738_v19, %v737_v21  ;;  %4061 = vmatmul.msk.bf16.gmra.mxu0 %vm207_vm0, %v425_v32  ;;  %v262_v19 = vld [vmem:[#allocation2 + $0x87] sm:$0xff] }
  0xb6   :  { %v395_v29 = vpack.c.bf16 %v383_v24, %v382_v20  ;;  %v617_v20 = vld [vmem:[#allocation2 + $0x89] sm:$0xff] }
  0xb7   :  { %4076 = vmatmul.msk.bf16.gmra.mxu2 %vm207_vm0, %v748_v41  ;;  %v345_v41 = vpop.permute.xlu2 %344 }
  0xb8   :  { %4066 = vmatmul.msk.bf16.gmra.mxu1 %vm207_vm0, %v393_v46  ;;  %2710 = vperm.xlu2 %4528, %v2703_v43   ;;  %v384_v46 = vmul.f32 %v345_v41, %v258_v42 }
  0xb9   :  { %2259 = vperm.xlu0 %4526, %v2240_v47   ;;  %2264 = vperm.xlu1 %4527, %v2241_v48  }
  0xba   :  { %v700_v27 = vpop.permute.xlu0 %699 }
  0xbb   :  { %v705_v33 = vpop.permute.xlu1 %704  ;;  %v739_v43 = vmul.f32 %v700_v27, %v613_v34  ;;  %v3724_v34 = vld [vmem:[%s4867_s27 + $0x20] sm:$0xf] }
  0xbc   :  { %v740_v44 = vmul.f32 %v705_v33, %v614_v36  ;;  %v3544_v33 = vld [vmem:[%s4851_s23 + $0x20] sm:$0xf] }
  0xbe   :  { %v751_v47 = vpack.c.bf16 %v740_v44, %v739_v43 }
  0xc0   :  { %2863 = vperm.xlu2 %4528, %v2852_v51   ;;  %v3346_v51 = vld [vmem:[%s4829_s15 + $0x10] sm:$0xff]  ;;  %s4024_s15 = sld [smem:[%s5988_s0 + %s4577_s12]]   ;;  %s4592_s12 = smov 37  }
  0xc1   :  { %2715 = vperm.xlu0 %4526, %v2704_v53   ;;  %2858 = vperm.xlu1 %4527, %v2851_v54   ;;  %v715_v53 = vpop.permute.xlu2 %714  ;;  %v3541_v54 = vld [vmem:[%s4851_s23 + $0x8] sm:$0xff] }
  0xc2   :  { %v350_v39 = vpop.permute.xlu0 %349 }
  0xc3   :  { %v385_v45 = vmul.f32 %v350_v39, %v259_v40  ;;  %v710_v48 = vpop.permute.xlu1 %709 }
  0xc4   :  { %v741_v0 = vmul.f32 %v710_v48, %v615_v55 }
  0xc5   :  { %v396_v50 = vpack.c.bf16 %v385_v45, %v384_v46 }
  0xc7   :  { %4077 = vmatmul.msk.bf16.gmra.mxu2 %vm207_vm0, %v749_v2 }
  0xc8   :  { %4067 = vmatmul.msk.bf16.gmra.mxu1 %vm207_vm0, %v394_v4  ;;  %2868 = vperm.xlu2 %4528, %v2853_v3   ;;  %v742_v3 = vmul.f32 %v715_v53, %v616_v63  ;;  %v4881_v4 = vpop.f32.mrf.mxu1 }
  0xc9   :  { %2720 = vperm.xlu0 %4526, %v2705_v5   ;;  %2725 = vperm.xlu1 %4527, %v2706_v6   ;;  %v3542_v6 = vld [vmem:[%s4851_s23 + $0x10] sm:$0xff]  ;;  %s4027_s23 = sld [smem:[%s5988_s0 + %s4579_s20]]   ;;  %s4594_s20 = smov 41  }
  0xca   :  { %v355_v59 = vpop.permute.xlu0 %354  ;;  %v752_v5 = vpack.c.bf16 %v742_v3, %v741_v0 }
  0xcb   :  { %v360_v61 = vpop.permute.xlu1 %359  ;;  %v386_v1 = vmul.f32 %v355_v59, %v260_v60 }
  0xcc   :  { %v387_v2 = vmul.f32 %v360_v61, %v261_v62 }
  0xce   :  { %v397_v7 = vpack.c.bf16 %v387_v2, %v386_v1 }
  0xd0   :  { %2878 = vperm.xlu2 %4528, %v2855_v10   ;;  %v720_v10 = vpop.permute.xlu2 %719 }
  0xd1   :  { %2873 = vperm.xlu0 %4526, %v2854_v12   ;;  %2730 = vperm.xlu1 %4527, %v2707_v13   ;;  %v4910_v12 = vpop.f32.mrf.mxu1  ;;  %v3723_v13 = vld [vmem:[%s4867_s27 + $0x18] sm:$0xff]  ;;  %v743_v27 = vmul.f32 %v720_v10, %v617_v20  ;;  %s4028_s27 = sld [smem:[%s5988_s0 + %s4580_s24]]   ;;  %s4595_s24 = smov 42  }
  0xd2   :  { %v725_v14 = vpop.permute.xlu0 %724 }
  0xd3   :  { %v365_v18 = vpop.permute.xlu1 %364  ;;  %v744_v23 = vmul.f32 %v725_v14, %v618_v15 }
  0xd4   :  { %v388_v24 = vmul.f32 %v365_v18, %v262_v19 }
  0xd7   :  { %4078 = vmatmul.msk.bf16.gmra.mxu2 %vm207_vm0, %v750_v26  ;;  %v477_v26 = vpop.f32.mrf.mxu0 }
  0xd8   :  { %4068 = vmatmul.msk.bf16.gmra.mxu1 %vm207_vm0, %v395_v29  ;;  %3351 = vperm.xlu2 %4528, %v3344_v28   ;;  %v370_v21 = vpop.permute.xlu2 %369  ;;  %v753_v29 = vpack.c.bf16 %v744_v23, %v743_v27 }
  0xd9   :  { %3203 = vperm.xlu0 %4526, %v3196_v30   ;;  %3208 = vperm.xlu1 %4527, %v3197_v31   ;;  %v389_v28 = vmul.f32 %v370_v21, %v263_v22 }
  0xdb   :  { %v398_v31 = vpack.c.bf16 %v389_v28, %v388_v24 }
  0xe0   :  { %3218 = vperm.xlu2 %4528, %v3199_v35  }
  0xe1   :  { %3356 = vperm.xlu0 %4526, %v3345_v37   ;;  %3213 = vperm.xlu1 %4527, %v3198_v38   ;;  %v479_v37 = vpop.f32.mrf.mxu0 }
  0xe7   :  { %4079 = vmatmul.msk.bf16.gmra.mxu2 %vm207_vm0, %v751_v47 }
  0xe8   :  { %4069 = vmatmul.msk.bf16.gmra.mxu1 %vm207_vm0, %v396_v50  ;;  %3223 = vperm.xlu2 %4528, %v3200_v49  }
  0xe9   :  { %3361 = vperm.xlu0 %4526, %v3346_v51   ;;  %3366 = vperm.xlu1 %4527, %v3347_v52   ;;  %v482_v42 = vpop.f32.mrf.mxu0 }
  0xf0   :  { %3552 = vperm.xlu2 %4528, %v3541_v54  }
  0xf1   :  { %3371 = vperm.xlu0 %4526, %v3348_v56   ;;  %3547 = vperm.xlu1 %4527, %v3540_v57   ;;  %v484_v46 = vpop.f32.mrf.mxu0 }
  0xf7   :  { %4080 = vmatmul.msk.bf16.gmra.mxu2 %vm207_vm0, %v752_v5 }
  0xf8   :  { %4070 = vmatmul.msk.bf16.gmra.mxu1 %vm207_vm0, %v397_v7  ;;  %3557 = vperm.xlu2 %4528, %v3542_v6  }
  0xf9   :  { %3727 = vperm.xlu0 %4526, %v3720_v8   ;;  %3732 = vperm.xlu1 %4527, %v3721_v9   ;;  %v487_v51 = vpop.f32.mrf.mxu0 }
 0x100   :  { %3742 = vperm.xlu2 %4528, %v3723_v13  }
 0x101   :  { %3562 = vperm.xlu0 %4526, %v3543_v16   ;;  %3737 = vperm.xlu1 %4527, %v3722_v17   ;;  %v489_v55 = vpop.f32.mrf.mxu0 }
 0x105   :  { %v556_v30 = vpop.f32.mrf.mxu1 }
 0x106   :  { %v557_v32 = vadd.f32 %v556_v30, %v4869_v58 }
 0x107   :  { %4081 = vmatmul.msk.bf16.gmra.mxu2 %vm207_vm0, %v753_v29 }
 0x108   :  { %4071 = vmatmul.msk.bf16.gmra.mxu1 %vm207_vm0, %v398_v31 }
 0x109   :  { %3567 = vperm.xlu0 %4526, %v3544_v33   ;;  %3747 = vperm.xlu1 %4527, %v3724_v34   ;;  %v492_v61 = vpop.f32.mrf.mxu0 }
 0x10a   :  { %v795_v35 = vpop.f32.mrf.mxu2 }
 0x10b   :  { %v4946_v36 = vadd.f32 %v795_v35, %v557_v32 }
 0x10d   :  { %v558_v38 = vpop.f32.mrf.mxu1  ;;  %v901_v24 = vmul.f32 %v4946_v36, %v4946_v36  ;;  %v859_v29 = vsel %vm858_vm3, %v4946_v36, 0.0 }
 0x10e   :  { %v559_v16 = vadd.f32 %v558_v38, %v4900_v11 }
 0x111   :  { %v494_v0 = vpop.f32.mrf.mxu0 }
 0x112   :  { %v797_v39 = vpop.f32.mrf.mxu2 }
 0x113   :  { %v4961_v17 = vadd.f32 %v797_v39, %v559_v16 }
 0x115   :  { %v561_v40 = vpop.f32.mrf.mxu1  ;;  %v902_v22 = vmul.f32 %v4961_v17, %v4961_v17  ;;  %v860_v11 = vsel %vm858_vm3, %v4961_v17, 0.0 }
 0x116   :  { %v562_v41 = vadd.f32 %v561_v40, %v477_v26  ;;  %v861_v34 = vadd.f32 %v860_v11, %v859_v29 }
 0x117   :  { %v920_v30 = vsel %vm858_vm3, %v902_v22, 0.0 }
 0x119   :  { %v497_v5 = vpop.f32.mrf.mxu0 }
 0x11a   :  { %v800_v43 = vpop.f32.mrf.mxu2 }
 0x11b   :  { %v4948_v44 = vadd.f32 %v800_v43, %v562_v41 }
 0x11d   :  { %v563_v45 = vpop.f32.mrf.mxu1  ;;  %v903_v26 = vmul.f32 %v4948_v44, %v4948_v44  ;;  %v862_v31 = vsel %vm858_vm3, %v4948_v44, 0.0 }
 0x11e   :  { %v564_v19 = vadd.f32 %v563_v45, %v479_v37  ;;  %v919_v37 = vsel %vm858_vm3, %v901_v24, 0.0 }
 0x11f   :  { %v922_v38 = vsel %vm858_vm3, %v903_v26, 0.0  ;;  %v921_v41 = vadd.f32 %v920_v30, %v919_v37 }
 0x121   :  { %v499_v8 = vpop.f32.mrf.mxu0 }
 0x122   :  { %v802_v47 = vpop.f32.mrf.mxu2 }
 0x123   :  { %v4965_v20 = vadd.f32 %v802_v47, %v564_v19 }
 0x125   :  { %v566_v48 = vpop.f32.mrf.mxu1  ;;  %v904_v28 = vmul.f32 %v4965_v20, %v4965_v20  ;;  %v864_v39 = vsel %vm858_vm3, %v4965_v20, 0.0 }
 0x126   :  { %v567_v49 = vadd.f32 %v566_v48, %v482_v42  ;;  %v863_v42 = vadd.f32 %v862_v31, %v861_v34 }
 0x127   :  { %v924_v43 = vsel %vm858_vm3, %v904_v28, 0.0 }
 0x129   :  { %v4956_v14 = vpop.f32.mrf.mxu0 }
 0x12a   :  { %v805_v50 = vpop.f32.mrf.mxu2 }
 0x12b   :  { %v4950_v52 = vadd.f32 %v805_v50, %v567_v49  ;;  %v923_v49 = vadd.f32 %v922_v38, %v921_v41  ;;  %v865_v50 = vadd.f32 %v864_v39, %v863_v42 }
 0x12d   :  { %v568_v53 = vpop.f32.mrf.mxu1  ;;  %v905_v35 = vmul.f32 %v4950_v52, %v4950_v52  ;;  %v866_v45 = vsel %vm858_vm3, %v4950_v52, 0.0 }
 0x12e   :  { %v569_v27 = vadd.f32 %v568_v53, %v484_v46  ;;  %v867_v16 = vadd.f32 %v866_v45, %v865_v50 }
 0x131   :  { %v4967_v21 = vpop.f32.mrf.mxu0 }
 0x132   :  { %v807_v54 = vpop.f32.mrf.mxu2 }
 0x133   :  { %v4986_v32 = vadd.f32 %v807_v54, %v569_v27 }
 0x135   :  { %v571_v56 = vpop.f32.mrf.mxu1  ;;  %v906_v46 = vmul.f32 %v4986_v32, %v4986_v32 }
 0x136   :  { %v572_v57 = vadd.f32 %v571_v56, %v487_v51  ;;  %v926_v51 = vsel %vm858_vm3, %v905_v35, 0.0 }
 0x139   :  { %v507_v53 = vpop.f32.mrf.mxu0 }
 0x13a   :  { %v810_v58 = vpop.f32.mrf.mxu2 }
 0x13b   :  { %v4952_v59 = vadd.f32 %v810_v58, %v572_v57 }
 0x13d   :  { %v573_v60 = vpop.f32.mrf.mxu1  ;;  %v907_v56 = vmul.f32 %v4952_v59, %v4952_v59 }
 0x13e   :  { %v574_v40 = vadd.f32 %v573_v60, %v489_v55  ;;  %v868_v55 = vsel %vm858_vm3, %v4986_v32, 0.0  ;;  %v925_v60 = vadd.f32 %v924_v43, %v923_v49 }
 0x13f   :  { %v869_v26 = vadd.f32 %v868_v55, %v867_v16 }
 0x140   :  { %v927_v11 = vadd.f32 %v926_v51, %v925_v60 }
 0x142   :  { %v812_v62 = vpop.f32.mrf.mxu2 }
 0x143   :  { %v4999_v47 = vadd.f32 %v812_v62, %v574_v40 }
 0x145   :  { %v576_v63 = vpop.f32.mrf.mxu1  ;;  %v908_v19 = vmul.f32 %v4999_v47, %v4999_v47 }
 0x146   :  { %v577_v48 = vadd.f32 %v576_v63, %v492_v61  ;;  %v928_v61 = vsel %vm858_vm3, %v906_v46, 0.0  ;;  %v870_v63 = vsel %vm858_vm3, %v4952_v59, 0.0 }
 0x147   :  { %v871_v28 = vadd.f32 %v870_v63, %v869_v26 }
 0x14a   :  { %v815_v1 = vpop.f32.mrf.mxu2 }
 0x14b   :  { %v5006_v57 = vadd.f32 %v815_v1, %v577_v48 }
 0x14d   :  { %v578_v2 = vpop.f32.mrf.mxu1  ;;  %v874_v30 = vsel %vm858_vm3, %v5006_v57, 0.0 }
 0x14e   :  { %v579_v58 = vadd.f32 %v578_v2, %v494_v0  ;;  %v930_v0 = vsel %vm858_vm3, %v907_v56, 0.0  ;;  %v872_v2 = vsel %vm858_vm3, %v4999_v47, 0.0 }
 0x14f   :  { %v873_v31 = vadd.f32 %v872_v2, %v871_v28 }
 0x151   :  { %v875_v41 = vadd.f32 %v874_v30, %v873_v31 }
 0x152   :  { %v817_v3 = vpop.f32.mrf.mxu2 }
 0x153   :  { %v5013_v22 = vadd.f32 %v817_v3, %v579_v58  ;;  %v932_v3 = vsel %vm858_vm3, %v908_v19, 0.0 }
 0x155   :  { %v581_v6 = vpop.f32.mrf.mxu1  ;;  %v876_v37 = vsel %vm858_vm3, %v5013_v22, 0.0 }
 0x156   :  { %v582_v62 = vadd.f32 %v581_v6, %v497_v5  ;;  %v909_v5 = vmul.f32 %v5006_v57, %v5006_v57  ;;  %v929_v6 = vadd.f32 %v928_v61, %v927_v11  ;;  %v877_v49 = vadd.f32 %v876_v37, %v875_v41 }
 0x15a   :  { %v820_v7 = vpop.f32.mrf.mxu2 }
 0x15b   :  { %v5015_v27 = vadd.f32 %v820_v7, %v582_v62  ;;  %v910_v7 = vmul.f32 %v5013_v22, %v5013_v22 }
 0x15d   :  { %v583_v9 = vpop.f32.mrf.mxu1  ;;  %v911_v34 = vmul.f32 %v5015_v27, %v5015_v27  ;;  %v936_v42 = vsel %vm858_vm3, %v910_v7, 0.0  ;;  %v878_v43 = vsel %vm858_vm3, %v5015_v27, 0.0 }
 0x15e   :  { %v584_v1 = vadd.f32 %v583_v9, %v499_v8  ;;  %v931_v9 = vadd.f32 %v930_v0, %v929_v6  ;;  %v879_v58 = vadd.f32 %v878_v43, %v877_v49 }
 0x160   :  { %v933_v40 = vadd.f32 %v932_v3, %v931_v9 }
 0x162   :  { %v822_v10 = vpop.f32.mrf.mxu2 }
 0x163   :  { %v5022_v29 = vadd.f32 %v822_v10, %v584_v1  ;;  %v934_v10 = vsel %vm858_vm3, %v909_v5, 0.0 }
 0x164   :  { %v935_v48 = vadd.f32 %v934_v10, %v933_v40 }
 0x165   :  { %v4954_v13 = vpop.f32.mrf.mxu1 }
 0x166   :  { %v587_v8 = vadd.f32 %v4954_v13, %v4956_v14  ;;  %v912_v13 = vmul.f32 %v5022_v29, %v5022_v29  ;;  %v509_v14 = vpop.f32.mrf.mxu0  ;;  %v937_v56 = vadd.f32 %v936_v42, %v935_v48 }
 0x16a   :  { %v4958_v15 = vpop.f32.mrf.mxu2 }
 0x16b   :  { %v5037_v38 = vadd.f32 %v4958_v15, %v587_v8 }
 0x16d   :  { %v4963_v18 = vpop.f32.mrf.mxu1  ;;  %v913_v50 = vmul.f32 %v5037_v38, %v5037_v38 }
 0x16e   :  { %v589_v39 = vadd.f32 %v4963_v18, %v4967_v21  ;;  %v938_v18 = vsel %vm858_vm3, %v911_v34, 0.0  ;;  %v880_v21 = vsel %vm858_vm3, %v5022_v29, 0.0 }
 0x16f   :  { %v939_v62 = vadd.f32 %v938_v18, %v937_v56  ;;  %v881_v61 = vadd.f32 %v880_v21, %v879_v58 }
 0x172   :  { %v4971_v23 = vpop.f32.mrf.mxu2 }
 0x173   :  { %v5047_v45 = vadd.f32 %v4971_v23, %v589_v39  ;;  %v940_v23 = vsel %vm858_vm3, %v912_v13, 0.0 }
 0x174   :  { %v941_v26 = vadd.f32 %v940_v23, %v939_v62 }
 0x175   :  { %v591_v33 = vpop.f32.mrf.mxu1  ;;  %v884_v19 = vsel %vm858_vm3, %v5047_v45, 0.0 }
 0x176   :  { %v592_v46 = vadd.f32 %v591_v33, %v507_v53  ;;  %v882_v33 = vsel %vm858_vm3, %v5037_v38, 0.0  ;;  %v914_v53 = vmul.f32 %v5047_v45, %v5047_v45 }
 0x177   :  { %v883_v1 = vadd.f32 %v882_v33, %v881_v61 }
 0x178   :  { %v944_v0 = vsel %vm858_vm3, %v914_v53, 0.0 }
 0x179   :  { %v885_v6 = vadd.f32 %v884_v19, %v883_v1  ;;  %v4425_v1 = vld [vmem:[%s4014_s1 + $0x10] sm:$0xff] }
 0x17a   :  { %v830_v54 = vpop.f32.mrf.mxu2  ;;  %1372 = vmatpush.bf16.msrb.mxu0 %v4425_v1 }
 0x17b   :  { %v5054_v51 = vadd.f32 %v830_v54, %v592_v46  ;;  %v942_v54 = vsel %vm858_vm3, %v913_v50, 0.0 }
 0x17c   :  { %v943_v5 = vadd.f32 %v942_v54, %v941_v26 }
 0x17d   :  { %v593_v24 = vpop.f32.mrf.mxu1 }
 0x17e   :  { %v594_v55 = vadd.f32 %v593_v24, %v509_v14  ;;  %v915_v24 = vmul.f32 %v5054_v51, %v5054_v51  ;;  %v945_v8 = vadd.f32 %v944_v0, %v943_v5  ;;  %v4424_v0 = vld [vmem:[%s4014_s1 + $0x8] sm:$0xff] }
 0x17f   :  { %1238 = vmatpush.bf16.msra.mxu3 %v4424_v0 }
 0x180   :  { %v946_v3 = vsel %vm858_vm3, %v915_v24, 0.0 }
 0x181   :  { %v947_v10 = vadd.f32 %v946_v3, %v945_v8  ;;  %v4423_v3 = vld [vmem:[%s4014_s1] sm:$0xff]  ;;  %s5653_s1 = sld [smem:[%s5988_s0 + %s4581_s28]]   ;;  %s4596_s28 = smov 44  }
 0x182   :  { %v832_v35 = vpop.f32.mrf.mxu2 }
 0x183   :  { %v5061_v60 = vadd.f32 %v832_v35, %v594_v55  ;;  %1292 = vmatpush.bf16.msrb.mxu3 %v4423_v3 }
 0x185   :  { %v596_v15 = vpop.f32.mrf.mxu1  ;;  %v916_v2 = vmul.f32 %v5061_v60, %v5061_v60  ;;  %v888_v30 = vsel %vm858_vm3, %v5061_v60, 0.0 }
 0x186   :  { %v597_v16 = vadd.f32 %v596_v15, %v4881_v4  ;;  %v886_v4 = vsel %vm858_vm3, %v5054_v51, 0.0 }
 0x187   :  { %v887_v9 = vadd.f32 %v886_v4, %v885_v6  ;;  %v948_v31 = vsel %vm858_vm3, %v916_v2, 0.0 }
 0x188   :  { %v949_v13 = vadd.f32 %v948_v31, %v947_v10  ;;  %v977_v31 = vld [vmem:[%s4012_s9] sm:$0x1]  ;;  %s4031_s9 = sld [smem:[%s5988_s0 + %s4583_s6]]  }
 0x189   :  { %v889_v37 = vadd.f32 %v888_v30, %v887_v9  ;;  %v964_v30 = vld [vmem:[%s4011_s5] sm:$0x1]  ;;  %s4030_s5 = sld [smem:[%s5988_s0 + %s4582_s2]]   ;;  %s4597_s2 = smov 45  }
 0x18a   :  { %v835_v63 = vpop.f32.mrf.mxu2 }
 0x18b   :  { %v5069_v11 = vadd.f32 %v835_v63, %v597_v16 }
 0x18d   :  { %v598_v28 = vpop.f32.mrf.mxu1  ;;  %v917_v7 = vmul.f32 %v5069_v11, %v5069_v11  ;;  %v890_v34 = vsel %vm858_vm3, %v5069_v11, 0.0 }
 0x18e   :  { %v599_v35 = vadd.f32 %v598_v28, %v4910_v12  ;;  %v891_v14 = vadd.f32 %v890_v34, %v889_v37 }
 0x18f   :  { %v950_v40 = vsel %vm858_vm3, %v917_v7, 0.0 }
 0x190   :  { %v951_v46 = vadd.f32 %v950_v40, %v949_v13 }
 0x192   :  { %v837_v39 = vpop.f32.mrf.mxu2 }
 0x193   :  { %v857_v41 = vadd.f32 %v837_v39, %v599_v35 }
 0x195   :  { %v892_v42 = vsel %vm858_vm3, %v857_v41, 0.0  ;;  %v918_v43 = vmul.f32 %v857_v41, %v857_v41 }
 0x196   :  { %v893_v15 = vadd.f32 %v892_v42, %v891_v14 }
 0x197   :  { %v952_v48 = vsel %vm858_vm3, %v918_v43, 0.0 }
 0x198   :  { %v894_v49 = vrot.slane %v893_v15, 4  ;;  %v953_v18 = vadd.f32 %v952_v48, %v951_v46 }
 0x19a   :  { %v895_v21 = vadd.f32 %v894_v49, %v893_v15  ;;  %v954_v50 = vrot.slane %v953_v18, 4 }
 0x19c   :  { %v896_v12 = vrot.slane %v895_v21, 2  ;;  %v955_v55 = vadd.f32 %v954_v50, %v953_v18 }
 0x19e   :  { %v897_v56 = vadd.f32 %v896_v12, %v895_v21  ;;  %v956_v58 = vrot.slane %v955_v55, 2 }
 0x1a0   :  { %v898_v23 = vrot.slane %v897_v56, 1  ;;  %v957_v33 = vadd.f32 %v956_v58, %v955_v55 }
 0x1a2   :  { %v899_v53 = vadd.f32 %v898_v23, %v897_v56  ;;  %v958_v16 = vrot.slane %v957_v33, 1 }
 0x1a4   :  { %v900_v62 = vmul.f32 0.0069444445, %v899_v53  ;;  %v959_v61 = vadd.f32 %v958_v16, %v957_v33 }
 0x1a6   :  { %v960_v63 = vmul.f32 0.0069444445, %v959_v61  ;;  %v961_v54 = vmul.f32 %v900_v62, %v900_v62 }
 0x1a8   :  { %v962_v19 = vsub.f32 %v960_v63, %v961_v54 }
 0x1aa   :  { %v963_v24 = vmax.f32 %v962_v19, 0.0 }
 0x1ac   :  { %v965_v26 = vadd.f32 1e-05, %v963_v24 }
 0x1ae   :  { %4530 = vrsqrt.f32 %v965_v26  ;;  %vm972_vm5 = vweird.f32 %v965_v26 }
 0x1b4   :  { %v4531_v4 = vpop.eup %4530 }
 0x1b5   :  { %v967_v2 = vmul.f32 %v4531_v4, %v965_v26  ;;  %vm973_vm4 = vweird.f32 %v4531_v4 }
 0x1b6   :  { %vm974_vm6 = vmor %vm972_vm5, %vm973_vm4 }
 0x1b7   :  { %v968_v5 = vmul.f32 %v4531_v4, %v967_v2 }
 0x1b9   :  { %v969_v6 = vmul.f32 0.5, %v968_v5 }
 0x1bb   :  { %v970_v28 = vsub.f32 1.5, %v969_v6 }
 0x1bd   :  { %v971_v7 = vmul.f32 %v4531_v4, %v970_v28 }
 0x1bf   :  { %v975_v8 = vsel %vm974_vm6, %v4531_v4, %v971_v7  ;;  %vm2610_vm6 = vcmask 257024  }
 0x1c0   :  { %v976_v9 = vmul.f32 %v975_v8, %v964_v30 }
 0x1c2   :  { %v978_v34 = vmul.f32 %v976_v9, %v900_v62  ;;  %v5097_v35 = vperm.slane %v976_v9, 0 }
 0x1c4   :  { %v979_v10 = vsub.f32 %v977_v31, %v978_v34  ;;  %v1000_v37 = vmul.f32 %v5097_v35, %v857_v41  ;;  %v983_v39 = vmul.f32 %v5097_v35, %v4946_v36  ;;  %v984_v40 = vmul.f32 %v5097_v35, %v4961_v17 }
 0x1c5   :  { %v985_v13 = vmul.f32 %v5097_v35, %v4948_v44  ;;  %v986_v14 = vmul.f32 %v5097_v35, %v4965_v20  ;;  %v987_v43 = vmul.f32 %v5097_v35, %v4950_v52  ;;  %v988_v41 = vmul.f32 %v5097_v35, %v4986_v32 }
 0x1c6   :  { %v5108_v42 = vperm.slane %v979_v10, 0  ;;  %v989_v36 = vmul.f32 %v5097_v35, %v4952_v59  ;;  %v990_v17 = vmul.f32 %v5097_v35, %v4999_v47  ;;  %v991_v44 = vmul.f32 %v5097_v35, %v5006_v57 }
 0x1c7   :  { %v992_v20 = vmul.f32 %v5097_v35, %v5013_v22  ;;  %v993_v46 = vmul.f32 %v5097_v35, %v5015_v27  ;;  %v994_v61 = vmul.f32 %v5097_v35, %v5022_v29  ;;  %v995_v4 = vmul.f32 %v5097_v35, %v5037_v38 }
 0x1c8   :  { %v1021_v52 = vadd.f32 %v5108_v42, %v1000_v37  ;;  %v1004_v15 = vadd.f32 %v5108_v42, %v983_v39  ;;  %v1005_v32 = vadd.f32 %v5108_v42, %v984_v40  ;;  %v1006_v59 = vadd.f32 %v5108_v42, %v985_v13 }
 0x1c9   :  { %v1007_v48 = vadd.f32 %v5108_v42, %v986_v14  ;;  %v1008_v47 = vadd.f32 %v5108_v42, %v987_v43  ;;  %v1009_v57 = vadd.f32 %v5108_v42, %v988_v41  ;;  %v1010_v49 = vadd.f32 %v5108_v42, %v989_v36 }
 0x1ca   :  { %v1039_v22 = vmul.f32 0.1, %v1021_v52  ;;  %v1022_v18 = vmul.f32 0.1, %v1004_v15  ;;  %v1023_v21 = vmul.f32 0.1, %v1005_v32  ;;  %v1011_v27 = vadd.f32 %v5108_v42, %v990_v17 }
 0x1cb   :  { %v1024_v50 = vmul.f32 0.1, %v1006_v59  ;;  %v1025_v12 = vmul.f32 0.1, %v1007_v48  ;;  %v1026_v55 = vmul.f32 0.1, %v1008_v47  ;;  %v1012_v56 = vadd.f32 %v5108_v42, %v991_v44 }
 0x1cc   :  { %v1057_v58 = vmax.f32 %v1021_v52, %v1039_v22  ;;  %v1040_v23 = vmax.f32 %v1004_v15, %v1022_v18  ;;  %v1041_v33 = vmax.f32 %v1005_v32, %v1023_v21  ;;  %v1027_v53 = vmul.f32 0.1, %v1009_v57 }
 0x1cd   :  { %v1042_v16 = vmax.f32 %v1006_v59, %v1024_v50  ;;  %v1028_v62 = vmul.f32 0.1, %v1010_v49  ;;  %v1043_v63 = vmax.f32 %v1007_v48, %v1025_v12  ;;  %v1029_v54 = vmul.f32 0.1, %v1011_v27 }
 0x1ce   :  { %1095 = vst.msk [vmem:[#allocation3 + $0x90] sm:$0xff] %vm858_vm3, %v1057_v58  ;;  %v1013_v19 = vadd.f32 %v5108_v42, %v992_v20  ;;  %v1014_v24 = vadd.f32 %v5108_v42, %v993_v46  ;;  %v1044_v26 = vmax.f32 %v1008_v47, %v1026_v55  ;;  %v1015_v1 = vadd.f32 %v5108_v42, %v994_v61 }
 0x1cf   :  { %1078 = vst.msk [vmem:[#allocation3 + $0x8] sm:$0xff] %vm858_vm3, %v1040_v23  ;;  %v1030_v0 = vmul.f32 0.1, %v1012_v56  ;;  %v1045_v29 = vmax.f32 %v1009_v57, %v1027_v53  ;;  %v996_v5 = vmul.f32 %v5097_v35, %v5047_v45  ;;  %v997_v6 = vmul.f32 %v5097_v35, %v5054_v51 }
 0x1d0   :  { %1079 = vst.msk [vmem:[#allocation3 + $0x10] sm:$0xff] %vm858_vm3, %v1041_v33  ;;  %v1031_v2 = vmul.f32 0.1, %v1013_v19  ;;  %v1046_v28 = vmax.f32 %v1010_v49, %v1028_v62  ;;  %v1032_v3 = vmul.f32 0.1, %v1014_v24  ;;  %v998_v30 = vmul.f32 %v5097_v35, %v5061_v60 }
 0x1d1   :  { %1080 = vst.msk [vmem:[#allocation3 + $0x18] sm:$0xff] %vm858_vm3, %v1042_v16  ;;  %v1016_v7 = vadd.f32 %v5108_v42, %v995_v4  ;;  %v1047_v38 = vmax.f32 %v1011_v27, %v1029_v54  ;;  %v1033_v8 = vmul.f32 0.1, %v1015_v1  ;;  %v1017_v9 = vadd.f32 %v5108_v42, %v996_v5 }
 0x1d2   :  { %1081 = vst.msk [vmem:[#allocation3 + $0x20] sm:$0xff] %vm858_vm3, %v1043_v63  ;;  %v1018_v45 = vadd.f32 %v5108_v42, %v997_v6  ;;  %v1048_v51 = vmax.f32 %v1012_v56, %v1030_v0  ;;  %v1019_v31 = vadd.f32 %v5108_v42, %v998_v30  ;;  %v999_v10 = vmul.f32 %v5097_v35, %v5069_v11  ;;  %v1136_v6 = vpop.permute.xlu2 %1135 }
 0x1d3   :  { %1082 = vst.msk [vmem:[#allocation3 + $0x28] sm:$0xff] %vm858_vm3, %v1044_v26  ;;  %v1034_v34 = vmul.f32 0.1, %v1016_v7  ;;  %v1049_v60 = vmax.f32 %v1013_v19, %v1031_v2  ;;  %v1035_v37 = vmul.f32 0.1, %v1017_v9  ;;  %v1050_v39 = vmax.f32 %v1014_v24, %v1032_v3  ;;  %v1126_v26 = vpop.permute.xlu0 %1125 }
 0x1d4   :  { %1083 = vst.msk [vmem:[#allocation3 + $0x30] sm:$0xff] %vm858_vm3, %v1045_v29  ;;  %v1036_v40 = vmul.f32 0.1, %v1018_v45  ;;  %v1020_v13 = vadd.f32 %v5108_v42, %v999_v10  ;;  %v1051_v14 = vmax.f32 %v1015_v1, %v1033_v8  ;;  %v1037_v43 = vmul.f32 0.1, %v1019_v31  ;;  %v1131_v1 = vpop.permute.xlu1 %1130 }
 0x1d5   :  { %1084 = vst.msk [vmem:[#allocation3 + $0x38] sm:$0xff] %vm858_vm3, %v1046_v28  ;;  %v1052_v17 = vmax.f32 %v1016_v7, %v1034_v34  ;;  %v1053_v11 = vmax.f32 %v1017_v9, %v1035_v37 }
 0x1d6   :  { %1085 = vst.msk [vmem:[#allocation3 + $0x40] sm:$0xff] %vm858_vm3, %v1047_v38  ;;  %v1038_v35 = vmul.f32 0.1, %v1020_v13  ;;  %v1054_v46 = vmax.f32 %v1018_v45, %v1036_v40  ;;  %v1055_v15 = vmax.f32 %v1019_v31, %v1037_v43 }
 0x1d7   :  { %v1185_v41 = vld [vmem:[#allocation3 + $0x8] ss:$2 sm:$0xff]  ;;  %v1319_v36 = vld [vmem:[#allocation3 + $0x9] ss:$2 sm:$0xff]  ;;  %1086 = vst.msk [vmem:[#allocation3 + $0x48] sm:$0xff] %vm858_vm3, %v1048_v51 }
 0x1d8   :  { %1087 = vst.msk [vmem:[#allocation3 + $0x50] sm:$0xff] %vm858_vm3, %v1049_v60  ;;  %v1056_v32 = vmax.f32 %v1020_v13, %v1038_v35  ;;  %v1097_v19 = vld [vmem:[#allocation3 + $0x7] ss:$2 sm:$0xff] }
 0x1d9   :  { %v1187_v44 = vld [vmem:[#allocation3 + $0x18] ss:$2 sm:$0xff]  ;;  %v1321_v20 = vld [vmem:[#allocation3 + $0x19] ss:$2 sm:$0xff]  ;;  %1088 = vst.msk [vmem:[#allocation3 + $0x58] sm:$0xff] %vm858_vm3, %v1050_v39  ;;  %v1168_v0 = vmul.f32 %v1126_v26, %v1097_v19 }
 0x1da   :  { %v1202_v52 = vpack.c.bf16 %v1187_v44, %v1185_v41  ;;  %v1336_v42 = vpack.c.bf16 %v1321_v20, %v1319_v36  ;;  %1089 = vst.msk [vmem:[#allocation3 + $0x60] sm:$0xff] %vm858_vm3, %v1051_v14  ;;  %v1099_v24 = vld [vmem:[#allocation3 + $0x17] ss:$2 sm:$0xff]  ;;  %v1151_v9 = vpop.permute.xlu2 %1150 }
 0x1db   :  { %1090 = vst.msk [vmem:[#allocation3 + $0x68] sm:$0xff] %vm858_vm3, %v1052_v17  ;;  %v1189_v59 = vld [vmem:[#allocation3 + $0x28] ss:$2 sm:$0xff]  ;;  %v1323_v47 = vld [vmem:[#allocation3 + $0x29] ss:$2 sm:$0xff]  ;;  %v1169_v4 = vmul.f32 %v1131_v1, %v1099_v24  ;;  %v1141_v28 = vpop.permute.xlu0 %1140 }
 0x1dc   :  { %4088 = vmatmul.msk.bf16.vlgmr.msra.gmra.mxu3 %vm858_vm3, %v1202_v52  ;;  %4108 = vmatmul.msk.bf16.vlgmr.msrb.gmra.mxu0 %vm858_vm3, %v1336_v42  ;;  %1091 = vst.msk [vmem:[#allocation3 + $0x70] sm:$0xff] %vm858_vm3, %v1053_v11  ;;  %v1101_v2 = vld [vmem:[#allocation3 + $0x27] ss:$2 sm:$0xff]  ;;  %v1146_v45 = vpop.permute.xlu1 %1145 }
 0x1dd   :  { %1092 = vst.msk [vmem:[#allocation3 + $0x78] sm:$0xff] %vm858_vm3, %v1054_v46  ;;  %v1191_v48 = vld [vmem:[#allocation3 + $0x38] ss:$2 sm:$0xff]  ;;  %v1325_v57 = vld [vmem:[#allocation3 + $0x39] ss:$2 sm:$0xff]  ;;  %v1177_v29 = vpack.c.bf16 %v1169_v4, %v1168_v0  ;;  %v1170_v3 = vmul.f32 %v1136_v6, %v1101_v2 }
 0x1de   :  { %1093 = vst.msk [vmem:[#allocation3 + $0x80] sm:$0xff] %vm858_vm3, %v1055_v15  ;;  %v1203_v49 = vpack.c.bf16 %v1191_v48, %v1189_v59  ;;  %v1337_v22 = vpack.c.bf16 %v1325_v57, %v1323_v47  ;;  %v1103_v5 = vld [vmem:[#allocation3 + $0x37] ss:$2 sm:$0xff]  ;;  %v4427_v48 = vld [vmem:[%s5192_s13 + $0x8] sm:$0xff] }
 0x1df   :  { %1094 = vst.msk [vmem:[#allocation3 + $0x88] sm:$0xff] %vm858_vm3, %v1056_v32  ;;  %v1193_v18 = vld [vmem:[#allocation3 + $0x48] ss:$2 sm:$0xff]  ;;  %v1327_v27 = vld [vmem:[#allocation3 + $0x49] ss:$2 sm:$0xff]  ;;  %v1171_v30 = vmul.f32 %v1141_v28, %v1103_v5  ;;  %1568 = vmatpush.bf16.msra.mxu1 %v4427_v48 }
 0x1e0   :  { %v1105_v38 = vld [vmem:[#allocation3 + $0x47] ss:$2 sm:$0xff] }
 0x1e1   :  { %v1195_v21 = vld [vmem:[#allocation3 + $0x58] ss:$2 sm:$0xff]  ;;  %v1329_v50 = vld [vmem:[#allocation3 + $0x59] ss:$2 sm:$0xff]  ;;  %v1178_v7 = vpack.c.bf16 %v1171_v30, %v1170_v3  ;;  %v1172_v51 = vmul.f32 %v1146_v45, %v1105_v38 }
 0x1e2   :  { %v1204_v12 = vpack.c.bf16 %v1195_v21, %v1193_v18  ;;  %v1338_v55 = vpack.c.bf16 %v1329_v50, %v1327_v27  ;;  %v1107_v8 = vld [vmem:[#allocation3 + $0x57] ss:$2 sm:$0xff]  ;;  %v1166_v11 = vpop.permute.xlu2 %1165 }
 0x1e3   :  { %v1197_v56 = vld [vmem:[#allocation3 + $0x68] ss:$2 sm:$0xff]  ;;  %v1331_v23 = vld [vmem:[#allocation3 + $0x69] ss:$2 sm:$0xff]  ;;  %v1173_v31 = vmul.f32 %v1151_v9, %v1107_v8  ;;  %v1156_v37 = vpop.permute.xlu0 %1155 }
 0x1e4   :  { %v1109_v10 = vld [vmem:[#allocation3 + $0x67] ss:$2 sm:$0xff]  ;;  %v1161_v39 = vpop.permute.xlu1 %1160 }
 0x1e5   :  { %v1199_v58 = vld [vmem:[#allocation3 + $0x78] ss:$2 sm:$0xff]  ;;  %v1333_v33 = vld [vmem:[#allocation3 + $0x79] ss:$2 sm:$0xff]  ;;  %v1179_v34 = vpack.c.bf16 %v1173_v31, %v1172_v51  ;;  %v1174_v40 = vmul.f32 %v1156_v37, %v1109_v10 }
 0x1e6   :  { %v1205_v53 = vpack.c.bf16 %v1199_v58, %v1197_v56  ;;  %v1339_v16 = vpack.c.bf16 %v1333_v33, %v1331_v23  ;;  %v1201_v62 = vld [vmem:[#allocation3 + $0x88] ss:$2 sm:$0xff]  ;;  %v1335_v61 = vld [vmem:[#allocation3 + $0x89] ss:$2 sm:$0xff] }
 0x1e7   :  { %v1206_v63 = vpack.c.bf16 %v1201_v62, %v1201_v62  ;;  %v1340_v54 = vpack.c.bf16 %v1335_v61, %v1335_v61  ;;  %v1111_v60 = vld [vmem:[#allocation3 + $0x77] ss:$2 sm:$0xff]  ;;  %v1113_v17 = vld [vmem:[#allocation3 + $0x87] ss:$2 sm:$0xff] }
 0x1e8   :  { %v1175_v13 = vmul.f32 %v1161_v39, %v1111_v60  ;;  %v1176_v35 = vmul.f32 %v1166_v11, %v1113_v17 }
 0x1ea   :  { %v1180_v43 = vpack.c.bf16 %v1175_v13, %v1174_v40  ;;  %v1181_v46 = vpack.c.bf16 %v1176_v35, %v1176_v35 }
 0x1ec   :  { %4089 = vmatmul.msk.bf16.gmra.mxu3 %vm858_vm3, %v1203_v49  ;;  %4109 = vmatmul.msk.bf16.gmra.mxu0 %vm858_vm3, %v1337_v22 }
 0x1fc   :  { %4090 = vmatmul.msk.bf16.gmra.mxu3 %vm858_vm3, %v1204_v12  ;;  %4110 = vmatmul.msk.bf16.gmra.mxu0 %vm858_vm3, %v1338_v55 }
 0x20c   :  { %4091 = vmatmul.msk.bf16.gmra.mxu3 %vm858_vm3, %v1205_v53  ;;  %4111 = vmatmul.msk.bf16.gmra.mxu0 %vm858_vm3, %v1339_v16  ;;  %v4426_v16 = vld [vmem:[%s5192_s13] sm:$0xff]  ;;  %s4037_s13 = sld [smem:[%s5988_s0 + %s4584_s10]]  }
 0x20d   :  { %1569 = vmatpush.bf16.msra.mxu1 %v4426_v16 }
 0x21c   :  { %4092 = vmatmul.msk.bf16.gmra.mxu3 %vm858_vm3, %v1206_v63  ;;  %4112 = vmatmul.msk.bf16.gmra.mxu0 %vm858_vm3, %v1340_v54 }
 0x22c   :  { %4097 = vmatmul.msk.bf16.vlgmr.msrb.gmra.mxu3 %vm858_vm3, %v1177_v29 }
 0x23c   :  { %4098 = vmatmul.msk.bf16.gmra.mxu3 %vm858_vm3, %v1178_v7 }
 0x24c   :  { %4099 = vmatmul.msk.bf16.gmra.mxu3 %vm858_vm3, %v1179_v34 }
 0x259   :  { %v5185_v14 = vpop.f32.mrf.mxu0 }
 0x25c   :  { %4100 = vmatmul.msk.bf16.gmra.mxu3 %vm858_vm3, %v1180_v43 }
 0x25f   :  { %v1240_v41 = vpop.f32.mrf.mxu3 }
 0x261   :  { %v1376_v36 = vpop.f32.mrf.mxu0 }
 0x267   :  { %v1242_v44 = vpop.f32.mrf.mxu3 }
 0x269   :  { %v1379_v20 = vpop.f32.mrf.mxu0 }
 0x26c   :  { %4101 = vmatmul.msk.bf16.gmra.mxu3 %vm858_vm3, %v1181_v46 }
 0x26f   :  { %v1245_v52 = vpop.f32.mrf.mxu3 }
 0x271   :  { %v1381_v42 = vpop.f32.mrf.mxu0 }
 0x277   :  { %v1247_v15 = vpop.f32.mrf.mxu3 }
 0x279   :  { %v1384_v32 = vpop.f32.mrf.mxu0 }
 0x27f   :  { %v1250_v59 = vpop.f32.mrf.mxu3 }
 0x281   :  { %v5195_v47 = vpop.f32.mrf.mxu0 }
 0x287   :  { %v1252_v57 = vpop.f32.mrf.mxu3 }
 0x289   :  { %v5197_v49 = vpop.f32.mrf.mxu0 }
 0x28f   :  { %v1255_v22 = vpop.f32.mrf.mxu3 }
 0x291   :  { %v5199_v18 = vpop.f32.mrf.mxu0 }
 0x297   :  { %v1257_v21 = vpop.f32.mrf.mxu3 }
 0x299   :  { %v5213_v27 = vpop.f32.mrf.mxu0 }
 0x29f   :  { %v5225_v50 = vpop.f32.mrf.mxu3 }
 0x2a1   :  { %v1396_v12 = vpop.f32.mrf.mxu0 }
 0x2a7   :  { %v1262_v55 = vpop.f32.mrf.mxu3 }
 0x2af   :  { %v1294_v56 = vpop.f32.mrf.mxu3 }
 0x2b0   :  { %v1295_v63 = vadd.f32 %v1294_v56, %v1240_v41 }
 0x2b2   :  { %v5253_v26 = vadd.f32 %v5185_v14, %v1295_v63 }
 0x2b4   :  { %v1432_v6 = vmul.f32 %v5253_v26, %v5253_v26  ;;  %v1408_v38 = vsel %vm1407_vm7, %v5253_v26, 0.0 }
 0x2b6   :  { %v1441_v31 = vsel %vm1407_vm7, %v1432_v6, 0.0 }
 0x2b7   :  { %v1296_v58 = vpop.f32.mrf.mxu3 }
 0x2b8   :  { %v1297_v61 = vadd.f32 %v1296_v58, %v1242_v44 }
 0x2ba   :  { %v5250_v19 = vadd.f32 %v1376_v36, %v1297_v61 }
 0x2bc   :  { %v1433_v29 = vmul.f32 %v5250_v19, %v5250_v19  ;;  %v1409_v3 = vsel %vm1407_vm7, %v5250_v19, 0.0 }
 0x2bd   :  { %v1410_v34 = vadd.f32 %v1409_v3, %v1408_v38 }
 0x2be   :  { %v1442_v8 = vsel %vm1407_vm7, %v1433_v29, 0.0 }
 0x2bf   :  { %v1299_v23 = vpop.f32.mrf.mxu3  ;;  %v1443_v14 = vadd.f32 %v1442_v8, %v1441_v31 }
 0x2c0   :  { %v1300_v54 = vadd.f32 %v1299_v23, %v1245_v52 }
 0x2c2   :  { %v5255_v1 = vadd.f32 %v1379_v20, %v1300_v54 }
 0x2c4   :  { %v1434_v28 = vmul.f32 %v5255_v1, %v5255_v1  ;;  %v1411_v9 = vsel %vm1407_vm7, %v5255_v1, 0.0 }
 0x2c5   :  { %v1412_v43 = vadd.f32 %v1411_v9, %v1410_v34 }
 0x2c6   :  { %v1444_v10 = vsel %vm1407_vm7, %v1434_v28, 0.0 }
 0x2c7   :  { %v1301_v33 = vpop.f32.mrf.mxu3  ;;  %v1445_v35 = vadd.f32 %v1444_v10, %v1443_v14 }
 0x2c8   :  { %v1302_v24 = vadd.f32 %v1301_v33, %v1247_v15 }
 0x2ca   :  { %v5259_v2 = vadd.f32 %v1381_v42, %v1302_v24 }
 0x2cc   :  { %v1435_v45 = vmul.f32 %v5259_v2, %v5259_v2  ;;  %v1413_v37 = vsel %vm1407_vm7, %v5259_v2, 0.0 }
 0x2cd   :  { %v1414_v44 = vadd.f32 %v1413_v37, %v1412_v43 }
 0x2ce   :  { %v1446_v41 = vsel %vm1407_vm7, %v1435_v45, 0.0 }
 0x2cf   :  { %v1304_v53 = vpop.f32.mrf.mxu3  ;;  %v1447_v42 = vadd.f32 %v1446_v41, %v1445_v35  ;;  %v1468_v41 = vld [vmem:[%s4015_s17] sm:$0x1]  ;;  %s4035_s17 = sld [smem:[%s5988_s0 + %s4585_s14]]  }
 0x2d0   :  { %v1305_v4 = vadd.f32 %v1304_v53, %v1250_v59 }
 0x2d2   :  { %v5267_v30 = vadd.f32 %v1384_v32, %v1305_v4 }
 0x2d4   :  { %v1436_v39 = vmul.f32 %v5267_v30, %v5267_v30  ;;  %v1415_v36 = vsel %vm1407_vm7, %v5267_v30, 0.0 }
 0x2d5   :  { %v1416_v15 = vadd.f32 %v1415_v36, %v1414_v44  ;;  %v1481_v44 = vld [vmem:[%s4016_s21] sm:$0x1]  ;;  %s4036_s21 = sld [smem:[%s5988_s0 + %s4586_s18]]  }
 0x2d6   :  { %v1448_v20 = vsel %vm1407_vm7, %v1436_v39, 0.0 }
 0x2d7   :  { %v1306_v62 = vpop.f32.mrf.mxu3 }
 0x2d8   :  { %v1307_v5 = vadd.f32 %v1306_v62, %v1252_v57 }
 0x2da   :  { %v5277_v51 = vadd.f32 %v5195_v47, %v1307_v5  ;;  %v1449_v47 = vadd.f32 %v1448_v20, %v1447_v42 }
 0x2dc   :  { %v1437_v17 = vmul.f32 %v5277_v51, %v5277_v51  ;;  %v1417_v46 = vsel %vm1407_vm7, %v5277_v51, 0.0 }
 0x2dd   :  { %v1418_v57 = vadd.f32 %v1417_v46, %v1416_v15 }
 0x2de   :  { %v1450_v32 = vsel %vm1407_vm7, %v1437_v17, 0.0 }
 0x2df   :  { %v1309_v0 = vpop.f32.mrf.mxu3  ;;  %v1451_v12 = vadd.f32 %v1450_v32, %v1449_v47 }
 0x2e0   :  { %v1310_v7 = vadd.f32 %v1309_v0, %v1255_v22 }
 0x2e2   :  { %v5286_v40 = vadd.f32 %v5197_v49, %v1310_v7 }
 0x2e4   :  { %v1438_v52 = vmul.f32 %v5286_v40, %v5286_v40  ;;  %v1419_v59 = vsel %vm1407_vm7, %v5286_v40, 0.0 }
 0x2e5   :  { %v1420_v55 = vadd.f32 %v1419_v59, %v1418_v57 }
 0x2e6   :  { %v1452_v22 = vsel %vm1407_vm7, %v1438_v52, 0.0 }
 0x2e7   :  { %v1311_v60 = vpop.f32.mrf.mxu3  ;;  %v1453_v23 = vadd.f32 %v1452_v22, %v1451_v12 }
 0x2e8   :  { %v1312_v13 = vadd.f32 %v1311_v60, %v1257_v21 }
 0x2ea   :  { %v5294_v11 = vadd.f32 %v5199_v18, %v1312_v13 }
 0x2ec   :  { %v1439_v48 = vmul.f32 %v5294_v11, %v5294_v11  ;;  %v1421_v18 = vsel %vm1407_vm7, %v5294_v11, 0.0 }
 0x2ed   :  { %v1422_v33 = vadd.f32 %v1421_v18, %v1420_v55 }
 0x2ee   :  { %v1454_v56 = vsel %vm1407_vm7, %v1439_v48, 0.0 }
 0x2ef   :  { %v1314_v49 = vpop.f32.mrf.mxu3  ;;  %v1455_v62 = vadd.f32 %v1454_v56, %v1453_v23 }
 0x2f0   :  { %v1315_v21 = vadd.f32 %v1314_v49, %v5225_v50 }
 0x2f2   :  { %v1406_v58 = vadd.f32 %v5213_v27, %v1315_v21 }
 0x2f4   :  { %v1423_v53 = vsel %vm1407_vm7, %v1406_v58, 0.0  ;;  %v1440_v16 = vmul.f32 %v1406_v58, %v1406_v58 }
 0x2f5   :  { %v1424_v61 = vadd.f32 %v1423_v53, %v1422_v33 }
 0x2f6   :  { %v1456_v63 = vsel %vm1407_vm7, %v1440_v16, 0.0 }
 0x2f7   :  { %v1425_v54 = vrot.slane %v1424_v61, 4  ;;  %v1457_v24 = vadd.f32 %v1456_v63, %v1455_v62  ;;  %v1316_v0 = vpop.f32.mrf.mxu3 }
 0x2f9   :  { %v1426_v4 = vadd.f32 %v1425_v54, %v1424_v61  ;;  %v1458_v50 = vrot.slane %v1457_v24, 4 }
 0x2fb   :  { %v1427_v29 = vrot.slane %v1426_v4, 2  ;;  %v1459_v5 = vadd.f32 %v1458_v50, %v1457_v24  ;;  %v4429_v50 = vld [vmem:[%s4022_s25 + $0x8] sm:$0xff] }
 0x2fc   :  { %1857 = vmatpush.bf16.msrb.mxu2 %v4429_v50 }
 0x2fd   :  { %v1428_v6 = vadd.f32 %v1427_v29, %v1426_v4  ;;  %v1460_v28 = vrot.slane %v1459_v5, 2 }
 0x2ff   :  { %v1429_v3 = vrot.slane %v1428_v6, 1  ;;  %v1461_v27 = vadd.f32 %v1460_v28, %v1459_v5 }
 0x301   :  { %v1430_v7 = vadd.f32 %v1429_v3, %v1428_v6  ;;  %v1462_v38 = vrot.slane %v1461_v27, 1 }
 0x303   :  { %v1431_v8 = vmul.f32 0.013888889, %v1430_v7  ;;  %v1463_v9 = vadd.f32 %v1462_v38, %v1461_v27 }
 0x305   :  { %v1464_v45 = vmul.f32 0.013888889, %v1463_v9  ;;  %v1465_v31 = vmul.f32 %v1431_v8, %v1431_v8 }
 0x307   :  { %v1466_v34 = vsub.f32 %v1464_v45, %v1465_v31  ;;  %v4428_v31 = vld [vmem:[%s4022_s25] sm:$0xff] }
 0x308   :  { %1911 = vmatpush.bf16.msra.mxu3 %v4428_v31 }
 0x309   :  { %v1467_v10 = vmax.f32 %v1466_v34, 0.0 }
 0x30b   :  { %v1469_v60 = vadd.f32 1e-05, %v1467_v10  ;;  %v4430_v10 = vld [vmem:[%s4022_s25 + $0x10] sm:$0xff]  ;;  %s4042_s25 = sld [smem:[%s5988_s0 + %s4587_s22]]  }
 0x30c   :  { %2045 = vmatpush.bf16.msra.mxu0 %v4430_v10 }
 0x30d   :  { %4532 = vrsqrt.f32 %v1469_v60  ;;  %vm1476_vm9 = vweird.f32 %v1469_v60 }
 0x313   :  { %v4533_v37 = vpop.eup %4532 }
 0x314   :  { %v1471_v39 = vmul.f32 %v4533_v37, %v1469_v60  ;;  %vm1477_vm8 = vweird.f32 %v4533_v37 }
 0x315   :  { %vm1478_vm10 = vmor %vm1476_vm9, %vm1477_vm8 }
 0x316   :  { %v1472_v13 = vmul.f32 %v4533_v37, %v1471_v39 }
 0x318   :  { %v1473_v14 = vmul.f32 0.5, %v1472_v13 }
 0x31a   :  { %v1474_v43 = vsub.f32 1.5, %v1473_v14 }
 0x31c   :  { %v1475_v36 = vmul.f32 %v4533_v37, %v1474_v43 }
 0x31e   :  { %v1479_v17 = vsel %vm1478_vm10, %v4533_v37, %v1475_v36 }
 0x31f   :  { %v1480_v35 = vmul.f32 %v1479_v17, %v1468_v41 }
 0x321   :  { %v1482_v20 = vmul.f32 %v1480_v35, %v1431_v8  ;;  %v1485_v46 = vperm.slane %v1480_v35, 0 }
 0x323   :  { %v1483_v52 = vsub.f32 %v1481_v44, %v1482_v20  ;;  %v1495_v42 = vmul.f32 %v1485_v46, %v1406_v58  ;;  %v1487_v32 = vmul.f32 %v1485_v46, %v5253_v26  ;;  %v1488_v59 = vmul.f32 %v1485_v46, %v5250_v19 }
 0x324   :  { %v1489_v55 = vmul.f32 %v1485_v46, %v5255_v1  ;;  %v1490_v26 = vmul.f32 %v1485_v46, %v5259_v2  ;;  %v1491_v62 = vmul.f32 %v1485_v46, %v5267_v30  ;;  %v1492_v61 = vmul.f32 %v1485_v46, %v5277_v51 }
 0x325   :  { %v1497_v15 = vperm.slane %v1483_v52, 0  ;;  %v1493_v30 = vmul.f32 %v1485_v46, %v5286_v40  ;;  %v1494_v51 = vmul.f32 %v1485_v46, %v5294_v11 }
 0x327   :  { %v1507_v48 = vadd.f32 %v1497_v15, %v1495_v42  ;;  %v1499_v47 = vadd.f32 %v1497_v15, %v1487_v32  ;;  %v1500_v57 = vadd.f32 %v1497_v15, %v1488_v59  ;;  %v1501_v56 = vadd.f32 %v1497_v15, %v1489_v55 }
 0x328   :  { %v1502_v19 = vadd.f32 %v1497_v15, %v1490_v26  ;;  %v1503_v1 = vadd.f32 %v1497_v15, %v1491_v62  ;;  %v1504_v63 = vadd.f32 %v1497_v15, %v1492_v61  ;;  %v1505_v29 = vadd.f32 %v1497_v15, %v1493_v30 }
 0x329   :  { %v1508_v49 = vmul.f32 0.1, %v1499_v47  ;;  %v1509_v22 = vmul.f32 0.1, %v1500_v57  ;;  %v1510_v58 = vmul.f32 0.1, %v1501_v56  ;;  %v1506_v5 = vadd.f32 %v1497_v15, %v1494_v51 }
 0x32a   :  { %v1511_v23 = vmul.f32 0.1, %v1502_v19  ;;  %v1512_v2 = vmul.f32 0.1, %v1503_v1  ;;  %v1513_v54 = vmul.f32 0.1, %v1504_v63 }
 0x32b   :  { %v5322_v18 = vmax.f32 %v1499_v47, %v1508_v49  ;;  %v5324_v21 = vmax.f32 %v1500_v57, %v1509_v22  ;;  %v5331_v33 = vmax.f32 %v1501_v56, %v1510_v58  ;;  %v1514_v6 = vmul.f32 0.1, %v1505_v29 }
 0x32c   :  { %v5333_v53 = vmax.f32 %v1502_v19, %v1511_v23  ;;  %v5343_v24 = vmax.f32 %v1503_v1, %v1512_v2  ;;  %v5345_v0 = vmax.f32 %v1504_v63, %v1513_v54  ;;  %v1515_v28 = vmul.f32 0.1, %v1506_v5 }
 0x32d   :  { %v1526_v12 = vpack.c.bf16 %v5324_v21, %v5322_v18  ;;  %v5352_v3 = vmax.f32 %v1505_v29, %v1514_v6  ;;  %v1516_v38 = vmul.f32 0.1, %v1507_v48 }
 0x32e   :  { %v1527_v16 = vpack.c.bf16 %v5333_v53, %v5331_v33  ;;  %v1528_v4 = vpack.c.bf16 %v5345_v0, %v5343_v24  ;;  %v5354_v27 = vmax.f32 %v1506_v5, %v1515_v28 }
 0x32f   :  { %4121 = vmatmul.msk.bf16.vlgmr.msra.gmra.mxu1 %vm1407_vm7, %v1526_v12  ;;  %v5359_v8 = vmax.f32 %v1507_v48, %v1516_v38 }
 0x330   :  { %v1529_v7 = vpack.c.bf16 %v5354_v27, %v5352_v3 }
 0x331   :  { %v1530_v40 = vpack.c.bf16 %v5359_v8, %v5359_v8 }
 0x33f   :  { %4122 = vmatmul.msk.bf16.gmra.mxu1 %vm1407_vm7, %v1527_v16 }
 0x34f   :  { %4123 = vmatmul.msk.bf16.gmra.mxu1 %vm1407_vm7, %v1528_v4 }
 0x35f   :  { %4124 = vmatmul.msk.bf16.gmra.mxu1 %vm1407_vm7, %v1529_v7 }
 0x36f   :  { %4125 = vmatmul.msk.bf16.gmra.mxu1 %vm1407_vm7, %v1530_v40 }
 0x3ac   :  { %v5364_v11 = vpop.f32.mrf.mxu1 }
 0x3ad   :  { %v1619_v14 = vmul.f32 %v5364_v11, %v5364_v11  ;;  %v1595_v36 = vsel %vm858_vm3, %v5364_v11, 0.0 }
 0x3af   :  { %v1628_v46 = vsel %vm858_vm3, %v1619_v14, 0.0 }
 0x3b4   :  { %v5366_v9 = vpop.f32.mrf.mxu1 }
 0x3b5   :  { %v1620_v39 = vmul.f32 %v5366_v9, %v5366_v9  ;;  %v1596_v43 = vsel %vm858_vm3, %v5366_v9, 0.0 }
 0x3b6   :  { %v1597_v20 = vadd.f32 %v1596_v43, %v1595_v36 }
 0x3b7   :  { %v1629_v17 = vsel %vm858_vm3, %v1620_v39, 0.0 }
 0x3b8   :  { %v1630_v59 = vadd.f32 %v1629_v17, %v1628_v46 }
 0x3bc   :  { %v5368_v45 = vpop.f32.mrf.mxu1 }
 0x3bd   :  { %v1621_v41 = vmul.f32 %v5368_v45, %v5368_v45  ;;  %v1598_v35 = vsel %vm858_vm3, %v5368_v45, 0.0 }
 0x3be   :  { %v1599_v32 = vadd.f32 %v1598_v35, %v1597_v20 }
 0x3bf   :  { %v1631_v52 = vsel %vm858_vm3, %v1621_v41, 0.0 }
 0x3c0   :  { %v1632_v49 = vadd.f32 %v1631_v52, %v1630_v59 }
 0x3c4   :  { %v5370_v34 = vpop.f32.mrf.mxu1 }
 0x3c5   :  { %v1622_v44 = vmul.f32 %v5370_v34, %v5370_v34  ;;  %v1600_v42 = vsel %vm858_vm3, %v5370_v34, 0.0 }
 0x3c6   :  { %v1601_v22 = vadd.f32 %v1600_v42, %v1599_v32 }
 0x3c7   :  { %v1633_v48 = vsel %vm858_vm3, %v1622_v44, 0.0 }
 0x3c8   :  { %v1634_v58 = vadd.f32 %v1633_v48, %v1632_v49 }
 0x3cc   :  { %v5372_v60 = vpop.f32.mrf.mxu1 }
 0x3cd   :  { %v1623_v15 = vmul.f32 %v5372_v60, %v5372_v60  ;;  %v1602_v47 = vsel %vm858_vm3, %v5372_v60, 0.0 }
 0x3ce   :  { %v1603_v19 = vadd.f32 %v1602_v47, %v1601_v22 }
 0x3cf   :  { %v1635_v55 = vsel %vm858_vm3, %v1623_v15, 0.0 }
 0x3d0   :  { %v1636_v61 = vadd.f32 %v1635_v55, %v1634_v58 }
 0x3d4   :  { %v5374_v37 = vpop.f32.mrf.mxu1 }
 0x3d5   :  { %v1624_v57 = vmul.f32 %v5374_v37, %v5374_v37  ;;  %v1604_v26 = vsel %vm858_vm3, %v5374_v37, 0.0 }
 0x3d6   :  { %v1605_v1 = vadd.f32 %v1604_v26, %v1603_v19 }
 0x3d7   :  { %v1637_v23 = vsel %vm858_vm3, %v1624_v57, 0.0 }
 0x3d8   :  { %v1638_v4 = vadd.f32 %v1637_v23, %v1636_v61 }
 0x3dc   :  { %v5378_v13 = vpop.f32.mrf.mxu1 }
 0x3dd   :  { %v1625_v56 = vmul.f32 %v5378_v13, %v5378_v13  ;;  %v1606_v16 = vsel %vm858_vm3, %v5378_v13, 0.0 }
 0x3de   :  { %v1607_v54 = vadd.f32 %v1606_v16, %v1605_v1  ;;  %v1668_v16 = vld [vmem:[%s4019_s3] sm:$0x1]  ;;  %s4039_s3 = sld [smem:[%s5988_s0 + %s4589_s30]]  }
 0x3df   :  { %v1639_v63 = vsel %vm858_vm3, %v1625_v56, 0.0  ;;  %v1655_v56 = vld [vmem:[%s4018_s29] sm:$0x1]  ;;  %s4038_s29 = sld [smem:[%s5988_s0 + %s4588_s26]]  }
 0x3e0   :  { %v1640_v51 = vadd.f32 %v1639_v63, %v1638_v4 }
 0x3e4   :  { %v5404_v12 = vpop.f32.mrf.mxu1 }
 0x3e5   :  { %v1626_v62 = vmul.f32 %v5404_v12, %v5404_v12  ;;  %v1608_v2 = vsel %vm858_vm3, %v5404_v12, 0.0 }
 0x3e6   :  { %v1609_v29 = vadd.f32 %v1608_v2, %v1607_v54 }
 0x3e7   :  { %v1641_v30 = vsel %vm858_vm3, %v1626_v62, 0.0 }
 0x3e8   :  { %v1642_v7 = vadd.f32 %v1641_v30, %v1640_v51 }
 0x3ec   :  { %v1591_v50 = vpop.f32.mrf.mxu1 }
 0x3ed   :  { %v1610_v5 = vsel %vm858_vm3, %v1591_v50, 0.0  ;;  %v1627_v6 = vmul.f32 %v1591_v50, %v1591_v50 }
 0x3ee   :  { %v1611_v28 = vadd.f32 %v1610_v5, %v1609_v29 }
 0x3ef   :  { %v1643_v38 = vsel %vm858_vm3, %v1627_v6, 0.0 }
 0x3f0   :  { %v1612_v40 = vrot.slane %v1611_v28, 4  ;;  %v1644_v31 = vadd.f32 %v1643_v38, %v1642_v7 }
 0x3f2   :  { %v1613_v10 = vadd.f32 %v1612_v40, %v1611_v28  ;;  %v1645_v39 = vrot.slane %v1644_v31, 4 }
 0x3f4   :  { %v1614_v14 = vrot.slane %v1613_v10, 2  ;;  %v1646_v43 = vadd.f32 %v1645_v39, %v1644_v31  ;;  %v1593_v41 = vpop.f32.mrf.mxu1 }
 0x3f6   :  { %v1615_v36 = vadd.f32 %v1614_v14, %v1613_v10  ;;  %v1647_v17 = vrot.slane %v1646_v43, 2 }
 0x3f8   :  { %v1616_v35 = vrot.slane %v1615_v36, 1  ;;  %v1648_v44 = vadd.f32 %v1647_v17, %v1646_v43 }
 0x3fa   :  { %v1617_v20 = vadd.f32 %v1616_v35, %v1615_v36  ;;  %v1649_v46 = vrot.slane %v1648_v44, 1 }
 0x3fc   :  { %v1618_v52 = vmul.f32 0.013888889, %v1617_v20  ;;  %v1650_v42 = vadd.f32 %v1649_v46, %v1648_v44  ;;  %v1754_v44 = vpop.permute.xlu0 %1753 }
 0x3fe   :  { %v1651_v15 = vmul.f32 0.013888889, %v1650_v42  ;;  %v1652_v32 = vmul.f32 %v1618_v52, %v1618_v52 }
 0x400   :  { %v1653_v59 = vsub.f32 %v1651_v15, %v1652_v32  ;;  %v1759_v32 = vpop.permute.xlu1 %1758 }
 0x402   :  { %v1654_v48 = vmax.f32 %v1653_v59, 0.0 }
 0x404   :  { %v1656_v47 = vadd.f32 1e-05, %v1654_v48 }
 0x406   :  { %4534 = vrsqrt.f32 %v1656_v47  ;;  %vm1663_vm12 = vweird.f32 %v1656_v47 }
 0x40c   :  { %v4535_v57 = vpop.eup %4534 }
 0x40d   :  { %v1658_v49 = vmul.f32 %v4535_v57, %v1656_v47  ;;  %vm1664_vm11 = vweird.f32 %v4535_v57 }
 0x40e   :  { %vm1665_vm13 = vmor %vm1663_vm12, %vm1664_vm11 }
 0x40f   :  { %v1659_v22 = vmul.f32 %v4535_v57, %v1658_v49 }
 0x411   :  { %v1660_v55 = vmul.f32 0.5, %v1659_v22 }
 0x413   :  { %v1661_v26 = vsub.f32 1.5, %v1660_v55 }
 0x415   :  { %v1662_v19 = vmul.f32 %v4535_v57, %v1661_v26 }
 0x417   :  { %v1666_v58 = vsel %vm1665_vm13, %v4535_v57, %v1662_v19  ;;  %v1958_v57 = vpop.permute.xlu2 %1957 }
 0x418   :  { %v1667_v23 = vmul.f32 %v1666_v58, %v1655_v56  ;;  %v1963_v56 = vpop.permute.xlu0 %1962 }
 0x41a   :  { %v1669_v62 = vmul.f32 %v1667_v23, %v1618_v52  ;;  %v1672_v61 = vperm.slane %v1667_v23, 0 }
 0x41c   :  { %v1670_v1 = vsub.f32 %v1668_v16, %v1669_v62  ;;  %v1676_v63 = vmul.f32 %v1672_v61, %v5368_v45  ;;  %v1682_v2 = vmul.f32 %v1672_v61, %v1591_v50  ;;  %v1674_v4 = vmul.f32 %v1672_v61, %v5364_v11 }
 0x41d   :  { %v1675_v30 = vmul.f32 %v1672_v61, %v5366_v9  ;;  %v1677_v51 = vmul.f32 %v1672_v61, %v5370_v34  ;;  %v1678_v29 = vmul.f32 %v1672_v61, %v5372_v60  ;;  %v1679_v5 = vmul.f32 %v1672_v61, %v5374_v37 }
 0x41e   :  { %v1684_v54 = vperm.slane %v1670_v1, 0  ;;  %v1680_v6 = vmul.f32 %v1672_v61, %v5378_v13  ;;  %v1681_v28 = vmul.f32 %v1672_v61, %v5404_v12 }
 0x420   :  { %v1688_v7 = vadd.f32 %v1684_v54, %v1676_v63  ;;  %v1694_v38 = vadd.f32 %v1684_v54, %v1682_v2  ;;  %v1686_v40 = vadd.f32 %v1684_v54, %v1674_v4  ;;  %v1687_v45 = vadd.f32 %v1684_v54, %v1675_v30  ;;  %v1764_v63 = vpop.permute.xlu1 %1763  ;;  %v1769_v2 = vpop.permute.xlu2 %1768 }
 0x421   :  { %v1689_v50 = vadd.f32 %v1684_v54, %v1677_v51  ;;  %v1690_v31 = vadd.f32 %v1684_v54, %v1678_v29  ;;  %v1691_v10 = vadd.f32 %v1684_v54, %v1679_v5  ;;  %v1692_v11 = vadd.f32 %v1684_v54, %v1680_v6  ;;  %v1968_v6 = vpop.permute.xlu0 %1967 }
 0x422   :  { %v1697_v39 = vmul.f32 0.1, %v1688_v7  ;;  %v1703_v9 = vmul.f32 0.1, %v1694_v38  ;;  %v1695_v14 = vmul.f32 0.1, %v1686_v40  ;;  %v1693_v34 = vadd.f32 %v1684_v54, %v1681_v28 }
 0x423   :  { %v1696_v43 = vmul.f32 0.1, %v1687_v45  ;;  %v1698_v60 = vmul.f32 0.1, %v1689_v50  ;;  %v1699_v41 = vmul.f32 0.1, %v1690_v31 }
 0x424   :  { %v1712_v37 = vmax.f32 %v1694_v38, %v1703_v9  ;;  %v1704_v36 = vmax.f32 %v1686_v40, %v1695_v14  ;;  %v1700_v13 = vmul.f32 0.1, %v1691_v10  ;;  %v1706_v12 = vmax.f32 %v1688_v7, %v1697_v39 }
 0x425   :  { %v1705_v17 = vmax.f32 %v1687_v45, %v1696_v43  ;;  %v1701_v35 = vmul.f32 0.1, %v1692_v11  ;;  %v1707_v20 = vmax.f32 %v1689_v50, %v1698_v60  ;;  %v1702_v46 = vmul.f32 0.1, %v1693_v34 }
 0x426   :  { %1732 = vst.msk [vmem:[#allocation4 + $0x48] sm:$0xff] %vm858_vm3, %v1712_v37  ;;  %v1708_v52 = vmax.f32 %v1690_v31, %v1699_v41  ;;  %v1709_v42 = vmax.f32 %v1691_v10, %v1700_v13 }
 0x427   :  { %1724 = vst.msk [vmem:[#allocation4 + $0x8] sm:$0xff] %vm858_vm3, %v1704_v36  ;;  %v1710_v15 = vmax.f32 %v1692_v11, %v1701_v35  ;;  %v1711_v59 = vmax.f32 %v1693_v34, %v1702_v46 }
 0x428   :  { %1725 = vst.msk [vmem:[#allocation4 + $0x10] sm:$0xff] %vm858_vm3, %v1705_v17  ;;  %v1973_v28 = vpop.permute.xlu1 %1972  ;;  %v1774_v11 = vpop.permute.xlu2 %1773 }
 0x429   :  { %1726 = vst.msk [vmem:[#allocation4 + $0x18] sm:$0xff] %vm858_vm3, %v1706_v12  ;;  %v1779_v39 = vpop.permute.xlu0 %1778 }
 0x42a   :  { %1727 = vst.msk [vmem:[#allocation4 + $0x20] sm:$0xff] %vm858_vm3, %v1707_v20 }
 0x42b   :  { %1728 = vst.msk [vmem:[#allocation4 + $0x28] sm:$0xff] %vm858_vm3, %v1708_v52 }
 0x42c   :  { %1729 = vst.msk [vmem:[#allocation4 + $0x30] sm:$0xff] %vm858_vm3, %v1709_v42 }
 0x42d   :  { %1730 = vst.msk [vmem:[#allocation4 + $0x38] sm:$0xff] %vm858_vm3, %v1710_v15 }
 0x42e   :  { %v1812_v48 = vld [vmem:[#allocation4 + $0x8] sm:$0xff]  ;;  %1731 = vst.msk [vmem:[#allocation4 + $0x40] sm:$0xff] %vm858_vm3, %v1711_v59 }
 0x42f   :  { %v1733_v47 = vld [vmem:[#allocation4 + $0x7] sm:$0xff]  ;;  %v1813_v49 = vld [vmem:[#allocation4 + $0x10] sm:$0xff] }
 0x430   :  { %v1734_v22 = vld [vmem:[#allocation4 + $0xf] sm:$0xff]  ;;  %v1796_v55 = vmul.f32 %v1754_v44, %v1733_v47  ;;  %v1821_v19 = vpack.c.bf16 %v1813_v49, %v1812_v48  ;;  %v1735_v54 = vld [vmem:[#allocation4 + $0x17] sm:$0xff]  ;;  %v1983_v37 = vpop.permute.xlu2 %1982  ;;  %v1978_v36 = vpop.permute.xlu1 %1977 }
 0x431   :  { %v1937_v26 = vld [vmem:[#allocation4 + $0x9] sm:$0xff]  ;;  %v1797_v58 = vmul.f32 %v1759_v32, %v1734_v22  ;;  %v1938_v23 = vld [vmem:[#allocation4 + $0x11] sm:$0xff]  ;;  %v1736_v4 = vld [vmem:[#allocation4 + $0x1f] sm:$0xff]  ;;  %v1798_v7 = vmul.f32 %v1764_v63, %v1735_v54  ;;  %v1784_v52 = vpop.permute.xlu0 %1783 }
 0x432   :  { %v2000_v16 = vmul.f32 %v1958_v57, %v1937_v26  ;;  %v2001_v62 = vmul.f32 %v1963_v56, %v1938_v23  ;;  %4132 = vmatmul.msk.bf16.vlgmr.msrb.gmra.mxu2 %vm858_vm3, %v1821_v19  ;;  %v1939_v30 = vld [vmem:[#allocation4 + $0x19] sm:$0xff]  ;;  %v1940_v51 = vld [vmem:[#allocation4 + $0x21] sm:$0xff]  ;;  %v1799_v38 = vmul.f32 %v1769_v2, %v1736_v4 }
 0x433   :  { %v1805_v61 = vpack.c.bf16 %v1797_v58, %v1796_v55  ;;  %v1814_v29 = vld [vmem:[#allocation4 + $0x18] sm:$0xff]  ;;  %v1815_v5 = vld [vmem:[#allocation4 + $0x20] sm:$0xff]  ;;  %v2002_v40 = vmul.f32 %v1968_v6, %v1939_v30  ;;  %v2003_v45 = vmul.f32 %v1973_v28, %v1940_v51  ;;  %v1738_v14 = vld [vmem:[#allocation4 + $0x2f] sm:$0xff] }
 0x434   :  { %v2009_v1 = vpack.c.bf16 %v2001_v62, %v2000_v16  ;;  %v1822_v50 = vpack.c.bf16 %v1815_v5, %v1814_v29  ;;  %v1806_v31 = vpack.c.bf16 %v1799_v38, %v1798_v7  ;;  %v1737_v9 = vld [vmem:[#allocation4 + $0x27] sm:$0xff]  ;;  %v1942_v43 = vld [vmem:[#allocation4 + $0x31] sm:$0xff]  ;;  %v1801_v17 = vmul.f32 %v1779_v39, %v1738_v14 }
 0x435   :  { %4141 = vmatmul.msk.bf16.vlgmr.msra.gmra.mxu3 %vm858_vm3, %v1805_v61  ;;  %v2010_v10 = vpack.c.bf16 %v2003_v45, %v2002_v40  ;;  %v1941_v34 = vld [vmem:[#allocation4 + $0x29] sm:$0xff]  ;;  %v1800_v13 = vmul.f32 %v1774_v11, %v1737_v9  ;;  %v2005_v35 = vmul.f32 %v1983_v37, %v1942_v43  ;;  %v1739_v42 = vld [vmem:[#allocation4 + $0x37] sm:$0xff]  ;;  %v1740_v15 = vld [vmem:[#allocation4 + $0x3f] sm:$0xff] }
 0x436   :  { %4152 = vmatmul.msk.bf16.vlgmr.msra.gmra.mxu0 %vm858_vm3, %v2009_v1  ;;  %v1816_v60 = vld [vmem:[#allocation4 + $0x28] sm:$0xff]  ;;  %v1817_v41 = vld [vmem:[#allocation4 + $0x30] sm:$0xff]  ;;  %v2004_v12 = vmul.f32 %v1978_v36, %v1941_v34  ;;  %v1943_v32 = vld [vmem:[#allocation4 + $0x39] sm:$0xff]  ;;  %v1802_v55 = vmul.f32 %v1784_v52, %v1739_v42 }
 0x437   :  { %v1823_v44 = vpack.c.bf16 %v1817_v41, %v1816_v60  ;;  %v1807_v20 = vpack.c.bf16 %v1801_v17, %v1800_v13  ;;  %v1944_v59 = vld [vmem:[#allocation4 + $0x41] sm:$0xff]  ;;  %v1818_v47 = vld [vmem:[#allocation4 + $0x38] sm:$0xff]  ;;  %v1945_v61 = vld [vmem:[#allocation4 + $0x49] sm:$0xff] }
 0x438   :  { %v2011_v46 = vpack.c.bf16 %v2005_v35, %v2004_v12  ;;  %v1789_v48 = vpop.permute.xlu1 %1788  ;;  %v1819_v57 = vld [vmem:[#allocation4 + $0x40] sm:$0xff]  ;;  %v1988_v49 = vpop.permute.xlu2 %1987  ;;  %v1820_v63 = vld [vmem:[#allocation4 + $0x48] sm:$0xff] }
 0x439   :  { %v1993_v22 = vpop.permute.xlu0 %1992  ;;  %v1803_v26 = vmul.f32 %v1789_v48, %v1740_v15  ;;  %v2006_v56 = vmul.f32 %v1988_v49, %v1943_v32  ;;  %v1824_v58 = vpack.c.bf16 %v1819_v57, %v1818_v47  ;;  %v1741_v62 = vld [vmem:[#allocation4 + $0x47] sm:$0xff]  ;;  %v1825_v30 = vpack.c.bf16 %v1820_v63, %v1820_v63 }
 0x43a   :  { %v2007_v19 = vmul.f32 %v1993_v22, %v1944_v59  ;;  %v4432_v43 = vld [vmem:[%s5463_s7 + $0x8] sm:$0xff] }
 0x43b   :  { %v1808_v23 = vpack.c.bf16 %v1803_v26, %v1802_v55  ;;  %v4436_v60 = vld [vmem:[%s5463_s7 + $0x28] sm:$0xff]  ;;  %2368 = vmatpush.bf16.msra.mxu2 %v4432_v43 }
 0x43c   :  { %v2012_v16 = vpack.c.bf16 %v2007_v19, %v2006_v56  ;;  %2430 = vmatpush.bf16.msrb.mxu3 %v4436_v60 }
 0x440   :  { %v1794_v1 = vpop.permute.xlu1 %1793  ;;  %v1998_v2 = vpop.permute.xlu2 %1997 }
 0x441   :  { %v1804_v54 = vmul.f32 %v1794_v1, %v1741_v62  ;;  %v2008_v4 = vmul.f32 %v1998_v2, %v1945_v61 }
 0x442   :  { %4133 = vmatmul.msk.bf16.gmra.mxu2 %vm858_vm3, %v1822_v50 }
 0x443   :  { %v1809_v51 = vpack.c.bf16 %v1804_v54, %v1804_v54  ;;  %v2013_v29 = vpack.c.bf16 %v2008_v4, %v2008_v4 }
 0x445   :  { %4142 = vmatmul.msk.bf16.gmra.mxu3 %vm858_vm3, %v1806_v31 }
 0x446   :  { %4153 = vmatmul.msk.bf16.gmra.mxu0 %vm858_vm3, %v2010_v10 }
 0x452   :  { %4134 = vmatmul.msk.bf16.gmra.mxu2 %vm858_vm3, %v1823_v44 }
 0x455   :  { %4143 = vmatmul.msk.bf16.gmra.mxu3 %vm858_vm3, %v1807_v20 }
 0x456   :  { %4154 = vmatmul.msk.bf16.gmra.mxu0 %vm858_vm3, %v2011_v46 }
 0x462   :  { %4135 = vmatmul.msk.bf16.gmra.mxu2 %vm858_vm3, %v1824_v58 }
 0x465   :  { %4144 = vmatmul.msk.bf16.gmra.mxu3 %vm858_vm3, %v1808_v23 }
 0x466   :  { %4155 = vmatmul.msk.bf16.gmra.mxu0 %vm858_vm3, %v2012_v16 }
 0x472   :  { %4136 = vmatmul.msk.bf16.gmra.mxu2 %vm858_vm3, %v1825_v30 }
 0x475   :  { %4145 = vmatmul.msk.bf16.gmra.mxu3 %vm858_vm3, %v1809_v51 }
 0x476   :  { %4156 = vmatmul.msk.bf16.gmra.mxu0 %vm858_vm3, %v2013_v29 }
 0x4b3   :  { %v2047_v5 = vpop.f32.mrf.mxu0 }
 0x4b5   :  { %v1859_v6 = vpop.f32.mrf.mxu2 }
 0x4b8   :  { %v1913_v28 = vpop.f32.mrf.mxu3 }
 0x4b9   :  { %v1914_v12 = vadd.f32 %v1913_v28, %v1859_v6 }
 0x4bb   :  { %v2049_v7 = vpop.f32.mrf.mxu0  ;;  %v5469_v52 = vadd.f32 %v2047_v5, %v1914_v12 }
 0x4bd   :  { %v1861_v38 = vpop.f32.mrf.mxu2  ;;  %v2104_v49 = vmul.f32 %v5469_v52, %v5469_v52  ;;  %v2080_v19 = vsel %vm1407_vm7, %v5469_v52, 0.0 }
 0x4bf   :  { %v2113_v1 = vsel %vm1407_vm7, %v2104_v49, 0.0 }
 0x4c0   :  { %v1915_v40 = vpop.f32.mrf.mxu3 }
 0x4c1   :  { %v1916_v13 = vadd.f32 %v1915_v40, %v1861_v38 }
 0x4c3   :  { %v2052_v45 = vpop.f32.mrf.mxu0  ;;  %v5467_v20 = vadd.f32 %v2049_v7, %v1916_v13 }
 0x4c5   :  { %v1864_v50 = vpop.f32.mrf.mxu2  ;;  %v2105_v59 = vmul.f32 %v5467_v20, %v5467_v20  ;;  %v2081_v55 = vsel %vm1407_vm7, %v5467_v20, 0.0 }
 0x4c6   :  { %v2082_v63 = vadd.f32 %v2081_v55, %v2080_v19 }
 0x4c7   :  { %v2114_v23 = vsel %vm1407_vm7, %v2105_v59, 0.0 }
 0x4c8   :  { %v1918_v31 = vpop.f32.mrf.mxu3  ;;  %v2115_v5 = vadd.f32 %v2114_v23, %v2113_v1 }
 0x4c9   :  { %v1919_v35 = vadd.f32 %v1918_v31, %v1864_v50 }
 0x4cb   :  { %v2054_v10 = vpop.f32.mrf.mxu0  ;;  %v5471_v42 = vadd.f32 %v2052_v45, %v1919_v35 }
 0x4cd   :  { %v1866_v11 = vpop.f32.mrf.mxu2  ;;  %v2106_v22 = vmul.f32 %v5471_v42, %v5471_v42  ;;  %v2083_v16 = vsel %vm1407_vm7, %v5471_v42, 0.0 }
 0x4ce   :  { %v2084_v6 = vadd.f32 %v2083_v16, %v2082_v63 }
 0x4cf   :  { %v2116_v2 = vsel %vm1407_vm7, %v2106_v22, 0.0 }
 0x4d0   :  { %v1920_v39 = vpop.f32.mrf.mxu3  ;;  %v2117_v50 = vadd.f32 %v2116_v2, %v2115_v5 }
 0x4d1   :  { %v1921_v46 = vadd.f32 %v1920_v39, %v1866_v11 }
 0x4d3   :  { %v2057_v9 = vpop.f32.mrf.mxu0  ;;  %v5475_v48 = vadd.f32 %v2054_v10, %v1921_v46 }
 0x4d5   :  { %v1869_v14 = vpop.f32.mrf.mxu2  ;;  %v2107_v62 = vmul.f32 %v5475_v48, %v5475_v48  ;;  %v2085_v4 = vsel %vm1407_vm7, %v5475_v48, 0.0 }
 0x4d6   :  { %v2086_v31 = vadd.f32 %v2085_v4, %v2084_v6 }
 0x4d7   :  { %v2118_v28 = vsel %vm1407_vm7, %v2107_v62, 0.0 }
 0x4d8   :  { %v1923_v34 = vpop.f32.mrf.mxu3 }
 0x4d9   :  { %v1924_v32 = vadd.f32 %v1923_v34, %v1869_v14 }
 0x4db   :  { %v2059_v41 = vpop.f32.mrf.mxu0  ;;  %v5483_v26 = vadd.f32 %v2057_v9, %v1924_v32  ;;  %v2119_v9 = vadd.f32 %v2118_v28, %v2117_v50 }
 0x4dd   :  { %v1871_v37 = vpop.f32.mrf.mxu2  ;;  %v2108_v30 = vmul.f32 %v5483_v26, %v5483_v26  ;;  %v2087_v7 = vsel %vm1407_vm7, %v5483_v26, 0.0 }
 0x4de   :  { %v2088_v14 = vadd.f32 %v2087_v7, %v2086_v31 }
 0x4df   :  { %v2120_v10 = vsel %vm1407_vm7, %v2108_v30, 0.0 }
 0x4e0   :  { %v1925_v36 = vpop.f32.mrf.mxu3 }
 0x4e1   :  { %v1926_v47 = vadd.f32 %v1925_v36, %v1871_v37  ;;  %v2121_v37 = vadd.f32 %v2120_v10, %v2119_v9  ;;  %v4431_v9 = vld [vmem:[%s5463_s7] sm:$0xff] }
 0x4e2   :  { %2369 = vmatpush.bf16.msra.mxu2 %v4431_v9 }
 0x4e3   :  { %v2062_v17 = vpop.f32.mrf.mxu0  ;;  %v5492_v61 = vadd.f32 %v2059_v41, %v1926_v47 }
 0x4e5   :  { %v1874_v44 = vpop.f32.mrf.mxu2  ;;  %v2109_v38 = vmul.f32 %v5492_v61, %v5492_v61  ;;  %v2089_v11 = vsel %vm1407_vm7, %v5492_v61, 0.0 }
 0x4e6   :  { %v2090_v36 = vadd.f32 %v2089_v11, %v2088_v14  ;;  %v4435_v14 = vld [vmem:[%s5463_s7 + $0x20] sm:$0xff] }
 0x4e7   :  { %v2122_v43 = vsel %vm1407_vm7, %v2109_v38, 0.0  ;;  %2431 = vmatpush.bf16.msrb.mxu3 %v4435_v14 }
 0x4e8   :  { %v1928_v15 = vpop.f32.mrf.mxu3 }
 0x4e9   :  { %v1929_v56 = vadd.f32 %v1928_v15, %v1874_v44  ;;  %v2123_v44 = vadd.f32 %v2122_v43, %v2121_v37 }
 0x4eb   :  { %v2064_v57 = vpop.f32.mrf.mxu0  ;;  %v5500_v51 = vadd.f32 %v2062_v17, %v1929_v56 }
 0x4ed   :  { %v1876_v58 = vpop.f32.mrf.mxu2  ;;  %v2110_v39 = vmul.f32 %v5500_v51, %v5500_v51  ;;  %v2091_v60 = vsel %vm1407_vm7, %v5500_v51, 0.0 }
 0x4ee   :  { %v2092_v46 = vadd.f32 %v2091_v60, %v2090_v36 }
 0x4ef   :  { %v2124_v17 = vsel %vm1407_vm7, %v2110_v39, 0.0  ;;  %v4434_v39 = vld [vmem:[%s5463_s7 + $0x18] sm:$0xff] }
 0x4f0   :  { %v1930_v54 = vpop.f32.mrf.mxu3  ;;  %v2125_v47 = vadd.f32 %v2124_v17, %v2123_v44  ;;  %2324 = vmatpush.bf16.msrb.mxu1 %v4434_v39  ;;  %v2153_v44 = vld [vmem:[%s4024_s15] sm:$0x1]  ;;  %s4044_s15 = sld [smem:[%s5988_s0 + %s4592_s12]]  }
 0x4f1   :  { %v1931_v29 = vadd.f32 %v1930_v54, %v1876_v58 }
 0x4f3   :  { %v5507_v40 = vadd.f32 %v2064_v57, %v1931_v29  ;;  %v2067_v45 = vpop.f32.mrf.mxu0 }
 0x4f5   :  { %v1879_v34 = vpop.f32.mrf.mxu2  ;;  %v2111_v41 = vmul.f32 %v5507_v40, %v5507_v40  ;;  %v2093_v12 = vsel %vm1407_vm7, %v5507_v40, 0.0 }
 0x4f6   :  { %v2094_v57 = vadd.f32 %v2093_v12, %v2092_v46 }
 0x4f7   :  { %v2126_v15 = vsel %vm1407_vm7, %v2111_v41, 0.0 }
 0x4f8   :  { %v1933_v13 = vpop.f32.mrf.mxu3  ;;  %v2127_v55 = vadd.f32 %v2126_v15, %v2125_v47 }
 0x4f9   :  { %v1934_v35 = vadd.f32 %v1933_v13, %v1879_v34  ;;  %v4433_v34 = vld [vmem:[%s5463_s7 + $0x10] sm:$0xff]  ;;  %v2140_v13 = vld [vmem:[%s4023_s11] sm:$0x1]  ;;  %s5889_s7 = sld [smem:[%s5988_s0 + %s4590_s4]]  }
 0x4fa   :  { %2325 = vmatpush.bf16.msrb.mxu1 %v4433_v34  ;;  %s4043_s11 = sld [smem:[%s5988_s0 + %s4591_s8]]  }
 0x4fb   :  { %v2079_v32 = vadd.f32 %v2067_v45, %v1934_v35  ;;  %v2069_v59 = vpop.f32.mrf.mxu0 }
 0x4fd   :  { %v2095_v49 = vsel %vm1407_vm7, %v2079_v32, 0.0  ;;  %v2112_v22 = vmul.f32 %v2079_v32, %v2079_v32  ;;  %v1881_v19 = vpop.f32.mrf.mxu2 }
 0x4fe   :  { %v2096_v56 = vadd.f32 %v2095_v49, %v2094_v57 }
 0x4ff   :  { %v2128_v58 = vsel %vm1407_vm7, %v2112_v22, 0.0 }
 0x500   :  { %v2097_v23 = vrot.slane %v2096_v56, 4  ;;  %v2129_v16 = vadd.f32 %v2128_v58, %v2127_v55  ;;  %v1935_v62 = vpop.f32.mrf.mxu3 }
 0x502   :  { %v2098_v1 = vadd.f32 %v2097_v23, %v2096_v56  ;;  %v2130_v63 = vrot.slane %v2129_v16, 4 }
 0x504   :  { %v2099_v2 = vrot.slane %v2098_v1, 2  ;;  %v2131_v54 = vadd.f32 %v2130_v63, %v2129_v16 }
 0x506   :  { %v2100_v4 = vadd.f32 %v2099_v2, %v2098_v1  ;;  %v2132_v30 = vrot.slane %v2131_v54, 2 }
 0x508   :  { %v2101_v29 = vrot.slane %v2100_v4, 1  ;;  %v2133_v5 = vadd.f32 %v2132_v30, %v2131_v54 }
 0x50a   :  { %v2102_v6 = vadd.f32 %v2101_v29, %v2100_v4  ;;  %v2134_v28 = vrot.slane %v2133_v5, 1 }
 0x50c   :  { %v2103_v7 = vmul.f32 0.013888889, %v2102_v6  ;;  %v2135_v38 = vadd.f32 %v2134_v28, %v2133_v5 }
 0x50e   :  { %v2136_v45 = vmul.f32 0.013888889, %v2135_v38  ;;  %v2137_v50 = vmul.f32 %v2103_v7, %v2103_v7 }
 0x510   :  { %v2138_v31 = vsub.f32 %v2136_v45, %v2137_v50 }
 0x512   :  { %v2139_v10 = vmax.f32 %v2138_v31, 0.0 }
 0x514   :  { %v2141_v11 = vadd.f32 1e-05, %v2139_v10 }
 0x516   :  { %4536 = vrsqrt.f32 %v2141_v11  ;;  %vm2148_vm15 = vweird.f32 %v2141_v11 }
 0x51c   :  { %v4537_v43 = vpop.eup %4536 }
 0x51d   :  { %v2143_v60 = vmul.f32 %v4537_v43, %v2141_v11  ;;  %vm2149_vm14 = vweird.f32 %v4537_v43 }
 0x51e   :  { %vm2150_vm0 = vmor %vm2148_vm15, %vm2149_vm14 }
 0x51f   :  { %v2144_v41 = vmul.f32 %v4537_v43, %v2143_v60 }
 0x521   :  { %v2145_v37 = vmul.f32 0.5, %v2144_v41 }
 0x523   :  { %v2146_v36 = vsub.f32 1.5, %v2145_v37  ;;  %v2250_v37 = vpop.permute.xlu1 %2249 }
 0x525   :  { %v2147_v17 = vmul.f32 %v4537_v43, %v2146_v36 }
 0x527   :  { %v2151_v12 = vsel %vm2150_vm0, %v4537_v43, %v2147_v17 }
 0x528   :  { %v2152_v35 = vmul.f32 %v2151_v12, %v2140_v13 }
 0x52a   :  { %v2154_v46 = vmul.f32 %v2152_v35, %v2103_v7  ;;  %v2157_v15 = vperm.slane %v2152_v35, 0 }
 0x52c   :  { %v2155_v59 = vsub.f32 %v2153_v44, %v2154_v46  ;;  %v2167_v47 = vmul.f32 %v2157_v15, %v2079_v32  ;;  %v2159_v57 = vmul.f32 %v2157_v15, %v5469_v52  ;;  %v2160_v22 = vmul.f32 %v2157_v15, %v5467_v20 }
 0x52d   :  { %v2161_v55 = vmul.f32 %v2157_v15, %v5471_v42  ;;  %v2162_v56 = vmul.f32 %v2157_v15, %v5475_v48  ;;  %v2163_v19 = vmul.f32 %v2157_v15, %v5483_v26  ;;  %v2164_v58 = vmul.f32 %v2157_v15, %v5492_v61 }
 0x52e   :  { %v2169_v49 = vperm.slane %v2155_v59, 0  ;;  %v2165_v23 = vmul.f32 %v2157_v15, %v5500_v51  ;;  %v2166_v16 = vmul.f32 %v2157_v15, %v5507_v40  ;;  %v2255_v59 = vpop.permute.xlu2 %2254 }
 0x530   :  { %v2179_v62 = vadd.f32 %v2169_v49, %v2167_v47  ;;  %v2171_v1 = vadd.f32 %v2169_v49, %v2159_v57  ;;  %v2172_v32 = vadd.f32 %v2169_v49, %v2160_v22  ;;  %v2173_v63 = vadd.f32 %v2169_v49, %v2161_v55 }
 0x531   :  { %v2174_v52 = vadd.f32 %v2169_v49, %v2162_v56  ;;  %v2175_v2 = vadd.f32 %v2169_v49, %v2163_v19  ;;  %v2176_v54 = vadd.f32 %v2169_v49, %v2164_v58  ;;  %v2177_v20 = vadd.f32 %v2169_v49, %v2165_v23 }
 0x532   :  { %v2188_v4 = vmul.f32 0.1, %v2179_v62  ;;  %v2180_v42 = vmul.f32 0.1, %v2171_v1  ;;  %v2181_v30 = vmul.f32 0.1, %v2172_v32  ;;  %v2178_v48 = vadd.f32 %v2169_v49, %v2166_v16 }
 0x533   :  { %v2182_v29 = vmul.f32 0.1, %v2173_v63  ;;  %v2183_v26 = vmul.f32 0.1, %v2174_v52  ;;  %v2184_v5 = vmul.f32 0.1, %v2175_v2 }
 0x534   :  { %v2197_v61 = vmax.f32 %v2179_v62, %v2188_v4  ;;  %v2189_v6 = vmax.f32 %v2171_v1, %v2180_v42  ;;  %v2190_v51 = vmax.f32 %v2172_v32, %v2181_v30  ;;  %v2185_v28 = vmul.f32 0.1, %v2176_v54  ;;  %v2265_v62 = vpop.permute.xlu1 %2264 }
 0x535   :  { %v2191_v40 = vmax.f32 %v2173_v63, %v2182_v29  ;;  %v2192_v7 = vmax.f32 %v2174_v52, %v2183_v26  ;;  %v2186_v38 = vmul.f32 0.1, %v2177_v20  ;;  %v2187_v45 = vmul.f32 0.1, %v2178_v48 }
 0x536   :  { %v2206_v50 = vadd.f32 %v2197_v61, %v5359_v8  ;;  %v2198_v31 = vadd.f32 %v2189_v6, %v5322_v18  ;;  %v2199_v10 = vadd.f32 %v2190_v51, %v5324_v21  ;;  %v2193_v11 = vmax.f32 %v2175_v2, %v2184_v5 }
 0x537   :  { %v2200_v39 = vadd.f32 %v2191_v40, %v5331_v33  ;;  %v2194_v9 = vmax.f32 %v2176_v54, %v2185_v28  ;;  %v2195_v14 = vmax.f32 %v2177_v20, %v2186_v38  ;;  %v2201_v34 = vadd.f32 %v2192_v7, %v5333_v53  ;;  %v2245_v53 = vpop.permute.xlu0 %2244 }
 0x538   :  { %2226 = vst.msk [vmem:[#allocation5 + $0x48] sm:$0xff] %vm1407_vm7, %v2206_v50  ;;  %v2196_v43 = vmax.f32 %v2178_v48, %v2187_v45  ;;  %v2202_v60 = vadd.f32 %v2193_v11, %v5343_v24 }
 0x539   :  { %2218 = vst.msk [vmem:[#allocation5 + $0x8] sm:$0xff] %vm1407_vm7, %v2198_v31  ;;  %v2203_v18 = vadd.f32 %v2194_v9, %v5345_v0  ;;  %v2204_v21 = vadd.f32 %v2195_v14, %v5352_v3 }
 0x53a   :  { %2219 = vst.msk [vmem:[#allocation5 + $0x10] sm:$0xff] %vm1407_vm7, %v2199_v10  ;;  %v2205_v33 = vadd.f32 %v2196_v43, %v5354_v27 }
 0x53b   :  { %2220 = vst.msk [vmem:[#allocation5 + $0x18] sm:$0xff] %vm1407_vm7, %v2200_v39 }
 0x53c   :  { %2221 = vst.msk [vmem:[#allocation5 + $0x20] sm:$0xff] %vm1407_vm7, %v2201_v34 }
 0x53d   :  { %2222 = vst.msk [vmem:[#allocation5 + $0x28] sm:$0xff] %vm1407_vm7, %v2202_v60 }
 0x53e   :  { %2223 = vst.msk [vmem:[#allocation5 + $0x30] sm:$0xff] %vm1407_vm7, %v2203_v18 }
 0x53f   :  { %2224 = vst.msk [vmem:[#allocation5 + $0x38] sm:$0xff] %vm1407_vm7, %v2204_v21  ;;  %v2260_v47 = vpop.permute.xlu0 %2259  ;;  %v2288_v1 = vld [vmem:[#allocation5 + $0x48] ss:$2 sm:$0xf] }
 0x540   :  { %2225 = vst.msk [vmem:[#allocation5 + $0x40] sm:$0xff] %vm1407_vm7, %v2205_v33  ;;  %v2394_v32 = vld [vmem:[#allocation5 + $0x49] ss:$2 sm:$0xf]  ;;  %v2291_v52 = vpack.c.bf16 %v2288_v1, %v2288_v1 }
 0x541   :  { %v2280_v24 = vld [vmem:[#allocation5 + $0x8] ss:$2 sm:$0xff]  ;;  %v2386_v8 = vld [vmem:[#allocation5 + $0x9] ss:$2 sm:$0xff]  ;;  %v2397_v2 = vpack.c.bf16 %v2394_v32, %v2394_v32 }
 0x542   :  { %v2228_v0 = vld [vmem:[#allocation5 + $0x7] ss:$2 sm:$0xff] }
 0x543   :  { %v2267_v41 = vmul.f32 %v2245_v53, %v2228_v0  ;;  %v2282_v36 = vld [vmem:[#allocation5 + $0x18] ss:$2 sm:$0xff]  ;;  %v2388_v3 = vld [vmem:[#allocation5 + $0x19] ss:$2 sm:$0xff] }
 0x544   :  { %v2230_v13 = vld [vmem:[#allocation5 + $0x17] ss:$2 sm:$0xff]  ;;  %v2289_v17 = vpack.c.bf16 %v2282_v36, %v2280_v24  ;;  %v2395_v12 = vpack.c.bf16 %v2388_v3, %v2386_v8 }
 0x545   :  { %v2268_v27 = vmul.f32 %v2250_v37, %v2230_v13  ;;  %v2232_v44 = vld [vmem:[#allocation5 + $0x27] ss:$2 sm:$0xff]  ;;  %v2284_v15 = vld [vmem:[#allocation5 + $0x28] ss:$2 sm:$0xff] }
 0x546   :  { %4169 = vmatmul.msk.bf16.vlgmr.msrb.gmra.mxu1 %vm1407_vm7, %v2289_v17  ;;  %4195 = vmatmul.msk.bf16.vlgmr.msrb.gmra.mxu3 %vm1407_vm7, %v2395_v12  ;;  %v2390_v49 = vld [vmem:[#allocation5 + $0x29] ss:$2 sm:$0xff]  ;;  %v2269_v55 = vmul.f32 %v2255_v59, %v2232_v44 }
 0x547   :  { %v2272_v35 = vpack.c.bf16 %v2268_v27, %v2267_v41  ;;  %v2234_v46 = vld [vmem:[#allocation5 + $0x37] ss:$2 sm:$0xff]  ;;  %v2286_v57 = vld [vmem:[#allocation5 + $0x38] ss:$2 sm:$0xff] }
 0x548   :  { %v2392_v22 = vld [vmem:[#allocation5 + $0x39] ss:$2 sm:$0xff]  ;;  %v2270_v56 = vmul.f32 %v2260_v47, %v2234_v46  ;;  %v2290_v19 = vpack.c.bf16 %v2286_v57, %v2284_v15 }
 0x549   :  { %4180 = vmatmul.msk.bf16.vlgmr.msra.gmra.mxu2 %vm1407_vm7, %v2272_v35  ;;  %v2396_v58 = vpack.c.bf16 %v2392_v22, %v2390_v49  ;;  %v2236_v16 = vld [vmem:[#allocation5 + $0x47] ss:$2 sm:$0xf] }
 0x54a   :  { %v2273_v23 = vpack.c.bf16 %v2270_v56, %v2269_v55  ;;  %v2271_v63 = vmul.f32 %v2265_v62, %v2236_v16 }
 0x54c   :  { %v2274_v54 = vpack.c.bf16 %v2271_v63, %v2271_v63 }
 0x556   :  { %4170 = vmatmul.msk.bf16.gmra.mxu1 %vm1407_vm7, %v2290_v19  ;;  %4196 = vmatmul.msk.bf16.gmra.mxu3 %vm1407_vm7, %v2396_v58 }
 0x559   :  { %4181 = vmatmul.msk.bf16.gmra.mxu2 %vm1407_vm7, %v2273_v23 }
 0x566   :  { %4171 = vmatmul.msk.bf16.gmra.mxu1 %vm1407_vm7, %v2291_v52  ;;  %4197 = vmatmul.msk.bf16.gmra.mxu3 %vm1407_vm7, %v2397_v2 }
 0x569   :  { %4182 = vmatmul.msk.bf16.gmra.mxu2 %vm1407_vm7, %v2274_v54 }
 0x5c3   :  { %v2327_v20 = vpop.f32.mrf.mxu1 }
 0x5c9   :  { %v2433_v4 = vpop.f32.mrf.mxu3 }
 0x5cb   :  { %v2329_v42 = vpop.f32.mrf.mxu1 }
 0x5cc   :  { %v2371_v30 = vpop.f32.mrf.mxu2 }
 0x5cd   :  { %v2372_v28 = vadd.f32 %v2371_v30, %v2327_v20 }
 0x5cf   :  { %v5584_v25 = vadd.f32 %v2433_v4, %v2372_v28 }
 0x5d1   :  { %v2435_v48 = vpop.f32.mrf.mxu3  ;;  %v2470_v9 = vmul.f32 %v5584_v25, %v5584_v25  ;;  %v2453_v60 = vsel %vm2452_vm1, %v5584_v25, 0.0 }
 0x5d3   :  { %v2332_v29 = vpop.f32.mrf.mxu1  ;;  %v2475_v0 = vsel %vm2452_vm1, %v2470_v9, 0.0  ;;  %v2507_v9 = vld [vmem:[%s4028_s27] sm:$0x1]  ;;  %s4049_s27 = sld [smem:[%s5988_s0 + %s4595_s24]]  }
 0x5d4   :  { %v2373_v26 = vpop.f32.mrf.mxu2 }
 0x5d5   :  { %v2374_v51 = vadd.f32 %v2373_v26, %v2329_v42  ;;  %v4440_v42 = vld [vmem:[%s4029_s19 + $0x18] sm:$0xff] }
 0x5d6   :  { %2584 = vmatpush.bf16.msra.mxu1 %v4440_v42 }
 0x5d7   :  { %v5582_v38 = vadd.f32 %v2435_v48, %v2374_v51 }
 0x5d9   :  { %v2438_v5 = vpop.f32.mrf.mxu3  ;;  %v2471_v11 = vmul.f32 %v5582_v38, %v5582_v38  ;;  %v2454_v14 = vsel %vm2452_vm1, %v5582_v38, 0.0 }
 0x5da   :  { %v2455_v53 = vadd.f32 %v2454_v14, %v2453_v60 }
 0x5db   :  { %v2334_v61 = vpop.f32.mrf.mxu1  ;;  %v2476_v18 = vsel %vm2452_vm1, %v2471_v11, 0.0 }
 0x5dc   :  { %v2376_v6 = vpop.f32.mrf.mxu2  ;;  %v2477_v3 = vadd.f32 %v2476_v18, %v2475_v0 }
 0x5dd   :  { %v2377_v40 = vadd.f32 %v2376_v6, %v2332_v29  ;;  %v4439_v29 = vld [vmem:[%s4029_s19 + $0x10] sm:$0xff] }
 0x5de   :  { %2585 = vmatpush.bf16.msra.mxu1 %v4439_v29 }
 0x5df   :  { %v5586_v31 = vadd.f32 %v2438_v5, %v2377_v40  ;;  %v4438_v5 = vld [vmem:[%s4029_s19 + $0x8] sm:$0xff] }
 0x5e1   :  { %v2440_v7 = vpop.f32.mrf.mxu3  ;;  %v2472_v34 = vmul.f32 %v5586_v31, %v5586_v31  ;;  %v2456_v21 = vsel %vm2452_vm1, %v5586_v31, 0.0 }
 0x5e2   :  { %v2457_v13 = vadd.f32 %v2456_v21, %v2455_v53  ;;  %2586 = vmatpush.bf16.msra.mxu1 %v4438_v5 }
 0x5e3   :  { %v2337_v45 = vpop.f32.mrf.mxu1  ;;  %v2478_v41 = vsel %vm2452_vm1, %v2472_v34, 0.0 }
 0x5e4   :  { %v2378_v50 = vpop.f32.mrf.mxu2  ;;  %v2479_v27 = vadd.f32 %v2478_v41, %v2477_v3 }
 0x5e5   :  { %v2379_v10 = vadd.f32 %v2378_v50, %v2334_v61  ;;  %v4437_v61 = vld [vmem:[%s4029_s19] sm:$0xff]  ;;  %s5938_s19 = sld [smem:[%s5988_s0 + %s4593_s16]]  }
 0x5e6   :  { %2587 = vmatpush.bf16.msra.mxu1 %v4437_v61 }
 0x5e7   :  { %v5590_v39 = vadd.f32 %v2440_v7, %v2379_v10 }
 0x5e9   :  { %v2443_v43 = vpop.f32.mrf.mxu3  ;;  %v2473_v33 = vmul.f32 %v5590_v39, %v5590_v39  ;;  %v2458_v37 = vsel %vm2452_vm1, %v5590_v39, 0.0 }
 0x5ea   :  { %v2459_v35 = vadd.f32 %v2458_v37, %v2457_v13 }
 0x5eb   :  { %v2339_v24 = vpop.f32.mrf.mxu1  ;;  %v2480_v17 = vsel %vm2452_vm1, %v2473_v33, 0.0 }
 0x5ec   :  { %v2381_v8 = vpop.f32.mrf.mxu2  ;;  %v2481_v15 = vadd.f32 %v2480_v17, %v2479_v27 }
 0x5ed   :  { %v2382_v36 = vadd.f32 %v2381_v8, %v2337_v45  ;;  %v2494_v45 = vld [vmem:[%s4027_s23] sm:$0x1]  ;;  %s4048_s23 = sld [smem:[%s5988_s0 + %s4594_s20]]  }
 0x5ef   :  { %v5610_v12 = vadd.f32 %v2443_v43, %v2382_v36 }
 0x5f1   :  { %v2461_v44 = vsel %vm2460_vm2, %v5610_v12, 0.0  ;;  %v2474_v46 = vmul.f32 %v5610_v12, %v5610_v12  ;;  %v2445_v47 = vpop.f32.mrf.mxu3 }
 0x5f2   :  { %v2462_v59 = vadd.f32 %v2461_v44, %v2459_v35  ;;  %v4446_v47 = vld [vmem:[%s5653_s1 + $0x28] sm:$0xff] }
 0x5f3   :  { %v2482_v57 = vsel %vm2460_vm2, %v2474_v46, 0.0  ;;  %2921 = vmatpush.bf16.msrb.mxu0 %v4446_v47 }
 0x5f4   :  { %v2463_v49 = vrot.slane %v2462_v59, 4  ;;  %v2483_v22 = vadd.f32 %v2482_v57, %v2481_v15  ;;  %v2383_v55 = vpop.f32.mrf.mxu2 }
 0x5f6   :  { %v2464_v56 = vadd.f32 %v2463_v49, %v2462_v59  ;;  %v2484_v19 = vrot.slane %v2483_v22, 4 }
 0x5f8   :  { %v2465_v58 = vrot.slane %v2464_v56, 2  ;;  %v2485_v23 = vadd.f32 %v2484_v19, %v2483_v22 }
 0x5fa   :  { %v2466_v16 = vadd.f32 %v2465_v58, %v2464_v56  ;;  %v2486_v62 = vrot.slane %v2485_v23, 2 }
 0x5fc   :  { %v2467_v1 = vrot.slane %v2466_v16, 1  ;;  %v2487_v32 = vadd.f32 %v2486_v62, %v2485_v23 }
 0x5fe   :  { %v2468_v63 = vadd.f32 %v2467_v1, %v2466_v16  ;;  %v2488_v52 = vrot.slane %v2487_v32, 1 }
 0x600   :  { %v2469_v2 = vmul.f32 0.027777778, %v2468_v63  ;;  %v2489_v54 = vadd.f32 %v2488_v52, %v2487_v32 }
 0x602   :  { %v2490_v20 = vmul.f32 0.027777778, %v2489_v54  ;;  %v2491_v4 = vmul.f32 %v2469_v2, %v2469_v2 }
 0x604   :  { %v2492_v30 = vsub.f32 %v2490_v20, %v2491_v4 }
 0x606   :  { %v2493_v48 = vmax.f32 %v2492_v30, 0.0 }
 0x608   :  { %v2495_v26 = vadd.f32 1e-05, %v2493_v48 }
 0x60a   :  { %4538 = vrsqrt.f32 %v2495_v26  ;;  %vm2502_vm4 = vweird.f32 %v2495_v26 }
 0x610   :  { %v4539_v6 = vpop.eup %4538 }
 0x611   :  { %v2497_v51 = vmul.f32 %v4539_v6, %v2495_v26  ;;  %vm2503_vm3 = vweird.f32 %v4539_v6 }
 0x612   :  { %vm2504_vm5 = vmor %vm2502_vm4, %vm2503_vm3 }
 0x613   :  { %v2498_v28 = vmul.f32 %v4539_v6, %v2497_v51 }
 0x615   :  { %v2499_v40 = vmul.f32 0.5, %v2498_v28 }
 0x617   :  { %v2500_v7 = vsub.f32 1.5, %v2499_v40 }
 0x619   :  { %v2501_v50 = vmul.f32 %v4539_v6, %v2500_v7 }
 0x61b   :  { %v2505_v10 = vsel %vm2504_vm5, %v4539_v6, %v2501_v50 }
 0x61c   :  { %v2506_v11 = vmul.f32 %v2505_v10, %v2494_v45 }
 0x61e   :  { %v2508_v14 = vmul.f32 %v2506_v11, %v2469_v2  ;;  %v2511_v34 = vperm.slane %v2506_v11, 0 }
 0x620   :  { %v2509_v43 = vsub.f32 %v2507_v9, %v2508_v14  ;;  %v2513_v18 = vmul.f32 %v2511_v34, %v5584_v25  ;;  %v2514_v21 = vmul.f32 %v2511_v34, %v5582_v38  ;;  %v2515_v36 = vmul.f32 %v2511_v34, %v5586_v31 }
 0x621   :  { %v2516_v3 = vmul.f32 %v2511_v34, %v5590_v39  ;;  %v2517_v46 = vmul.f32 %v2511_v34, %v5610_v12 }
 0x622   :  { %v2519_v60 = vperm.slane %v2509_v43, 0 }
 0x624   :  { %v2521_v33 = vadd.f32 %v2519_v60, %v2513_v18  ;;  %v2522_v53 = vadd.f32 %v2519_v60, %v2514_v21  ;;  %v2523_v25 = vadd.f32 %v2519_v60, %v2515_v36  ;;  %v2524_v13 = vadd.f32 %v2519_v60, %v2516_v3  ;;  %v4444_v36 = vld [vmem:[%s5653_s1 + $0x18] sm:$0xff]  ;;  %v4442_v3 = vld [vmem:[%s5653_s1 + $0x8] sm:$0xff] }
 0x625   :  { %v2525_v15 = vadd.f32 %v2519_v60, %v2517_v46  ;;  %2785 = vmatpush.bf16.msrb.mxu2 %v4444_v36  ;;  %2829 = vmatpush.bf16.msra.mxu3 %v4442_v3 }
 0x626   :  { %v2526_v24 = vmul.f32 0.1, %v2521_v33  ;;  %v2527_v8 = vmul.f32 0.1, %v2522_v53  ;;  %v2528_v38 = vmul.f32 0.1, %v2523_v25 }
 0x627   :  { %v2529_v17 = vmul.f32 0.1, %v2524_v13  ;;  %v2530_v59 = vmul.f32 0.1, %v2525_v15 }
 0x628   :  { %v5628_v0 = vmax.f32 %v2521_v33, %v2526_v24  ;;  %v5630_v41 = vmax.f32 %v2522_v53, %v2527_v8  ;;  %v5637_v27 = vmax.f32 %v2523_v25, %v2528_v38  ;;  %v4445_v25 = vld [vmem:[%s5653_s1 + $0x20] sm:$0xff]  ;;  %v4443_v38 = vld [vmem:[%s5653_s1 + $0x10] sm:$0xff] }
 0x629   :  { %v5639_v35 = vmax.f32 %v2524_v13, %v2529_v17  ;;  %v5645_v31 = vmax.f32 %v2525_v15, %v2530_v59  ;;  %v4441_v17 = vld [vmem:[%s5653_s1] sm:$0xff]  ;;  %2922 = vmatpush.bf16.msrb.mxu0 %v4445_v25  ;;  %2786 = vmatpush.bf16.msrb.mxu2 %v4443_v38  ;;  %s4051_s1 = sld [smem:[%s5988_s0 + %s4596_s28]]  }
 0x62a   :  { %v2536_v37 = vpack.c.bf16 %v5630_v41, %v5628_v0  ;;  %2830 = vmatpush.bf16.msra.mxu3 %v4441_v17 }
 0x62b   :  { %v2537_v44 = vpack.c.bf16 %v5639_v35, %v5637_v27  ;;  %v2538_v39 = vpack.c.bf16 %v5645_v31, %v5645_v31 }
 0x62c   :  { %4214 = vmatmul.msk.bf16.vlgmr.msra.gmra.mxu1 %vm2452_vm1, %v2536_v37 }
 0x63c   :  { %4215 = vmatmul.msk.bf16.gmra.mxu1 %vm2452_vm1, %v2537_v44 }
 0x64c   :  { %4216 = vmatmul.msk.bf16.gmra.mxu1 %vm2452_vm1, %v2538_v39  ;;  %v2644_v39 = vld [vmem:[%s4030_s5] sm:$0x1]  ;;  %s4052_s5 = sld [smem:[%s5988_s0 + %s4597_s2]]  }
 0x6a9   :  { %v5656_v12 = vpop.f32.mrf.mxu1 }
 0x6aa   :  { %v2620_v56 = vmul.f32 %v5656_v12, %v5656_v12  ;;  %v2603_v23 = vsel %vm1407_vm7, %v5656_v12, 0.0 }
 0x6ac   :  { %v2625_v63 = vsel %vm1407_vm7, %v2620_v56, 0.0 }
 0x6b1   :  { %v5658_v57 = vpop.f32.mrf.mxu1 }
 0x6b2   :  { %v2621_v22 = vmul.f32 %v5658_v57, %v5658_v57  ;;  %v2604_v19 = vsel %vm1407_vm7, %v5658_v57, 0.0 }
 0x6b3   :  { %v2605_v32 = vadd.f32 %v2604_v19, %v2603_v23  ;;  %v2657_v19 = vld [vmem:[%s4031_s9] sm:$0x1] }
 0x6b4   :  { %v2626_v16 = vsel %vm1407_vm7, %v2621_v22, 0.0 }
 0x6b5   :  { %v2627_v54 = vadd.f32 %v2626_v16, %v2625_v63 }
 0x6b9   :  { %v5660_v49 = vpop.f32.mrf.mxu1 }
 0x6ba   :  { %v2622_v58 = vmul.f32 %v5660_v49, %v5660_v49  ;;  %v2606_v62 = vsel %vm1407_vm7, %v5660_v49, 0.0 }
 0x6bb   :  { %v2607_v20 = vadd.f32 %v2606_v62, %v2605_v32 }
 0x6bc   :  { %v2628_v52 = vsel %vm1407_vm7, %v2622_v58, 0.0 }
 0x6bd   :  { %v2629_v42 = vadd.f32 %v2628_v52, %v2627_v54 }
 0x6c1   :  { %v5664_v55 = vpop.f32.mrf.mxu1 }
 0x6c2   :  { %v2623_v1 = vmul.f32 %v5664_v55, %v5664_v55  ;;  %v2608_v2 = vsel %vm1407_vm7, %v5664_v55, 0.0 }
 0x6c3   :  { %v2609_v30 = vadd.f32 %v2608_v2, %v2607_v20 }
 0x6c4   :  { %v2630_v4 = vsel %vm1407_vm7, %v2623_v1, 0.0 }
 0x6c5   :  { %v2631_v5 = vadd.f32 %v2630_v4, %v2629_v42 }
 0x6c9   :  { %v2599_v48 = vpop.f32.mrf.mxu1 }
 0x6ca   :  { %v2611_v29 = vsel %vm2610_vm6, %v2599_v48, 0.0  ;;  %v2624_v26 = vmul.f32 %v2599_v48, %v2599_v48 }
 0x6cb   :  { %v2612_v61 = vadd.f32 %v2611_v29, %v2609_v30 }
 0x6cc   :  { %v2632_v6 = vsel %vm2610_vm6, %v2624_v26, 0.0 }
 0x6cd   :  { %v2613_v51 = vrot.slane %v2612_v61, 4  ;;  %v2633_v28 = vadd.f32 %v2632_v6, %v2631_v5 }
 0x6cf   :  { %v2614_v40 = vadd.f32 %v2613_v51, %v2612_v61  ;;  %v2634_v7 = vrot.slane %v2633_v28, 4 }
 0x6d1   :  { %v2615_v45 = vrot.slane %v2614_v40, 2  ;;  %v2635_v50 = vadd.f32 %v2634_v7, %v2633_v28  ;;  %v2601_v10 = vpop.f32.mrf.mxu1 }
 0x6d3   :  { %v2616_v11 = vadd.f32 %v2615_v45, %v2614_v40  ;;  %v2636_v9 = vrot.slane %v2635_v50, 2  ;;  %v2859_v45 = vpop.permute.xlu1 %2858 }
 0x6d5   :  { %v2617_v14 = vrot.slane %v2616_v11, 1  ;;  %v2637_v34 = vadd.f32 %v2636_v9, %v2635_v50 }
 0x6d7   :  { %v2618_v43 = vadd.f32 %v2617_v14, %v2616_v11  ;;  %v2638_v60 = vrot.slane %v2637_v34, 1 }
 0x6d9   :  { %v2619_v18 = vmul.f32 0.027777778, %v2618_v43  ;;  %v2639_v21 = vadd.f32 %v2638_v60, %v2637_v34 }
 0x6db   :  { %v2640_v33 = vmul.f32 0.027777778, %v2639_v21  ;;  %v2641_v53 = vmul.f32 %v2619_v18, %v2619_v18  ;;  %v2726_v25 = vpop.permute.xlu1 %2725 }
 0x6dd   :  { %v2642_v24 = vsub.f32 %v2640_v33, %v2641_v53 }
 0x6df   :  { %v2643_v8 = vmax.f32 %v2642_v24, 0.0 }
 0x6e1   :  { %v2645_v37 = vadd.f32 1e-05, %v2643_v8 }
 0x6e3   :  { %4540 = vrsqrt.f32 %v2645_v37  ;;  %vm2652_vm9 = vweird.f32 %v2645_v37 }
 0x6e9   :  { %v4541_v13 = vpop.eup %4540 }
 0x6ea   :  { %v2647_v44 = vmul.f32 %v4541_v13, %v2645_v37  ;;  %vm2653_vm8 = vweird.f32 %v4541_v13 }
 0x6eb   :  { %vm2654_vm10 = vmor %vm2652_vm9, %vm2653_vm8  ;;  %vm3997_vm8 = vcmask 7168   ;;  %vm4002_vm9 = vcmask 3072  }
 0x6ec   :  { %v2648_v46 = vmul.f32 %v4541_v13, %v2647_v44 }
 0x6ee   :  { %v2649_v15 = vmul.f32 0.5, %v2648_v46 }
 0x6f0   :  { %v2650_v59 = vsub.f32 1.5, %v2649_v15 }
 0x6f2   :  { %v2651_v47 = vmul.f32 %v4541_v13, %v2650_v59 }
 0x6f4   :  { %v2655_v22 = vsel %vm2654_vm10, %v4541_v13, %v2651_v47 }
 0x6f5   :  { %v2656_v56 = vmul.f32 %v2655_v22, %v2644_v39 }
 0x6f7   :  { %v2658_v58 = vmul.f32 %v2656_v56, %v2619_v18  ;;  %v2661_v23 = vperm.slane %v2656_v56, 0 }
 0x6f9   :  { %v2659_v16 = vsub.f32 %v2657_v19, %v2658_v58  ;;  %v2663_v62 = vmul.f32 %v2661_v23, %v5656_v12  ;;  %v2664_v1 = vmul.f32 %v2661_v23, %v5658_v57  ;;  %v2665_v32 = vmul.f32 %v2661_v23, %v5660_v49  ;;  %v2711_v57 = vpop.permute.xlu2 %2710 }
 0x6fa   :  { %v2666_v63 = vmul.f32 %v2661_v23, %v5664_v55  ;;  %v2667_v2 = vmul.f32 %v2661_v23, %v2599_v48  ;;  %v2716_v55 = vpop.permute.xlu0 %2715  ;;  %v2731_v23 = vpop.permute.xlu1 %2730 }
 0x6fb   :  { %v2669_v52 = vperm.slane %v2659_v16, 0 }
 0x6fd   :  { %v2671_v54 = vadd.f32 %v2669_v52, %v2663_v62  ;;  %v2672_v20 = vadd.f32 %v2669_v52, %v2664_v1  ;;  %v2673_v4 = vadd.f32 %v2669_v52, %v2665_v32  ;;  %v2674_v42 = vadd.f32 %v2669_v52, %v2666_v63 }
 0x6fe   :  { %v2675_v30 = vadd.f32 %v2669_v52, %v2667_v2 }
 0x6ff   :  { %v2676_v29 = vmul.f32 0.1, %v2671_v54  ;;  %v2677_v26 = vmul.f32 0.1, %v2672_v20  ;;  %v2678_v5 = vmul.f32 0.1, %v2673_v4 }
 0x700   :  { %v2679_v61 = vmul.f32 0.1, %v2674_v42  ;;  %v2680_v6 = vmul.f32 0.1, %v2675_v30 }
 0x701   :  { %v2681_v51 = vmax.f32 %v2671_v54, %v2676_v29  ;;  %v2682_v12 = vmax.f32 %v2672_v20, %v2677_v26  ;;  %v2683_v28 = vmax.f32 %v2673_v4, %v2678_v5  ;;  %v2864_v14 = vpop.permute.xlu2 %2863 }
 0x702   :  { %v2684_v40 = vmax.f32 %v2674_v42, %v2679_v61  ;;  %v2685_v49 = vmax.f32 %v2675_v30, %v2680_v6  ;;  %v2721_v24 = vpop.permute.xlu0 %2720 }
 0x703   :  { %2693 = vst.msk [vmem:[#allocation6 + $0x8] sm:$0xff] %vm1407_vm7, %v2681_v51 }
 0x704   :  { %2694 = vst.msk [vmem:[#allocation6 + $0x10] sm:$0xff] %vm1407_vm7, %v2682_v12 }
 0x705   :  { %2695 = vst.msk [vmem:[#allocation6 + $0x18] sm:$0xff] %vm1407_vm7, %v2683_v28 }
 0x706   :  { %2696 = vst.msk [vmem:[#allocation6 + $0x20] sm:$0xff] %vm1407_vm7, %v2684_v40 }
 0x707   :  { %2697 = vst.msk [vmem:[#allocation6 + $0x28] sm:$0xf] %vm2610_vm6, %v2685_v49 }
 0x709   :  { %v2869_v17 = vpop.permute.xlu2 %2868 }
 0x70a   :  { %v2745_v48 = vld [vmem:[#allocation6 + $0x8] sm:$0xff]  ;;  %v2874_v44 = vpop.permute.xlu0 %2873 }
 0x70b   :  { %v2698_v7 = vld [vmem:[#allocation6 + $0x7] sm:$0xff]  ;;  %v2746_v50 = vld [vmem:[#allocation6 + $0x10] sm:$0xff] }
 0x70c   :  { %v2699_v10 = vld [vmem:[#allocation6 + $0xf] sm:$0xff]  ;;  %v2733_v11 = vmul.f32 %v2711_v57, %v2698_v7  ;;  %v2750_v34 = vpack.c.bf16 %v2746_v50, %v2745_v48  ;;  %v2700_v8 = vld [vmem:[#allocation6 + $0x17] sm:$0xff] }
 0x70d   :  { %v2846_v9 = vld [vmem:[#allocation6 + $0x9] sm:$0xff]  ;;  %v2734_v43 = vmul.f32 %v2716_v55, %v2699_v10  ;;  %v2847_v60 = vld [vmem:[#allocation6 + $0x11] sm:$0xff]  ;;  %v2701_v37 = vld [vmem:[#allocation6 + $0x1f] sm:$0xff]  ;;  %v2735_v46 = vmul.f32 %v2721_v24, %v2700_v8 }
 0x70e   :  { %v2881_v18 = vmul.f32 %v2859_v45, %v2846_v9  ;;  %v2882_v21 = vmul.f32 %v2864_v14, %v2847_v60  ;;  %4229 = vmatmul.msk.bf16.vlgmr.msrb.gmra.mxu2 %vm1407_vm7, %v2750_v34  ;;  %v2848_v36 = vld [vmem:[#allocation6 + $0x19] sm:$0xff]  ;;  %v2849_v3 = vld [vmem:[#allocation6 + $0x21] sm:$0xff]  ;;  %v2736_v15 = vmul.f32 %v2726_v25, %v2701_v37  ;;  %v2850_v58 = vld [vmem:[#allocation6 + $0x29] sm:$0xf] }
 0x70f   :  { %v2738_v33 = vpack.c.bf16 %v2734_v43, %v2733_v11  ;;  %v2747_v13 = vld [vmem:[#allocation6 + $0x18] sm:$0xff]  ;;  %v2748_v38 = vld [vmem:[#allocation6 + $0x20] sm:$0xff]  ;;  %v2883_v59 = vmul.f32 %v2869_v17, %v2848_v36  ;;  %v2884_v39 = vmul.f32 %v2874_v44, %v2849_v3  ;;  %v2749_v16 = vld [vmem:[#allocation6 + $0x28] sm:$0xf] }
 0x710   :  { %v2886_v53 = vpack.c.bf16 %v2882_v21, %v2881_v18  ;;  %v2751_v47 = vpack.c.bf16 %v2748_v38, %v2747_v13  ;;  %v2739_v22 = vpack.c.bf16 %v2736_v15, %v2735_v46  ;;  %v2702_v19 = vld [vmem:[#allocation6 + $0x27] sm:$0xf]  ;;  %v2752_v63 = vpack.c.bf16 %v2749_v16, %v2749_v16 }
 0x711   :  { %4240 = vmatmul.msk.bf16.vlgmr.msra.gmra.mxu3 %vm1407_vm7, %v2738_v33  ;;  %v2887_v56 = vpack.c.bf16 %v2884_v39, %v2883_v59  ;;  %v2879_v62 = vpop.permute.xlu2 %2878  ;;  %v2737_v1 = vmul.f32 %v2731_v23, %v2702_v19 }
 0x712   :  { %4255 = vmatmul.msk.bf16.vlgmr.msrb.gmra.mxu0 %vm1407_vm7, %v2886_v53  ;;  %v2885_v32 = vmul.f32 %v2879_v62, %v2850_v58 }
 0x713   :  { %v2740_v52 = vpack.c.bf16 %v2737_v1, %v2737_v1 }
 0x714   :  { %v2888_v2 = vpack.c.bf16 %v2885_v32, %v2885_v32 }
 0x71e   :  { %4230 = vmatmul.msk.bf16.gmra.mxu2 %vm1407_vm7, %v2751_v47 }
 0x721   :  { %4241 = vmatmul.msk.bf16.gmra.mxu3 %vm1407_vm7, %v2739_v22 }
 0x722   :  { %4256 = vmatmul.msk.bf16.gmra.mxu0 %vm1407_vm7, %v2887_v56 }
 0x72e   :  { %4231 = vmatmul.msk.bf16.gmra.mxu2 %vm1407_vm7, %v2752_v63 }
 0x731   :  { %4242 = vmatmul.msk.bf16.gmra.mxu3 %vm1407_vm7, %v2740_v52 }
 0x732   :  { %4257 = vmatmul.msk.bf16.gmra.mxu0 %vm1407_vm7, %v2888_v2 }
 0x78f   :  { %v2924_v54 = vpop.f32.mrf.mxu0 }
 0x791   :  { %v2788_v20 = vpop.f32.mrf.mxu2 }
 0x794   :  { %v2832_v4 = vpop.f32.mrf.mxu3 }
 0x795   :  { %v2833_v12 = vadd.f32 %v2832_v4, %v2788_v20 }
 0x797   :  { %v2926_v42 = vpop.f32.mrf.mxu0  ;;  %v5717_v55 = vadd.f32 %v2924_v54, %v2833_v12 }
 0x799   :  { %v2790_v30 = vpop.f32.mrf.mxu2  ;;  %v2959_v11 = vmul.f32 %v5717_v55, %v5717_v55  ;;  %v2943_v43 = vsel %vm2452_vm1, %v5717_v55, 0.0 }
 0x79b   :  { %v2964_v24 = vsel %vm2452_vm1, %v2959_v11, 0.0 }
 0x79c   :  { %v2834_v29 = vpop.f32.mrf.mxu3 }
 0x79d   :  { %v2835_v6 = vadd.f32 %v2834_v29, %v2790_v30 }
 0x79f   :  { %v2929_v26 = vpop.f32.mrf.mxu0  ;;  %v5715_v40 = vadd.f32 %v2926_v42, %v2835_v6 }
 0x7a1   :  { %v2793_v5 = vpop.f32.mrf.mxu2  ;;  %v2960_v45 = vmul.f32 %v5715_v40, %v5715_v40  ;;  %v2944_v9 = vsel %vm2452_vm1, %v5715_v40, 0.0 }
 0x7a2   :  { %v2945_v33 = vadd.f32 %v2944_v9, %v2943_v43  ;;  %v2983_v9 = vld [vmem:[%s4035_s17] sm:$0x1] }
 0x7a3   :  { %v2965_v60 = vsel %vm2452_vm1, %v2960_v45, 0.0 }
 0x7a4   :  { %v2837_v61 = vpop.f32.mrf.mxu3  ;;  %v2966_v3 = vadd.f32 %v2965_v60, %v2964_v24  ;;  %v2996_v60 = vld [vmem:[%s4036_s21] sm:$0x1] }
 0x7a5   :  { %v2838_v28 = vadd.f32 %v2837_v61, %v2793_v5  ;;  %v4450_v5 = vld [vmem:[%s4037_s13 + $0x18] sm:$0xff] }
 0x7a6   :  { %3078 = vmatpush.bf16.msrb.mxu1 %v4450_v5 }
 0x7a7   :  { %v2931_v51 = vpop.f32.mrf.mxu0  ;;  %v5719_v48 = vadd.f32 %v2929_v26, %v2838_v28  ;;  %v4448_v28 = vld [vmem:[%s4037_s13 + $0x8] sm:$0xff] }
 0x7a9   :  { %v2795_v57 = vpop.f32.mrf.mxu2  ;;  %v2961_v14 = vmul.f32 %v5719_v48, %v5719_v48  ;;  %v2946_v18 = vsel %vm2452_vm1, %v5719_v48, 0.0 }
 0x7aa   :  { %v2947_v25 = vadd.f32 %v2946_v18, %v2945_v33 }
 0x7ab   :  { %v2967_v8 = vsel %vm2452_vm1, %v2961_v14, 0.0 }
 0x7ac   :  { %v2839_v49 = vpop.f32.mrf.mxu3  ;;  %v2968_v44 = vadd.f32 %v2967_v8, %v2966_v3 }
 0x7ad   :  { %v2840_v7 = vadd.f32 %v2839_v49, %v2795_v57  ;;  %v4447_v57 = vld [vmem:[%s4037_s13] sm:$0xff] }
 0x7af   :  { %v5723_v50 = vadd.f32 %v2931_v51, %v2840_v7  ;;  %v2934_v10 = vpop.f32.mrf.mxu0  ;;  %v4449_v51 = vld [vmem:[%s4037_s13 + $0x10] sm:$0xff] }
 0x7b0   :  { %3079 = vmatpush.bf16.msrb.mxu1 %v4449_v51 }
 0x7b1   :  { %v2798_v34 = vpop.f32.mrf.mxu2  ;;  %v2962_v21 = vmul.f32 %v5723_v50, %v5723_v50  ;;  %v2948_v37 = vsel %vm2452_vm1, %v5723_v50, 0.0 }
 0x7b2   :  { %v2949_v46 = vadd.f32 %v2948_v37, %v2947_v25 }
 0x7b3   :  { %v2969_v13 = vsel %vm2452_vm1, %v2962_v21, 0.0 }
 0x7b4   :  { %v2842_v53 = vpop.f32.mrf.mxu3  ;;  %v2970_v39 = vadd.f32 %v2969_v13, %v2968_v44  ;;  %3080 = vmatpush.bf16.msrb.mxu1 %v4448_v28 }
 0x7b5   :  { %v2843_v36 = vadd.f32 %v2842_v53, %v2798_v34 }
 0x7b7   :  { %v5743_v38 = vadd.f32 %v2934_v10, %v2843_v36  ;;  %v2936_v17 = vpop.f32.mrf.mxu0 }
 0x7b8   :  { %3081 = vmatpush.bf16.msrb.mxu1 %v4447_v57 }
 0x7b9   :  { %v2950_v15 = vsel %vm2460_vm2, %v5743_v38, 0.0  ;;  %v2963_v59 = vmul.f32 %v5743_v38, %v5743_v38  ;;  %v2800_v22 = vpop.f32.mrf.mxu2 }
 0x7ba   :  { %v2951_v47 = vadd.f32 %v2950_v15, %v2949_v46 }
 0x7bb   :  { %v2971_v56 = vsel %vm2460_vm2, %v2963_v59, 0.0 }
 0x7bc   :  { %v2952_v19 = vrot.slane %v2951_v47, 4  ;;  %v2972_v58 = vadd.f32 %v2971_v56, %v2970_v39  ;;  %v2844_v23 = vpop.f32.mrf.mxu3 }
 0x7be   :  { %v2953_v16 = vadd.f32 %v2952_v19, %v2951_v47  ;;  %v2973_v62 = vrot.slane %v2972_v58, 4 }
 0x7c0   :  { %v2954_v1 = vrot.slane %v2953_v16, 2  ;;  %v2974_v32 = vadd.f32 %v2973_v62, %v2972_v58 }
 0x7c2   :  { %v2955_v63 = vadd.f32 %v2954_v1, %v2953_v16  ;;  %v2975_v52 = vrot.slane %v2974_v32, 2 }
 0x7c4   :  { %v2956_v2 = vrot.slane %v2955_v63, 1  ;;  %v2976_v54 = vadd.f32 %v2975_v52, %v2974_v32 }
 0x7c6   :  { %v2957_v20 = vadd.f32 %v2956_v2, %v2955_v63  ;;  %v2977_v4 = vrot.slane %v2976_v54, 1 }
 0x7c8   :  { %v2958_v42 = vmul.f32 0.027777778, %v2957_v20  ;;  %v2978_v30 = vadd.f32 %v2977_v4, %v2976_v54 }
 0x7ca   :  { %v2979_v29 = vmul.f32 0.027777778, %v2978_v30  ;;  %v2980_v26 = vmul.f32 %v2958_v42, %v2958_v42 }
 0x7cc   :  { %v2981_v61 = vsub.f32 %v2979_v29, %v2980_v26 }
 0x7ce   :  { %v2982_v6 = vmax.f32 %v2981_v61, 0.0 }
 0x7d0   :  { %v2984_v12 = vadd.f32 1e-05, %v2982_v6 }
 0x7d2   :  { %4542 = vrsqrt.f32 %v2984_v12  ;;  %vm2991_vm12 = vweird.f32 %v2984_v12 }
 0x7d8   :  { %v4543_v49 = vpop.eup %4542 }
 0x7d9   :  { %v2986_v7 = vmul.f32 %v4543_v49, %v2984_v12  ;;  %vm2992_vm11 = vweird.f32 %v4543_v49 }
 0x7da   :  { %vm2993_vm13 = vmor %vm2991_vm12, %vm2992_vm11 }
 0x7db   :  { %v2987_v45 = vmul.f32 %v4543_v49, %v2986_v7 }
 0x7dd   :  { %v2988_v10 = vmul.f32 0.5, %v2987_v45 }
 0x7df   :  { %v2989_v11 = vsub.f32 1.5, %v2988_v10 }
 0x7e1   :  { %v2990_v14 = vmul.f32 %v4543_v49, %v2989_v11 }
 0x7e3   :  { %v2994_v34 = vsel %vm2993_vm13, %v4543_v49, %v2990_v14 }
 0x7e4   :  { %v2995_v43 = vmul.f32 %v2994_v34, %v2983_v9 }
 0x7e6   :  { %v2997_v18 = vmul.f32 %v2995_v43, %v2958_v42  ;;  %v3000_v21 = vperm.slane %v2995_v43, 0 }
 0x7e8   :  { %v2998_v33 = vsub.f32 %v2996_v60, %v2997_v18  ;;  %v3002_v24 = vmul.f32 %v3000_v21, %v5717_v55  ;;  %v3003_v8 = vmul.f32 %v3000_v21, %v5715_v40  ;;  %v3004_v15 = vmul.f32 %v3000_v21, %v5719_v48 }
 0x7e9   :  { %v3005_v59 = vmul.f32 %v3000_v21, %v5723_v50  ;;  %v3006_v48 = vmul.f32 %v3000_v21, %v5743_v38 }
 0x7ea   :  { %v3008_v53 = vperm.slane %v2998_v33, 0 }
 0x7ec   :  { %v3010_v37 = vadd.f32 %v3008_v53, %v3002_v24  ;;  %v3011_v36 = vadd.f32 %v3008_v53, %v3003_v8  ;;  %v3012_v40 = vadd.f32 %v3008_v53, %v3004_v15  ;;  %v3013_v39 = vadd.f32 %v3008_v53, %v3005_v59 }
 0x7ed   :  { %v3014_v50 = vadd.f32 %v3008_v53, %v3006_v48 }
 0x7ee   :  { %v3015_v3 = vmul.f32 0.1, %v3010_v37  ;;  %v3016_v25 = vmul.f32 0.1, %v3011_v36  ;;  %v3017_v47 = vmul.f32 0.1, %v3012_v40 }
 0x7ef   :  { %v3018_v22 = vmul.f32 0.1, %v3013_v39  ;;  %v3019_v23 = vmul.f32 0.1, %v3014_v50 }
 0x7f0   :  { %v3020_v13 = vmax.f32 %v3010_v37, %v3015_v3  ;;  %v3021_v17 = vmax.f32 %v3011_v36, %v3016_v25  ;;  %v3022_v56 = vmax.f32 %v3012_v40, %v3017_v47  ;;  %v4454_v40 = vld [vmem:[%s4042_s25 + $0x18] sm:$0xff]  ;;  %v4456_v47 = vld [vmem:[%s4042_s25 + $0x28] sm:$0xff] }
 0x7f1   :  { %v3023_v19 = vmax.f32 %v3013_v39, %v3018_v22  ;;  %v3024_v16 = vmax.f32 %v3014_v50, %v3019_v23  ;;  %v4452_v39 = vld [vmem:[%s4042_s25 + $0x8] sm:$0xff]  ;;  %3278 = vmatpush.bf16.msra.mxu2 %v4454_v40  ;;  %3414 = vmatpush.bf16.msra.mxu0 %v4456_v47  ;;  %v4455_v50 = vld [vmem:[%s4042_s25 + $0x20] sm:$0xff] }
 0x7f2   :  { %v5762_v44 = vadd.f32 %v3020_v13, %v5628_v0  ;;  %v5765_v46 = vadd.f32 %v3021_v17, %v5630_v41  ;;  %v5773_v0 = vadd.f32 %v3022_v56, %v5637_v27  ;;  %3322 = vmatpush.bf16.msrb.mxu3 %v4452_v39  ;;  %v4453_v56 = vld [vmem:[%s4042_s25 + $0x10] sm:$0xff] }
 0x7f3   :  { %v5776_v41 = vadd.f32 %v3023_v19, %v5639_v35  ;;  %v5783_v62 = vadd.f32 %v3024_v16, %v5645_v31  ;;  %v4451_v19 = vld [vmem:[%s4042_s25] sm:$0xff] }
 0x7f4   :  { %v3030_v55 = vpack.c.bf16 %v5765_v46, %v5762_v44 }
 0x7f5   :  { %v3031_v58 = vpack.c.bf16 %v5776_v41, %v5773_v0  ;;  %v3032_v27 = vpack.c.bf16 %v5783_v62, %v5783_v62  ;;  %3279 = vmatpush.bf16.msra.mxu2 %v4453_v56  ;;  %3415 = vmatpush.bf16.msra.mxu0 %v4455_v50 }
 0x7f6   :  { %4274 = vmatmul.msk.bf16.vlgmr.msrb.gmra.mxu1 %vm2452_vm1, %v3030_v55  ;;  %3323 = vmatpush.bf16.msrb.mxu3 %v4451_v19 }
 0x806   :  { %4275 = vmatmul.msk.bf16.gmra.mxu1 %vm2452_vm1, %v3031_v58 }
 0x816   :  { %4276 = vmatmul.msk.bf16.gmra.mxu1 %vm2452_vm1, %v3032_v27  ;;  %v3137_v27 = vld [vmem:[%s4038_s29] sm:$0x1] }
 0x873   :  { %v5788_v35 = vpop.f32.mrf.mxu1 }
 0x874   :  { %v3113_v31 = vmul.f32 %v5788_v35, %v5788_v35  ;;  %v3097_v54 = vsel %vm1407_vm7, %v5788_v35, 0.0 }
 0x876   :  { %v3118_v29 = vsel %vm1407_vm7, %v3113_v31, 0.0 }
 0x87b   :  { %v5790_v1 = vpop.f32.mrf.mxu1 }
 0x87c   :  { %v3114_v32 = vmul.f32 %v5790_v1, %v5790_v1  ;;  %v3098_v52 = vsel %vm1407_vm7, %v5790_v1, 0.0 }
 0x87d   :  { %v3099_v30 = vadd.f32 %v3098_v52, %v3097_v54 }
 0x87e   :  { %v3119_v20 = vsel %vm1407_vm7, %v3114_v32, 0.0 }
 0x87f   :  { %v3120_v61 = vadd.f32 %v3119_v20, %v3118_v29 }
 0x883   :  { %v5792_v38 = vpop.f32.mrf.mxu1 }
 0x884   :  { %v3115_v2 = vmul.f32 %v5792_v38, %v5792_v38  ;;  %v3100_v4 = vsel %vm1407_vm7, %v5792_v38, 0.0 }
 0x885   :  { %v3101_v6 = vadd.f32 %v3100_v4, %v3099_v30 }
 0x886   :  { %v3121_v26 = vsel %vm1407_vm7, %v3115_v2, 0.0  ;;  %v3150_v2 = vld [vmem:[%s4039_s3] sm:$0x1] }
 0x887   :  { %v3122_v12 = vadd.f32 %v3121_v26, %v3120_v61 }
 0x88b   :  { %v5796_v63 = vpop.f32.mrf.mxu1 }
 0x88c   :  { %v3116_v42 = vmul.f32 %v5796_v63, %v5796_v63  ;;  %v3102_v5 = vsel %vm1407_vm7, %v5796_v63, 0.0 }
 0x88d   :  { %v3103_v28 = vadd.f32 %v3102_v5, %v3101_v6 }
 0x88e   :  { %v3123_v51 = vsel %vm1407_vm7, %v3116_v42, 0.0 }
 0x88f   :  { %v3124_v45 = vadd.f32 %v3123_v51, %v3122_v12 }
 0x893   :  { %v5816_v57 = vpop.f32.mrf.mxu1 }
 0x894   :  { %v3104_v49 = vsel %vm2610_vm6, %v5816_v57, 0.0  ;;  %v3117_v7 = vmul.f32 %v5816_v57, %v5816_v57 }
 0x895   :  { %v3105_v10 = vadd.f32 %v3104_v49, %v3103_v28 }
 0x896   :  { %v3125_v11 = vsel %vm2610_vm6, %v3117_v7, 0.0 }
 0x897   :  { %v3106_v9 = vrot.slane %v3105_v10, 4  ;;  %v3126_v14 = vadd.f32 %v3125_v11, %v3124_v45 }
 0x899   :  { %v3107_v34 = vadd.f32 %v3106_v9, %v3105_v10  ;;  %v3127_v43 = vrot.slane %v3126_v14, 4 }
 0x89b   :  { %v3108_v60 = vrot.slane %v3107_v34, 2  ;;  %v3128_v18 = vadd.f32 %v3127_v43, %v3126_v14  ;;  %v3095_v21 = vpop.f32.mrf.mxu1 }
 0x89d   :  { %v3109_v33 = vadd.f32 %v3108_v60, %v3107_v34  ;;  %v3129_v53 = vrot.slane %v3128_v18, 2  ;;  %v3204_v34 = vpop.permute.xlu0 %3203 }
 0x89f   :  { %v3110_v24 = vrot.slane %v3109_v33, 1  ;;  %v3130_v8 = vadd.f32 %v3129_v53, %v3128_v18  ;;  %v3352_v18 = vpop.permute.xlu2 %3351 }
 0x8a1   :  { %v3111_v37 = vadd.f32 %v3110_v24, %v3109_v33  ;;  %v3131_v36 = vrot.slane %v3130_v8, 1 }
 0x8a3   :  { %v3112_v3 = vmul.f32 0.027777778, %v3111_v37  ;;  %v3132_v25 = vadd.f32 %v3131_v36, %v3130_v8 }
 0x8a5   :  { %v3133_v13 = vmul.f32 0.027777778, %v3132_v25  ;;  %v3134_v17 = vmul.f32 %v3112_v3, %v3112_v3  ;;  %v3357_v8 = vpop.permute.xlu0 %3356 }
 0x8a7   :  { %v3135_v15 = vsub.f32 %v3133_v13, %v3134_v17 }
 0x8a9   :  { %v3136_v59 = vmax.f32 %v3135_v15, 0.0 }
 0x8ab   :  { %v3138_v55 = vadd.f32 1e-05, %v3136_v59 }
 0x8ad   :  { %4544 = vrsqrt.f32 %v3138_v55  ;;  %vm3145_vm15 = vweird.f32 %v3138_v55 }
 0x8b3   :  { %v4545_v22 = vpop.eup %4544 }
 0x8b4   :  { %v3140_v48 = vmul.f32 %v4545_v22, %v3138_v55  ;;  %vm3146_vm14 = vweird.f32 %v4545_v22 }
 0x8b5   :  { %vm3147_vm0 = vmor %vm3145_vm15, %vm3146_vm14 }
 0x8b6   :  { %v3141_v58 = vmul.f32 %v4545_v22, %v3140_v48  ;;  %v3362_v48 = vpop.permute.xlu0 %3361 }
 0x8b8   :  { %v3142_v23 = vmul.f32 0.5, %v3141_v58 }
 0x8ba   :  { %v3143_v16 = vsub.f32 1.5, %v3142_v23 }
 0x8bc   :  { %v3144_v32 = vmul.f32 %v4545_v22, %v3143_v16 }
 0x8be   :  { %v3148_v31 = vsel %vm3147_vm0, %v4545_v22, %v3144_v32  ;;  %v3219_v22 = vpop.permute.xlu2 %3218 }
 0x8bf   :  { %v3149_v52 = vmul.f32 %v3148_v31, %v3137_v27 }
 0x8c1   :  { %v3151_v54 = vmul.f32 %v3149_v52, %v3112_v3  ;;  %v3154_v20 = vperm.slane %v3149_v52, 0 }
 0x8c3   :  { %v3152_v4 = vsub.f32 %v3150_v2, %v3151_v54  ;;  %v3156_v42 = vmul.f32 %v3154_v20, %v5788_v35  ;;  %v3157_v30 = vmul.f32 %v3154_v20, %v5790_v1  ;;  %v3158_v29 = vmul.f32 %v3154_v20, %v5792_v38 }
 0x8c4   :  { %v3159_v26 = vmul.f32 %v3154_v20, %v5796_v63  ;;  %v3160_v61 = vmul.f32 %v3154_v20, %v5816_v57  ;;  %v3209_v63 = vpop.permute.xlu1 %3208 }
 0x8c5   :  { %v3162_v5 = vperm.slane %v3152_v4, 0 }
 0x8c6   :  { %v3224_v20 = vpop.permute.xlu2 %3223 }
 0x8c7   :  { %v3164_v6 = vadd.f32 %v3162_v5, %v3156_v42  ;;  %v3165_v51 = vadd.f32 %v3162_v5, %v3157_v30  ;;  %v3166_v12 = vadd.f32 %v3162_v5, %v3158_v29  ;;  %v3167_v28 = vadd.f32 %v3162_v5, %v3159_v26  ;;  %v3372_v42 = vpop.permute.xlu0 %3371 }
 0x8c8   :  { %v3168_v49 = vadd.f32 %v3162_v5, %v3160_v61 }
 0x8c9   :  { %v3169_v7 = vmul.f32 0.1, %v3164_v6  ;;  %v3170_v45 = vmul.f32 0.1, %v3165_v51  ;;  %v3171_v10 = vmul.f32 0.1, %v3166_v12 }
 0x8ca   :  { %v3172_v11 = vmul.f32 0.1, %v3167_v28  ;;  %v3173_v9 = vmul.f32 0.1, %v3168_v49 }
 0x8cb   :  { %v3174_v35 = vmax.f32 %v3164_v6, %v3169_v7  ;;  %v3175_v14 = vmax.f32 %v3165_v51, %v3170_v45  ;;  %v3176_v1 = vmax.f32 %v3166_v12, %v3171_v10 }
 0x8cc   :  { %v3177_v38 = vmax.f32 %v3167_v28, %v3172_v11  ;;  %v3178_v43 = vmax.f32 %v3168_v49, %v3173_v9  ;;  %v3214_v59 = vpop.permute.xlu1 %3213 }
 0x8cd   :  { %3186 = vst.msk [vmem:[#allocation7 + $0x8] sm:$0xff] %vm1407_vm7, %v3174_v35 }
 0x8ce   :  { %3187 = vst.msk [vmem:[#allocation7 + $0x10] sm:$0xff] %vm1407_vm7, %v3175_v14 }
 0x8cf   :  { %3188 = vst.msk [vmem:[#allocation7 + $0x18] sm:$0xff] %vm1407_vm7, %v3176_v1 }
 0x8d0   :  { %3189 = vst.msk [vmem:[#allocation7 + $0x20] sm:$0xff] %vm1407_vm7, %v3177_v38 }
 0x8d1   :  { %3190 = vst.msk [vmem:[#allocation7 + $0x28] sm:$0xf] %vm2610_vm6, %v3178_v43 }
 0x8d4   :  { %v3238_v57 = vld [vmem:[#allocation7 + $0x8] sm:$0xff]  ;;  %v3367_v50 = vpop.permute.xlu1 %3366 }
 0x8d5   :  { %v3191_v60 = vld [vmem:[#allocation7 + $0x7] sm:$0xff]  ;;  %v3239_v21 = vld [vmem:[#allocation7 + $0x10] sm:$0xff] }
 0x8d6   :  { %v3192_v33 = vld [vmem:[#allocation7 + $0xf] sm:$0xff]  ;;  %v3226_v53 = vmul.f32 %v3204_v34, %v3191_v60  ;;  %v3243_v37 = vpack.c.bf16 %v3239_v21, %v3238_v57  ;;  %v3193_v55 = vld [vmem:[#allocation7 + $0x17] sm:$0xff] }
 0x8d7   :  { %v3339_v24 = vld [vmem:[#allocation7 + $0x9] sm:$0xff]  ;;  %v3227_v36 = vmul.f32 %v3209_v63, %v3192_v33  ;;  %v3340_v3 = vld [vmem:[#allocation7 + $0x11] sm:$0xff]  ;;  %v3194_v40 = vld [vmem:[#allocation7 + $0x1f] sm:$0xff]  ;;  %v3228_v58 = vmul.f32 %v3214_v59, %v3193_v55 }
 0x8d8   :  { %v3374_v25 = vmul.f32 %v3352_v18, %v3339_v24  ;;  %v3375_v13 = vmul.f32 %v3357_v8, %v3340_v3  ;;  %4289 = vmatmul.msk.bf16.vlgmr.msra.gmra.mxu2 %vm1407_vm7, %v3243_v37  ;;  %v3341_v39 = vld [vmem:[#allocation7 + $0x19] sm:$0xff]  ;;  %v3342_v47 = vld [vmem:[#allocation7 + $0x21] sm:$0xff]  ;;  %v3229_v23 = vmul.f32 %v3219_v22, %v3194_v40  ;;  %v3343_v54 = vld [vmem:[#allocation7 + $0x29] sm:$0xf] }
 0x8d9   :  { %v3231_v17 = vpack.c.bf16 %v3227_v36, %v3226_v53  ;;  %v3240_v56 = vld [vmem:[#allocation7 + $0x18] sm:$0xff]  ;;  %v3241_v19 = vld [vmem:[#allocation7 + $0x20] sm:$0xff]  ;;  %v3376_v16 = vmul.f32 %v3362_v48, %v3341_v39  ;;  %v3377_v27 = vmul.f32 %v3367_v50, %v3342_v47  ;;  %v3242_v4 = vld [vmem:[#allocation7 + $0x28] sm:$0xf]  ;;  %v3378_v29 = vmul.f32 %v3372_v42, %v3343_v54 }
 0x8da   :  { %v3379_v15 = vpack.c.bf16 %v3375_v13, %v3374_v25  ;;  %v3244_v32 = vpack.c.bf16 %v3241_v19, %v3240_v56  ;;  %v3232_v31 = vpack.c.bf16 %v3229_v23, %v3228_v58  ;;  %v3195_v2 = vld [vmem:[#allocation7 + $0x27] sm:$0xf]  ;;  %v3245_v26 = vpack.c.bf16 %v3242_v4, %v3242_v4 }
 0x8db   :  { %4300 = vmatmul.msk.bf16.vlgmr.msrb.gmra.mxu3 %vm1407_vm7, %v3231_v17  ;;  %v3380_v52 = vpack.c.bf16 %v3377_v27, %v3376_v16  ;;  %v3230_v30 = vmul.f32 %v3224_v20, %v3195_v2  ;;  %v3381_v61 = vpack.c.bf16 %v3378_v29, %v3378_v29 }
 0x8dc   :  { %4315 = vmatmul.msk.bf16.vlgmr.msra.gmra.mxu0 %vm1407_vm7, %v3379_v15 }
 0x8dd   :  { %v3233_v5 = vpack.c.bf16 %v3230_v30, %v3230_v30 }
 0x8e8   :  { %4290 = vmatmul.msk.bf16.gmra.mxu2 %vm1407_vm7, %v3244_v32 }
 0x8eb   :  { %4301 = vmatmul.msk.bf16.gmra.mxu3 %vm1407_vm7, %v3232_v31 }
 0x8ec   :  { %4316 = vmatmul.msk.bf16.gmra.mxu0 %vm1407_vm7, %v3380_v52 }
 0x8f8   :  { %4291 = vmatmul.msk.bf16.gmra.mxu2 %vm1407_vm7, %v3245_v26 }
 0x8fb   :  { %4302 = vmatmul.msk.bf16.gmra.mxu3 %vm1407_vm7, %v3233_v5 }
 0x8fc   :  { %4317 = vmatmul.msk.bf16.gmra.mxu0 %vm1407_vm7, %v3381_v61 }
 0x959   :  { %v3417_v6 = vpop.f32.mrf.mxu0 }
 0x95b   :  { %v3281_v51 = vpop.f32.mrf.mxu2 }
 0x95e   :  { %v3325_v12 = vpop.f32.mrf.mxu3 }
 0x95f   :  { %v3326_v14 = vadd.f32 %v3325_v12, %v3281_v51 }
 0x961   :  { %v3419_v28 = vpop.f32.mrf.mxu0  ;;  %v5853_v63 = vadd.f32 %v3417_v6, %v3326_v14  ;;  %v4460_v14 = vld [vmem:[%s5889_s7 + $0x18] sm:$0xff] }
 0x962   :  { %3696 = vmatpush.bf16.msrb.mxu2 %v4460_v14 }
 0x963   :  { %v3283_v49 = vpop.f32.mrf.mxu2  ;;  %v3452_v53 = vmul.f32 %v5853_v63, %v5853_v63  ;;  %v3436_v36 = vsel %vm2452_vm1, %v5853_v63, 0.0 }
 0x965   :  { %v3457_v59 = vsel %vm2452_vm1, %v3452_v53, 0.0  ;;  %v4462_v53 = vld [vmem:[%s5889_s7 + $0x28] sm:$0xff] }
 0x966   :  { %v3327_v7 = vpop.f32.mrf.mxu3 }
 0x967   :  { %v3328_v9 = vadd.f32 %v3327_v7, %v3283_v49 }
 0x969   :  { %v3422_v45 = vpop.f32.mrf.mxu0  ;;  %v5851_v38 = vadd.f32 %v3419_v28, %v3328_v9 }
 0x96b   :  { %v3286_v10 = vpop.f32.mrf.mxu2  ;;  %v3453_v18 = vmul.f32 %v5851_v38, %v5851_v38  ;;  %v3437_v24 = vsel %vm2452_vm1, %v5851_v38, 0.0 }
 0x96c   :  { %v3438_v17 = vadd.f32 %v3437_v24, %v3436_v36  ;;  %v4458_v24 = vld [vmem:[%s5889_s7 + $0x8] sm:$0xff]  ;;  %v4461_v36 = vld [vmem:[%s5889_s7 + $0x20] sm:$0xff] }
 0x96d   :  { %v3458_v3 = vsel %vm2452_vm1, %v3453_v18, 0.0  ;;  %v4467_v18 = vld [vmem:[%s5889_s7 + $0x50] sm:$0xff] }
 0x96e   :  { %v3330_v11 = vpop.f32.mrf.mxu3  ;;  %v3459_v47 = vadd.f32 %v3458_v3, %v3457_v59 }
 0x96f   :  { %v3331_v1 = vadd.f32 %v3330_v11, %v3286_v10 }
 0x971   :  { %v3424_v35 = vpop.f32.mrf.mxu0  ;;  %v5855_v57 = vadd.f32 %v3422_v45, %v3331_v1  ;;  %v4468_v1 = vld [vmem:[%s5889_s7 + $0x58] sm:$0xff] }
 0x972   :  { %3804 = vmatpush.bf16.msra.mxu3 %v4468_v1 }
 0x973   :  { %v3288_v34 = vpop.f32.mrf.mxu2  ;;  %v3454_v8 = vmul.f32 %v5855_v57, %v5855_v57  ;;  %v3439_v25 = vsel %vm2452_vm1, %v5855_v57, 0.0 }
 0x974   :  { %v3440_v22 = vadd.f32 %v3439_v25, %v3438_v17  ;;  %v4457_v25 = vld [vmem:[%s5889_s7] sm:$0xff] }
 0x975   :  { %v3460_v55 = vsel %vm2452_vm1, %v3454_v8, 0.0  ;;  %v4466_v8 = vld [vmem:[%s5889_s7 + $0x48] sm:$0xff] }
 0x976   :  { %v3332_v43 = vpop.f32.mrf.mxu3  ;;  %v3461_v50 = vadd.f32 %v3460_v55, %v3459_v47  ;;  %3805 = vmatpush.bf16.msra.mxu3 %v4467_v18 }
 0x977   :  { %v3333_v60 = vadd.f32 %v3332_v43, %v3288_v34  ;;  %v4463_v34 = vld [vmem:[%s5889_s7 + $0x30] sm:$0xff] }
 0x979   :  { %v5859_v21 = vadd.f32 %v3424_v35, %v3333_v60  ;;  %v3427_v33 = vpop.f32.mrf.mxu0  ;;  %v4464_v35 = vld [vmem:[%s5889_s7 + $0x38] sm:$0xff]  ;;  %v4459_v60 = vld [vmem:[%s5889_s7 + $0x10] sm:$0xff] }
 0x97a   :  { %3640 = vmatpush.bf16.msra.mxu1 %v4464_v35  ;;  %3697 = vmatpush.bf16.msrb.mxu2 %v4459_v60 }
 0x97b   :  { %v3291_v37 = vpop.f32.mrf.mxu2  ;;  %v3455_v13 = vmul.f32 %v5859_v21, %v5859_v21  ;;  %v3441_v40 = vsel %vm2452_vm1, %v5859_v21, 0.0  ;;  %3806 = vmatpush.bf16.msra.mxu3 %v4466_v8 }
 0x97c   :  { %v3442_v58 = vadd.f32 %v3441_v40, %v3440_v22 }
 0x97d   :  { %v3462_v56 = vsel %vm2452_vm1, %v3455_v13, 0.0  ;;  %v4465_v13 = vld [vmem:[%s5889_s7 + $0x40] sm:$0xff] }
 0x97e   :  { %v3335_v15 = vpop.f32.mrf.mxu3  ;;  %v3463_v27 = vadd.f32 %v3462_v56, %v3461_v50  ;;  %3641 = vmatpush.bf16.msra.mxu1 %v4463_v34  ;;  %3698 = vmatpush.bf16.msrb.mxu2 %v4458_v24 }
 0x97f   :  { %v3336_v39 = vadd.f32 %v3335_v15, %v3291_v37  ;;  %v3476_v15 = vld [vmem:[%s4043_s11] sm:$0x1]  ;;  %3807 = vmatpush.bf16.msra.mxu3 %v4465_v13 }
 0x981   :  { %v5879_v19 = vadd.f32 %v3427_v33, %v3336_v39  ;;  %v3429_v48 = vpop.f32.mrf.mxu0  ;;  %v3489_v39 = vld [vmem:[%s4044_s15] sm:$0x1] }
 0x982   :  { %3642 = vmatpush.bf16.msra.mxu1 %v4462_v53  ;;  %3699 = vmatpush.bf16.msrb.mxu2 %v4457_v25 }
 0x983   :  { %v3443_v23 = vsel %vm2460_vm2, %v5879_v19, 0.0  ;;  %v3456_v16 = vmul.f32 %v5879_v19, %v5879_v19  ;;  %v3293_v31 = vpop.f32.mrf.mxu2 }
 0x984   :  { %v3444_v32 = vadd.f32 %v3443_v23, %v3442_v58 }
 0x985   :  { %v3464_v52 = vsel %vm2460_vm2, %v3456_v16, 0.0 }
 0x986   :  { %v3445_v2 = vrot.slane %v3444_v32, 4  ;;  %v3465_v54 = vadd.f32 %v3464_v52, %v3463_v27  ;;  %v3337_v20 = vpop.f32.mrf.mxu3  ;;  %3643 = vmatpush.bf16.msra.mxu1 %v4461_v36 }
 0x988   :  { %v3446_v4 = vadd.f32 %v3445_v2, %v3444_v32  ;;  %v3466_v42 = vrot.slane %v3465_v54, 4 }
 0x98a   :  { %v3447_v30 = vrot.slane %v3446_v4, 2  ;;  %v3467_v29 = vadd.f32 %v3466_v42, %v3465_v54 }
 0x98c   :  { %v3448_v26 = vadd.f32 %v3447_v30, %v3446_v4  ;;  %v3468_v5 = vrot.slane %v3467_v29, 2 }
 0x98e   :  { %v3449_v61 = vrot.slane %v3448_v26, 1  ;;  %v3469_v6 = vadd.f32 %v3468_v5, %v3467_v29 }
 0x990   :  { %v3450_v51 = vadd.f32 %v3449_v61, %v3448_v26  ;;  %v3470_v12 = vrot.slane %v3469_v6, 1 }
 0x992   :  { %v3451_v28 = vmul.f32 0.027777778, %v3450_v51  ;;  %v3471_v49 = vadd.f32 %v3470_v12, %v3469_v6  ;;  %v3548_v6 = vpop.permute.xlu1 %3547 }
 0x994   :  { %v3472_v7 = vmul.f32 0.027777778, %v3471_v49  ;;  %v3473_v45 = vmul.f32 %v3451_v28, %v3451_v28  ;;  %v3728_v49 = vpop.permute.xlu0 %3727 }
 0x996   :  { %v3474_v10 = vsub.f32 %v3472_v7, %v3473_v45 }
 0x998   :  { %v3475_v11 = vmax.f32 %v3474_v10, 0.0 }
 0x99a   :  { %v3477_v9 = vadd.f32 1e-05, %v3475_v11  ;;  %v3733_v10 = vpop.permute.xlu1 %3732 }
 0x99c   :  { %4546 = vrsqrt.f32 %v3477_v9  ;;  %vm3484_vm3 = vweird.f32 %v3477_v9  ;;  %v3563_v24 = vpop.permute.xlu0 %3562 }
 0x9a2   :  { %v4547_v43 = vpop.eup %4546 }
 0x9a3   :  { %v3479_v33 = vmul.f32 %v4547_v43, %v3477_v9  ;;  %vm3485_vm7 = vweird.f32 %v4547_v43 }
 0x9a4   :  { %vm3486_vm4 = vmor %vm3484_vm3, %vm3485_vm7 }
 0x9a5   :  { %v3480_v37 = vmul.f32 %v4547_v43, %v3479_v33 }
 0x9a7   :  { %v3481_v3 = vmul.f32 0.5, %v3480_v37 }
 0x9a9   :  { %v3482_v17 = vsub.f32 1.5, %v3481_v3  ;;  %v3738_v3 = vpop.permute.xlu1 %3737 }
 0x9ab   :  { %v3483_v59 = vmul.f32 %v4547_v43, %v3482_v17 }
 0x9ad   :  { %v3487_v55 = vsel %vm3486_vm4, %v4547_v43, %v3483_v59 }
 0x9ae   :  { %v3488_v40 = vmul.f32 %v3487_v55, %v3476_v15 }
 0x9b0   :  { %v3490_v47 = vmul.f32 %v3488_v40, %v3451_v28  ;;  %v3493_v22 = vperm.slane %v3488_v40, 0  ;;  %v3553_v28 = vpop.permute.xlu2 %3552 }
 0x9b2   :  { %v3491_v56 = vsub.f32 %v3489_v39, %v3490_v47  ;;  %v3495_v48 = vmul.f32 %v3493_v22, %v5853_v63  ;;  %v3496_v50 = vmul.f32 %v3493_v22, %v5851_v38  ;;  %v3497_v58 = vmul.f32 %v3493_v22, %v5855_v57 }
 0x9b3   :  { %v3498_v23 = vmul.f32 %v3493_v22, %v5859_v21  ;;  %v3499_v27 = vmul.f32 %v3493_v22, %v5879_v19  ;;  %v3568_v22 = vpop.permute.xlu0 %3567 }
 0x9b4   :  { %v3501_v16 = vperm.slane %v3491_v56, 0 }
 0x9b6   :  { %v3503_v32 = vadd.f32 %v3501_v16, %v3495_v48  ;;  %v3504_v31 = vadd.f32 %v3501_v16, %v3496_v50  ;;  %v3505_v52 = vadd.f32 %v3501_v16, %v3497_v58  ;;  %v3506_v2 = vadd.f32 %v3501_v16, %v3498_v23  ;;  %v3748_v48 = vpop.permute.xlu1 %3747 }
 0x9b7   :  { %v3507_v54 = vadd.f32 %v3501_v16, %v3499_v27 }
 0x9b8   :  { %v3508_v20 = vmul.f32 0.1, %v3503_v32  ;;  %v3509_v4 = vmul.f32 0.1, %v3504_v31  ;;  %v3510_v42 = vmul.f32 0.1, %v3505_v52  ;;  %v3558_v43 = vpop.permute.xlu2 %3557 }
 0x9b9   :  { %v3511_v30 = vmul.f32 0.1, %v3506_v2  ;;  %v3512_v29 = vmul.f32 0.1, %v3507_v54 }
 0x9ba   :  { %v3513_v63 = vmax.f32 %v3503_v32, %v3508_v20  ;;  %v3514_v26 = vmax.f32 %v3504_v31, %v3509_v4  ;;  %v3515_v38 = vmax.f32 %v3505_v52, %v3510_v42 }
 0x9bb   :  { %v3516_v5 = vmax.f32 %v3506_v2, %v3511_v30  ;;  %v3517_v57 = vmax.f32 %v3507_v54, %v3512_v29 }
 0x9bc   :  { %v3518_v21 = vadd.f32 %v3513_v63, %v5762_v44  ;;  %v3519_v61 = vadd.f32 %v3514_v26, %v5765_v46  ;;  %v3520_v19 = vadd.f32 %v3515_v38, %v5773_v0 }
 0x9bd   :  { %v3521_v51 = vadd.f32 %v3516_v5, %v5776_v41  ;;  %v3522_v12 = vadd.f32 %v3517_v57, %v5783_v62 }
 0x9be   :  { %3530 = vst.msk [vmem:[#allocation8 + $0x8] sm:$0xff] %vm2452_vm1, %v3518_v21 }
 0x9bf   :  { %3531 = vst.msk [vmem:[#allocation8 + $0x10] sm:$0xff] %vm2452_vm1, %v3519_v61 }
 0x9c0   :  { %3532 = vst.msk [vmem:[#allocation8 + $0x18] sm:$0xff] %vm2452_vm1, %v3520_v19  ;;  %v3743_v36 = vpop.permute.xlu2 %3742 }
 0x9c1   :  { %3533 = vst.msk [vmem:[#allocation8 + $0x20] sm:$0xff] %vm2452_vm1, %v3521_v51 }
 0x9c2   :  { %3534 = vst.msk [vmem:[#allocation8 + $0x28] sm:$0xf] %vm2460_vm2, %v3522_v12 }
 0x9c5   :  { %v3586_v44 = vld [vmem:[#allocation8 + $0x8] sm:$0xff] }
 0x9c6   :  { %v3535_v46 = vld [vmem:[#allocation8 + $0x7] sm:$0xff]  ;;  %v3587_v0 = vld [vmem:[#allocation8 + $0x10] sm:$0xff] }
 0x9c7   :  { %v3536_v7 = vld [vmem:[#allocation8 + $0xf] sm:$0xff]  ;;  %v3570_v45 = vmul.f32 %v3548_v6, %v3535_v46  ;;  %v3591_v62 = vpack.c.bf16 %v3587_v0, %v3586_v44  ;;  %v3537_v60 = vld [vmem:[#allocation8 + $0x17] sm:$0xff] }
 0x9c8   :  { %v3715_v41 = vld [vmem:[#allocation8 + $0x9] sm:$0xff]  ;;  %v3571_v11 = vmul.f32 %v3553_v28, %v3536_v7  ;;  %v3716_v9 = vld [vmem:[#allocation8 + $0x11] sm:$0xff]  ;;  %v3538_v18 = vld [vmem:[#allocation8 + $0x1f] sm:$0xff]  ;;  %v3572_v25 = vmul.f32 %v3558_v43, %v3537_v60 }
 0x9c9   :  { %v3750_v35 = vmul.f32 %v3728_v49, %v3715_v41  ;;  %v3751_v14 = vmul.f32 %v3733_v10, %v3716_v9  ;;  %4342 = vmatmul.msk.bf16.vlgmr.msra.gmra.mxu1 %vm2452_vm1, %v3591_v62  ;;  %v3717_v33 = vld [vmem:[#allocation8 + $0x19] sm:$0xff]  ;;  %v3718_v53 = vld [vmem:[#allocation8 + $0x21] sm:$0xff]  ;;  %v3573_v13 = vmul.f32 %v3563_v24, %v3538_v18  ;;  %v3719_v47 = vld [vmem:[#allocation8 + $0x29] sm:$0xf] }
 0x9ca   :  { %v3575_v1 = vpack.c.bf16 %v3571_v11, %v3570_v45  ;;  %v3588_v8 = vld [vmem:[#allocation8 + $0x18] sm:$0xff]  ;;  %v3589_v37 = vld [vmem:[#allocation8 + $0x20] sm:$0xff]  ;;  %v3752_v17 = vmul.f32 %v3738_v3, %v3717_v33  ;;  %v3753_v15 = vmul.f32 %v3743_v36, %v3718_v53  ;;  %v3590_v56 = vld [vmem:[#allocation8 + $0x28] sm:$0xf]  ;;  %v3754_v58 = vmul.f32 %v3748_v48, %v3719_v47 }
 0x9cb   :  { %v3755_v34 = vpack.c.bf16 %v3751_v14, %v3750_v35  ;;  %v3592_v59 = vpack.c.bf16 %v3589_v37, %v3588_v8  ;;  %v3576_v55 = vpack.c.bf16 %v3573_v13, %v3572_v25  ;;  %v3539_v39 = vld [vmem:[#allocation8 + $0x27] sm:$0xf]  ;;  %v3593_v23 = vpack.c.bf16 %v3590_v56, %v3590_v56  ;;  %v4476_v35 = vld [vmem:[%s5938_s19 + $0x38] sm:$0xff]  ;;  %v4475_v53 = vld [vmem:[%s5938_s19 + $0x30] sm:$0xff] }
 0x9cc   :  { %4361 = vmatmul.msk.bf16.vlgmr.msrb.gmra.mxu2 %vm2452_vm1, %v3575_v1  ;;  %v3756_v40 = vpack.c.bf16 %v3753_v15, %v3752_v17  ;;  %v3574_v50 = vmul.f32 %v3568_v22, %v3539_v39  ;;  %v3757_v27 = vpack.c.bf16 %v3754_v58, %v3754_v58  ;;  %3974 = vmatpush.bf16.msrb.mxu0 %v4476_v35  ;;  %v4474_v13 = vld [vmem:[%s5938_s19 + $0x28] sm:$0xff]  ;;  %v4472_v48 = vld [vmem:[%s5938_s19 + $0x18] sm:$0xff] }
 0x9cd   :  { %4388 = vmatmul.msk.bf16.vlgmr.msra.gmra.mxu3 %vm2452_vm1, %v3755_v34 }
 0x9ce   :  { %v3577_v16 = vpack.c.bf16 %v3574_v50, %v3574_v50 }
 0x9d0   :  { %3975 = vmatpush.bf16.msrb.mxu0 %v4475_v53 }
 0x9d4   :  { %3976 = vmatpush.bf16.msrb.mxu0 %v4474_v13 }
 0x9d9   :  { %4343 = vmatmul.msk.bf16.gmra.mxu1 %vm2452_vm1, %v3592_v59 }
 0x9dc   :  { %4362 = vmatmul.msk.bf16.gmra.mxu2 %vm2452_vm1, %v3576_v55 }
 0x9dd   :  { %4389 = vmatmul.msk.bf16.gmra.mxu3 %vm2452_vm1, %v3756_v40  ;;  %v4473_v40 = vld [vmem:[%s5938_s19 + $0x20] sm:$0xff] }
 0x9de   :  { %3977 = vmatpush.bf16.msrb.mxu0 %v4473_v40 }
 0x9e2   :  { %3978 = vmatpush.bf16.msrb.mxu0 %v4472_v48 }
 0x9e9   :  { %4344 = vmatmul.msk.bf16.gmra.mxu1 %vm2452_vm1, %v3593_v23 }
 0x9ec   :  { %4363 = vmatmul.msk.bf16.gmra.mxu2 %vm2452_vm1, %v3577_v16 }
 0x9ed   :  { %4390 = vmatmul.msk.bf16.gmra.mxu3 %vm2452_vm1, %v3757_v27  ;;  %vm3831_vm1 = vcmask 1043456   ;;  %v4471_v27 = vld [vmem:[%s5938_s19 + $0x10] sm:$0xff] }
 0x9ee   :  { %3979 = vmatpush.bf16.msrb.mxu0 %v4471_v27 }
 0xa46   :  { %v3645_v32 = vpop.f32.mrf.mxu1 }
 0xa4e   :  { %v3647_v31 = vpop.f32.mrf.mxu1 }
 0xa4f   :  { %v3701_v52 = vpop.f32.mrf.mxu2 }
 0xa50   :  { %v3809_v2 = vpop.f32.mrf.mxu3  ;;  %v3702_v26 = vadd.f32 %v3701_v52, %v3645_v32 }
 0xa52   :  { %v5940_v6 = vadd.f32 %v3809_v2, %v3702_v26 }
 0xa54   :  { %v3841_v44 = vmul.f32 %v5940_v6, %v5940_v6 }
 0xa56   :  { %v3650_v54 = vpop.f32.mrf.mxu1 }
 0xa57   :  { %v3703_v20 = vpop.f32.mrf.mxu2 }
 0xa58   :  { %v3811_v4 = vpop.f32.mrf.mxu3  ;;  %v3704_v63 = vadd.f32 %v3703_v20, %v3647_v31  ;;  %v4470_v31 = vld [vmem:[%s5938_s19 + $0x8] sm:$0xff] }
 0xa59   :  { %3980 = vmatpush.bf16.msrb.mxu0 %v4470_v31 }
 0xa5a   :  { %v5933_v61 = vadd.f32 %v3811_v4, %v3704_v63  ;;  %v3861_v63 = vld [vmem:[%s4048_s23] sm:$0x1] }
 0xa5c   :  { %v3842_v12 = vmul.f32 %v5933_v61, %v5933_v61  ;;  %v3828_v46 = vadd.f32 %v5933_v61, %v5940_v6 }
 0xa5e   :  { %v3652_v42 = vpop.f32.mrf.mxu1  ;;  %v3846_v10 = vadd.f32 %v3842_v12, %v3841_v44 }
 0xa5f   :  { %v3706_v30 = vpop.f32.mrf.mxu2 }
 0xa60   :  { %v3814_v29 = vpop.f32.mrf.mxu3  ;;  %v3707_v38 = vadd.f32 %v3706_v30, %v3650_v54  ;;  %v4469_v54 = vld [vmem:[%s5938_s19] sm:$0xff] }
 0xa61   :  { %3981 = vmatpush.bf16.msrb.mxu0 %v4469_v54 }
 0xa62   :  { %v5942_v51 = vadd.f32 %v3814_v29, %v3707_v38 }
 0xa64   :  { %v3843_v49 = vmul.f32 %v5942_v51, %v5942_v51  ;;  %v3829_v62 = vadd.f32 %v3828_v46, %v5942_v51 }
 0xa66   :  { %v3655_v5 = vpop.f32.mrf.mxu1  ;;  %v3847_v14 = vadd.f32 %v3846_v10, %v3843_v49 }
 0xa67   :  { %v3708_v57 = vpop.f32.mrf.mxu2 }
 0xa68   :  { %v3816_v21 = vpop.f32.mrf.mxu3  ;;  %v3709_v19 = vadd.f32 %v3708_v57, %v3652_v42  ;;  %v3874_v57 = vld [vmem:[%s4049_s27] sm:$0x1] }
 0xa6a   :  { %v5946_v28 = vadd.f32 %v3816_v21, %v3709_v19 }
 0xa6c   :  { %v3844_v11 = vmul.f32 %v5946_v28, %v5946_v28  ;;  %v3830_v1 = vadd.f32 %v3829_v62, %v5946_v28 }
 0xa6e   :  { %v3657_v0 = vpop.f32.mrf.mxu1  ;;  %v3848_v60 = vadd.f32 %v3847_v14, %v3844_v11 }
 0xa6f   :  { %v3711_v7 = vpop.f32.mrf.mxu2 }
 0xa70   :  { %v3712_v45 = vadd.f32 %v3711_v7, %v3655_v5  ;;  %v3819_v41 = vpop.f32.mrf.mxu3 }
 0xa72   :  { %v5957_v9 = vadd.f32 %v3819_v41, %v3712_v45 }
 0xa74   :  { %v3832_v34 = vsel %vm3831_vm1, %v5957_v9, 0.0  ;;  %v3845_v43 = vmul.f32 %v5957_v9, %v5957_v9 }
 0xa75   :  { %v3833_v18 = vadd.f32 %v3832_v34, %v3830_v1 }
 0xa76   :  { %v3849_v33 = vsel %vm3831_vm1, %v3845_v43, 0.0 }
 0xa77   :  { %v3834_v24 = vrot.slane %v3833_v18, 4  ;;  %v3850_v8 = vadd.f32 %v3849_v33, %v3848_v60  ;;  %v3713_v37 = vpop.f32.mrf.mxu2 }
 0xa78   :  { %v3821_v36 = vpop.f32.mrf.mxu3 }
 0xa79   :  { %v3835_v3 = vadd.f32 %v3834_v24, %v3833_v18  ;;  %v3851_v25 = vrot.slane %v3850_v8, 4 }
 0xa7b   :  { %v3836_v17 = vrot.slane %v3835_v3, 2  ;;  %v3852_v15 = vadd.f32 %v3851_v25, %v3850_v8 }
 0xa7d   :  { %v3837_v59 = vadd.f32 %v3836_v17, %v3835_v3  ;;  %v3853_v55 = vrot.slane %v3852_v15, 2 }
 0xa7f   :  { %v3838_v39 = vrot.slane %v3837_v59, 1  ;;  %v3854_v47 = vadd.f32 %v3853_v55, %v3852_v15 }
 0xa81   :  { %v3839_v22 = vadd.f32 %v3838_v39, %v3837_v59  ;;  %v3855_v56 = vrot.slane %v3854_v47, 1 }
 0xa83   :  { %v3840_v50 = vmul.f32 0.027777778, %v3839_v22  ;;  %v3856_v58 = vadd.f32 %v3855_v56, %v3854_v47 }
 0xa85   :  { %v3857_v23 = vmul.f32 0.027777778, %v3856_v58  ;;  %v3858_v16 = vmul.f32 %v3840_v50, %v3840_v50 }
 0xa87   :  { %v3859_v32 = vsub.f32 %v3857_v23, %v3858_v16 }
 0xa89   :  { %v3860_v52 = vmax.f32 %v3859_v32, 0.0 }
 0xa8b   :  { %v3862_v2 = vadd.f32 1e-05, %v3860_v52 }
 0xa8d   :  { %4548 = vrsqrt.f32 %v3862_v2  ;;  %vm3869_vm5 = vweird.f32 %v3862_v2 }
 0xa93   :  { %v4549_v20 = vpop.eup %4548 }
 0xa94   :  { %v3864_v4 = vmul.f32 %v4549_v20, %v3862_v2  ;;  %vm3870_vm2 = vweird.f32 %v4549_v20 }
 0xa95   :  { %vm3871_vm6 = vmor %vm3869_vm5, %vm3870_vm2 }
 0xa96   :  { %v3865_v42 = vmul.f32 %v4549_v20, %v3864_v4 }
 0xa98   :  { %v3866_v30 = vmul.f32 0.5, %v3865_v42 }
 0xa9a   :  { %v3867_v29 = vsub.f32 1.5, %v3866_v30 }
 0xa9c   :  { %v3868_v26 = vmul.f32 %v4549_v20, %v3867_v29 }
 0xa9e   :  { %v3872_v38 = vsel %vm3871_vm6, %v4549_v20, %v3868_v26 }
 0xa9f   :  { %v3873_v5 = vmul.f32 %v3872_v38, %v3861_v63 }
 0xaa1   :  { %v3875_v21 = vmul.f32 %v3873_v5, %v3840_v50  ;;  %v3878_v19 = vperm.slane %v3873_v5, 0 }
 0xaa3   :  { %v3876_v12 = vsub.f32 %v3874_v57, %v3875_v21  ;;  %v3880_v44 = vmul.f32 %v3878_v19, %v5940_v6  ;;  %v3881_v49 = vmul.f32 %v3878_v19, %v5933_v61  ;;  %v3882_v0 = vmul.f32 %v3878_v19, %v5942_v51 }
 0xaa4   :  { %v3883_v7 = vmul.f32 %v3878_v19, %v5946_v28  ;;  %v96_v28 = vstv %s4051_s1  ;;  %v3884_v18 = vmul.f32 %v3878_v19, %v5957_v9 }
 0xaa5   :  { %v3886_v46 = vperm.slane %v3876_v12, 0  ;;  %97 = vst [vmem:[#allocation9] sm:$0x1] %v96_v28 }
 0xaa7   :  { %v3888_v45 = vadd.f32 %v3886_v46, %v3880_v44  ;;  %v3889_v41 = vadd.f32 %v3886_v46, %v3881_v49  ;;  %v3890_v10 = vadd.f32 %v3886_v46, %v3882_v0  ;;  %v3891_v62 = vadd.f32 %v3886_v46, %v3883_v7 }
 0xaa8   :  { %v3892_v33 = vadd.f32 %v3886_v46, %v3884_v18 }
 0xaa9   :  { %v3893_v11 = vmul.f32 0.1, %v3888_v45  ;;  %v3894_v35 = vmul.f32 0.1, %v3889_v41  ;;  %v3895_v14 = vmul.f32 0.1, %v3890_v10 }
 0xaaa   :  { %v3896_v6 = vmul.f32 0.1, %v3891_v62  ;;  %v3897_v53 = vmul.f32 0.1, %v3892_v33 }
 0xaab   :  { %v3898_v1 = vmax.f32 %v3888_v45, %v3893_v11  ;;  %v3899_v34 = vmax.f32 %v3889_v41, %v3894_v35  ;;  %v3900_v61 = vmax.f32 %v3890_v10, %v3895_v14 }
 0xaac   :  { %v3901_v43 = vmax.f32 %v3891_v62, %v3896_v6  ;;  %v3902_v24 = vmax.f32 %v3892_v33, %v3897_v53  ;;  %v4529_v37 = vld [vmem:[#allocation9] ss:$0 sm:$0xff] }
 0xaad   :  { %v3903_v51 = vpack.c.bf16 %v3899_v34, %v3898_v1 }
 0xaae   :  { %v3904_v60 = vpack.c.bf16 %v3901_v43, %v3900_v61  ;;  %v3905_v8 = vpack.c.bf16 %v3902_v24, %v3902_v24 }
 0xaaf   :  { %3982 = vmatmul.bf16.vlgmr.msrb.gmra.mxu0 %v3903_v51 }
 0xabf   :  { %3987 = vmatmul.bf16.gmra.mxu0 %v3904_v60 }
 0xacf   :  { %3992 = vmatmul.bf16.gmra.mxu0 %v3905_v8 }
 0xb2c   :  { %v3983_v36 = vpop.f32.mrf.mxu0 }
 0xb2d   :  { %v3984_v3 = vadd.f32 %v4529_v37, %v3983_v36 }
 0xb2f   :  { %3998 = vst.msk [vmem:[%s4052_s5] sm:$0xff] %vm3997_vm8, %v3984_v3 }
 0xb34   :  { %v3985_v25 = vpop.f32.mrf.mxu0 }
 0xb35   :  { %v3986_v13 = vadd.f32 %v4529_v37, %v3985_v25 }
 0xb37   :  { %3999 = vst.msk [vmem:[%s4052_s5 + $0x8] sm:$0xff] %vm3997_vm8, %v3986_v13 }
 0xb3c   :  { %v3988_v9 = vpop.f32.mrf.mxu0 }
 0xb3d   :  { %v3989_v17 = vadd.f32 %v4529_v37, %v3988_v9 }
 0xb3f   :  { %4000 = vst.msk [vmem:[%s4052_s5 + $0x10] sm:$0xff] %vm3997_vm8, %v3989_v17 }
 0xb44   :  { %v3990_v15 = vpop.f32.mrf.mxu0 }
 0xb45   :  { %v3991_v59 = vadd.f32 %v4529_v37, %v3990_v15 }
 0xb47   :  { %4001 = vst.msk [vmem:[%s4052_s5 + $0x18] sm:$0xff] %vm3997_vm8, %v3991_v59 }
 0xb4c   :  { %v3993_v55 = vpop.f32.mrf.mxu0 }
 0xb4d   :  { %v3994_v40 = vadd.f32 %v4529_v37, %v3993_v55 }
 0xb4f   :  { %4003 = vst.msk [vmem:[%s4052_s5 + $0x20] sm:$0xf] %vm4002_vm9, %v3994_v40 }
 0xb54   :  { %v3995_v39 = vpop.f32.mrf.mxu0 }

</bundles_post_ra>
